<compile_context>
chip_gen: v7x
topology: tpu7x:2x2x1
jax: 0.10.0
libtpu: 0.0.40
codegen_flags: <defaults>
</compile_context>

<pallas_src>
import functools

import jax
import jax.numpy as jnp
from jax import lax
from jax.experimental import pallas as pl
from jax.experimental.pallas import tpu as pltpu

_LANE = 128
_SUBLANE = 8
_PADL = 8          # sublane-aligned left halo width inside the conv2 scratch


def _bottleneck_kernel(x_hbm, w1_ref, b1_ref, w2_ref, b2_ref, w3_ref, b3_ref,
                       out_ref,
                       xbuf, dma_sem, pad_buf,
                       *, dilation, row_tile, valid_h, valid_w, batch_parallel):
    s = pl.program_id(0)          # row-split index (parallel when S == 2)
    n = pl.program_id(1)          # image index
    j = pl.program_id(2)          # row tile within this split
    n_img = pl.num_programs(1)
    num_j = pl.num_programs(2)

    d = dilation
    TH = row_tile
    HR = TH + 2 * d
    _, _, Wp, Cip = xbuf.shape    # (2, HR, Wp, Cin_padded)
    Cpp = w1_ref.shape[1]
    Cop = w3_ref.shape[1]

    row0 = (s * num_j + j) * TH   # first halo row of this tile (x_pad coords)

    def start_fetch(img, row_start, slot_):
        pltpu.make_async_copy(x_hbm.at[img, pl.ds(row_start, HR)],
                              xbuf.at[slot_], dma_sem.at[slot_]).start()

    if batch_parallel:
        # Per-image pipeline; images may be split across cores.
        step = j
        prime = (j == 0)
    else:
        # Per-row-split pipeline over all images (n is sequential on one core),
        # so we can prefetch across the image boundary.
        step = n * num_j + j
        prime = (n == 0) & (j == 0)
    slot = step % 2

    @pl.when(prime)
    def _():
        # Prime the double buffer for this pipeline's first block.
        start_fetch(n, row0, 0)
        # One-time zeroing of the conv2 left/right zero-padding strips; the
        # interior is overwritten each step, these strips never are.
        pad_buf[:, pl.ds(_PADL - d, d), :] = jnp.zeros((HR, d, Cpp), jnp.bfloat16)
        pad_buf[:, pl.ds(_PADL + Wp, d), :] = jnp.zeros((HR, d, Cpp), jnp.bfloat16)

    @pl.when(j + 1 < num_j)       # prefetch the next row tile of this image
    def _():
        start_fetch(n, row0 + TH, 1 - slot)

    if not batch_parallel:
        @pl.when((j + 1 == num_j) & (n + 1 < n_img))   # cross-image prefetch
        def _():
            start_fetch(n + 1, s * num_j * TH, 1 - slot)

    # Wait for this step's block -- descriptor matches the start exactly.
    pltpu.make_async_copy(x_hbm.at[n, pl.ds(row0, HR)],
                          xbuf.at[slot], dma_sem.at[slot]).wait()

    # ---- conv1 (1x1, BN scale folded into w1) + bias + relu on HR halo rows ----
    x_bf = xbuf[slot]                                         # (HR, Wp, Cip) bf16
    a1 = jnp.dot(x_bf.reshape(HR * Wp, Cip), w1_ref[...],
                 preferred_element_type=jnp.float32)
    o1 = jnp.maximum(a1 + b1_ref[...], 0.0).reshape(HR, Wp, Cpp)

    # Zero out-of-image halo rows and padded columns: conv2 zero-pads *o1*.
    row = lax.broadcasted_iota(jnp.int32, (HR, Wp, 1), 0) + row0
    valid = (row >= d) & (row < valid_h + d)
    if valid_w < Wp:
        col = lax.broadcasted_iota(jnp.int32, (HR, Wp, 1), 1)
        valid = valid & (col < valid_w)
    o1 = jnp.where(valid, o1, 0.0)

    # Sublane-aligned interior store (left halo width is 8, Wp % 8 == 0).
    pad_buf[:, pl.ds(_PADL, Wp), :] = o1.astype(jnp.bfloat16)

    # ---- conv2 (3x3, dilation d, padding d) + bias + relu ----
    # Three ky-grouped im2col matmuls, K = 3*Cpp each.
    acc = None
    for ky in range(3):
        grp = jnp.concatenate(
            [pad_buf[pl.ds(ky * d, TH), pl.ds(_PADL - d + kx * d, Wp), :]
             for kx in range(3)], axis=-1).reshape(TH * Wp, 3 * Cpp)
        part = jnp.dot(grp, w2_ref[pl.ds(ky * 3 * Cpp, 3 * Cpp), :],
                       preferred_element_type=jnp.float32)
        acc = part if acc is None else acc + part
    o2 = jnp.maximum(acc + b2_ref[...], 0.0)

    # ---- conv3 (1x1) + bias ----
    a3 = jnp.dot(o2.astype(jnp.bfloat16), w3_ref[...],
                 preferred_element_type=jnp.float32)
    y = (a3 + b3_ref[...]).reshape(TH, Wp, Cop)

    # ---- identity residual (downsample=None) + relu.  Re-read from the VMEM
    # ref at the use point so the x tile isn't held live across the matmuls.
    res = xbuf[slot, pl.ds(d, TH), :, :].astype(jnp.float32)
    out_ref[0] = jnp.maximum(y + res, 0.0).astype(out_ref.dtype)


def _round_up(v, m):
    return (v + m - 1) // m * m


def _pad_to(a, axis, size):
    pad = size - a.shape[axis]
    if pad == 0:
        return a
    widths = [(0, 0)] * a.ndim
    widths[axis] = (0, pad)
    return jnp.pad(a, widths)


def _vmem_estimate_bytes(TH, Wp, Cip, Cpp, Cop, d):
    """Rough per-core VMEM working set for a given row tile."""
    HR = TH + 2 * d
    wtot = _PADL + Wp + d
    return (
        2 * HR * Wp * Cip * 2              # x halo double buffer (bf16)
        + HR * wtot * Cpp * 2              # padded conv2 input scratch (bf16)
        + TH * Wp * 3 * Cpp * 2            # one ky-group im2col slab (bf16)
        + HR * Wp * Cpp * 4                # conv1 f32 intermediate
        + TH * Wp * Cpp * 4                # conv2 f32 accumulator
        + TH * Wp * Cop * 4                # conv3 f32 intermediate
        + 2 * TH * Wp * Cop * 4            # pipelined output block (f32, x2)
        + 2 * ((Cip + 9 * Cpp) * Cpp + Cpp * Cop) * 2   # weights (bf16, x2 buf)
        + 2 * (2 * Cpp + Cop) * 4          # biases
    )


def _vmem_budget_bytes():
    """Generation-aware budget: ~82% of physical VMEM (~52 MiB on 64 MiB v7x,
    ~105 MiB on 128 MiB v5e/v6e)."""
    try:
        cap = int(pltpu.get_tpu_info().vmem_capacity_bytes)
    except Exception:                      # conservative, valid everywhere
        cap = 64 << 20
    return int(cap * 0.82)


def _choose_row_tile(H, Wp, Cip, Cpp, Cop, d, budget):
    """Largest divisor of H fitting ~70% of the budget; prefer one that leaves
    an even number of row tiles (2-way parallel row split -> both v7x
    TensorCores busy) as long as the MXU stays fed (TH*Wp >= 512 rows)."""
    divs = sorted((t for t in range(1, H + 1) if H % t == 0), reverse=True)
    fitting = [t for t in divs
               if _vmem_estimate_bytes(t, Wp, Cip, Cpp, Cop, d) <= 0.70 * budget]
    if not fitting:
        return divs[-1]
    best = fitting[0]
    for t in fitting:
        if (H // t) % 2 == 0 and t * Wp >= 512 and 2 * t >= best:
            return t
    return best


def bottleneck_forward(x_nhwc, params, *, dilation=1, row_tile=None):
    """x_nhwc: (N, H, W, Cin) float32 -> (N, H, W, Cout), Cout == Cin."""
    N, H, W, Cin = x_nhwc.shape
    Cp = params["w1"].shape[1]
    Cout = params["w3"].shape[1]
    assert Cin == Cout, "identity residual requires inplanes == planes * expansion"
    d = int(dilation)
    assert 1 <= d <= _PADL

    # Lane-dense channel padding and sublane-dense width padding.
    Cip = _round_up(Cin, _LANE)
    Cpp = _round_up(Cp, _LANE)
    Cop = _round_up(Cout, _LANE)
    Wp = _round_up(W, _SUBLANE)

    budget = _vmem_budget_bytes()
    if row_tile is None:
        TH = _choose_row_tile(H, Wp, Cip, Cpp, Cop, d, budget)
    else:
        TH = int(row_tile)
        assert H % TH == 0
    j_total = H // TH
    S = 2 if (j_total >= 2 and j_total % 2 == 0) else 1
    J = j_total // S
    HR = TH + 2 * d
    batch_parallel = (S == 1)          # no row split -> parallelize over images

    # ---- fold BN scale into the conv weights (f32), then cast to bf16 ----
    w1 = params["w1"] * params["s1"]                              # (Cin, Cp)
    w1 = _pad_to(_pad_to(w1, 0, Cip), 1, Cpp).astype(jnp.bfloat16)
    w2 = params["w2"] * params["s2"].reshape(1, 1, 1, -1)         # HWIO * out-scale
    w2 = _pad_to(_pad_to(w2, 2, Cpp), 3, Cpp).reshape(9 * Cpp, Cpp)
    w2 = w2.astype(jnp.bfloat16)
    w3 = params["w3"] * params["s3"]                              # (Cp, Cout)
    w3 = _pad_to(_pad_to(w3, 0, Cpp), 1, Cop).astype(jnp.bfloat16)
    b1 = _pad_to(params["b1"], 1, Cpp).astype(jnp.float32)
    b2 = _pad_to(params["b2"], 1, Cpp).astype(jnp.float32)
    b3 = _pad_to(params["b3"], 1, Cop).astype(jnp.float32)

    # ---- input: bf16 staging, padded channels/width, d halo rows top+bottom ----
    x_pad = _pad_to(_pad_to(x_nhwc, 3, Cip), 2, Wp)
    x_pad = jnp.pad(x_pad, ((0, 0), (d, d), (0, 0), (0, 0))).astype(jnp.bfloat16)

    grid = (S, N, J)

    def const(shape):
        return pl.BlockSpec(shape, lambda s_, n_, j_: (0,) * len(shape))

    in_specs = [
        pl.BlockSpec(memory_space=pl.ANY),        # x: manual halo DMA from HBM
        const((Cip, Cpp)), const((1, Cpp)),
        const((9 * Cpp, Cpp)), const((1, Cpp)),
        const((Cpp, Cop)), const((1, Cop)),
    ]
    out_specs = pl.BlockSpec((1, TH, Wp, Cop),
                             lambda s_, n_, j_: (n_, s_ * J + j_, 0, 0))

    if batch_parallel:
        dim_sem = ("parallel", "parallel", "arbitrary")
    else:
        dim_sem = ("parallel", "arbitrary", "arbitrary")

    kernel = functools.partial(
        _bottleneck_kernel, dilation=d, row_tile=TH,
        valid_h=H, valid_w=W, batch_parallel=batch_parallel)

    out = pl.pallas_call(
        kernel,
        out_shape=jax.ShapeDtypeStruct((N, H, Wp, Cop), x_nhwc.dtype),
        grid=grid,
        in_specs=in_specs,
        out_specs=out_specs,
        scratch_shapes=[
            pltpu.VMEM((2, HR, Wp, Cip), jnp.bfloat16),           # x halo 2-buffer
            pltpu.SemaphoreType.DMA((2,)),
            pltpu.VMEM((HR, _PADL + Wp + d, Cpp), jnp.bfloat16),  # padded conv2 in
        ],
        compiler_params=pltpu.CompilerParams(
            dimension_semantics=dim_sem,
            vmem_limit_bytes=budget,
        ),
    )(x_pad, w1, b1, w2, b2, w3, b3)
    return out[:, :, :W, :Cout]


def _ref_bottleneck(x, p, *, dilation):
    """Plain-JAX (f32) reference with identical semantics to the module."""
    o = jnp.einsum('nhwc,co->nhwo', x, p["w1"]) * p["s1"] + p["b1"]
    o = jax.nn.relu(o)
    o = lax.conv_general_dilated(
        o, p["w2"], window_strides=(1, 1),
        padding=[(dilation, dilation), (dilation, dilation)],
        rhs_dilation=(dilation, dilation),
        dimension_numbers=('NHWC', 'HWIO', 'NHWC'))
    o = jax.nn.relu(o * p["s2"] + p["b2"])
    o = jnp.einsum('nhwc,co->nhwo', o, p["w3"]) * p["s3"] + p["b3"]
    return jax.nn.relu(o + x)


def _make_params(key, inplanes, planes, eps=1e-5):
    expansion = 4
    cout = planes * expansion
    ks = jax.random.split(key, 15)
    w1_t = 0.1 * jax.random.normal(ks[0], (planes, inplanes, 1, 1), jnp.float32)
    w2_t = 0.1 * jax.random.normal(ks[1], (planes, planes, 3, 3), jnp.float32)
    w3_t = 0.1 * jax.random.normal(ks[2], (cout, planes, 1, 1), jnp.float32)

    def bn_fold(kg, kb, km, kv, c):
        gamma = 1.0 + 0.1 * jax.random.normal(kg, (c,), jnp.float32)
        beta = 0.1 * jax.random.normal(kb, (c,), jnp.float32)
        mean = 0.1 * jax.random.normal(km, (c,), jnp.float32)
        var = jnp.abs(jax.random.normal(kv, (c,), jnp.float32)) + 0.5
        scale = gamma / jnp.sqrt(var + eps)
        bias = beta - mean * scale
        return scale.reshape(1, c), bias.reshape(1, c)

    s1, b1 = bn_fold(ks[3], ks[4], ks[5], ks[6], planes)
    s2, b2 = bn_fold(ks[7], ks[8], ks[9], ks[10], planes)
    s3, b3 = bn_fold(ks[11], ks[12], ks[13], ks[14], cout)
    return dict(
        w1=jnp.transpose(w1_t[:, :, 0, 0], (1, 0)),    # (Cin, Cp)
        w2=jnp.transpose(w2_t, (2, 3, 1, 0)),          # HWIO
        w3=jnp.transpose(w3_t[:, :, 0, 0], (1, 0)),    # (Cp, Cout)
        s1=s1, b1=b1, s2=s2, b2=b2, s3=s3, b3=b3,
    )


if __name__ == "__main__":
    key = jax.random.PRNGKey(0)
    k_cfg = jax.random.split(key, 4)

    # Config 1: Bottleneck(inplanes=16, planes=4), auto row tile (TH == H,
    # batch-parallel pipeline), dilation 1 and 2.
    N, inplanes, planes, H, W = 2, 16, 4, 16, 16
    params = _make_params(k_cfg[0], inplanes, planes)
    x_nhwc = jax.random.normal(k_cfg[1], (N, H, W, inplanes), jnp.float32)
    for dil in (1, 2):
        out = jax.block_until_ready(bottleneck_forward(x_nhwc, params, dilation=dil))
        exp = _ref_bottleneck(x_nhwc, params, dilation=dil)
        err = float(jnp.max(jnp.abs(out - exp)))
        # bf16 MXU operands / bf16 x staging (f32 accumulation) -> loose tol.
        assert jnp.allclose(out, exp, atol=2e-2, rtol=2e-2), ("cfg1", dil, err)

    # Config 2: forced small row tile to exercise the 2-way row split, the
    # within-image + cross-image DMA prefetch path, and W padding (W=12 -> 16).
    N2, inplanes2, planes2, H2, W2 = 2, 32, 8, 32, 12
    params2 = _make_params(k_cfg[2], inplanes2, planes2)
    x2 = jax.random.normal(k_cfg[3], (N2, H2, W2, inplanes2), jnp.float32)
    out2 = jax.block_until_ready(
        bottleneck_forward(x2, params2, dilation=2, row_tile=8))
    exp2 = _ref_bottleneck(x2, params2, dilation=2)
    err2 = float(jnp.max(jnp.abs(out2 - exp2)))
    assert jnp.allclose(out2, exp2, atol=2e-2, rtol=2e-2), ("cfg2", err2)

    print("KERNEL_OK")
</pallas_src>

<mosaic_0001>
module attributes {stable_mosaic.version = 11 : i64} {
  func.func @_bottleneck_kernel(%arg0: i32, %arg1: i32, %arg2: i32, %arg3: memref<2x18x16x128xbf16, #tpu.memory_space<any>>, %arg4: memref<128x128xbf16, #tpu.memory_space<vmem>>, %arg5: memref<1x128xf32, #tpu.memory_space<vmem>>, %arg6: memref<1152x128xbf16, #tpu.memory_space<vmem>>, %arg7: memref<1x128xf32, #tpu.memory_space<vmem>>, %arg8: memref<128x128xbf16, #tpu.memory_space<vmem>>, %arg9: memref<1x128xf32, #tpu.memory_space<vmem>>, %arg10: memref<1x16x16x128xf32, #tpu.memory_space<vmem>>, %arg11: memref<2x18x16x128xbf16, #tpu.memory_space<vmem>>, %arg12: memref<2x!tpu.dma_semaphore, #tpu.memory_space<semaphore_mem>>, %arg13: memref<18x25x128xbf16, #tpu.memory_space<vmem>>) attributes {dimension_semantics = [#tpu.dimension_semantics<parallel>, #tpu.dimension_semantics<parallel>, #tpu.dimension_semantics<arbitrary>], iteration_bounds = array<i64: 1, 2, 1>, scalar_prefetch = 0 : i64, scratch_operands = 3 : i64, tpu.core_type = #tpu.core_type<tc>, window_params = [{}, {pipeline_mode = #tpu.pipeline_mode<synchronous>, transform_indices = @transform_1, window_bounds = array<i64: 128, 128>}, {pipeline_mode = #tpu.pipeline_mode<synchronous>, transform_indices = @transform_2, window_bounds = array<i64: 1, 128>}, {pipeline_mode = #tpu.pipeline_mode<synchronous>, transform_indices = @transform_3, window_bounds = array<i64: 1152, 128>}, {pipeline_mode = #tpu.pipeline_mode<synchronous>, transform_indices = @transform_4, window_bounds = array<i64: 1, 128>}, {pipeline_mode = #tpu.pipeline_mode<synchronous>, transform_indices = @transform_5, window_bounds = array<i64: 128, 128>}, {pipeline_mode = #tpu.pipeline_mode<synchronous>, transform_indices = @transform_6, window_bounds = array<i64: 1, 128>}, {transform_indices = @transform_7, window_bounds = array<i64: 1, 16, 16, 128>}]} {
    %c1_i32 = arith.constant 1 : i32
    %0 = arith.muli %arg0, %c1_i32 : i32
    %1 = arith.addi %0, %arg2 : i32
    %c16_i32 = arith.constant 16 : i32
    %2 = arith.muli %1, %c16_i32 : i32
    %c0_i32 = arith.constant 0 : i32
    %3 = arith.cmpi eq, %arg2, %c0_i32 : i32
    %c2_i32 = arith.constant 2 : i32
    %c0_i32_0 = arith.constant 0 : i32
    %4 = arith.cmpi eq, %c2_i32, %c0_i32_0 : i32
    %c1_i32_1 = arith.constant 1 : i32
    %5 = arith.select %4, %c1_i32_1, %c2_i32 : i32
    %6 = arith.remsi %arg2, %5 : i32
    %c0_i32_2 = arith.constant 0 : i32
    %7 = arith.cmpi ne, %6, %c0_i32_2 : i32
    %c0_i32_3 = arith.constant 0 : i32
    %8 = arith.cmpi slt, %6, %c0_i32_3 : i32
    %c0_i32_4 = arith.constant 0 : i32
    %9 = arith.cmpi slt, %5, %c0_i32_4 : i32
    %10 = arith.xori %8, %9 : i1
    %11 = arith.andi %10, %7 : i1
    %12 = arith.addi %6, %5 : i32
    %13 = arith.select %11, %12, %6 : i32
    %14 = arith.extui %3 : i1 to i32
    %c0_i32_5 = arith.constant 0 : i32
    %15 = arith.cmpi ne, %14, %c0_i32_5 : i32
    scf.if %15 {
      %c0_i32_71 = arith.constant 0 : i32
      %c0_i32_72 = arith.constant 0 : i32
      %c0_i32_73 = arith.constant 0 : i32
      %c0_i32_74 = arith.constant 0 : i32
      %97 = tpu.memref_slice %arg3[%arg1, %2, %c0_i32_73, %c0_i32_74] : memref<2x18x16x128xbf16, #tpu.memory_space<any>> -> memref<1x18x16x128xbf16, #tpu.memory_space<any>>
      %98 = tpu.memref_squeeze %97 : memref<1x18x16x128xbf16, #tpu.memory_space<any>> -> memref<18x16x128xbf16, #tpu.memory_space<any>>
      %c0_i32_75 = arith.constant 0 : i32
      %c0_i32_76 = arith.constant 0 : i32
      %c0_i32_77 = arith.constant 0 : i32
      %99 = tpu.memref_slice %arg11[%c0_i32_71, %c0_i32_75, %c0_i32_76, %c0_i32_77] : memref<2x18x16x128xbf16, #tpu.memory_space<vmem>> -> memref<1x18x16x128xbf16, #tpu.memory_space<vmem>>
      %100 = tpu.memref_squeeze %99 : memref<1x18x16x128xbf16, #tpu.memory_space<vmem>> -> memref<18x16x128xbf16, #tpu.memory_space<vmem>>
      %101 = tpu.memref_slice %arg12[%c0_i32_72] : memref<2x!tpu.dma_semaphore, #tpu.memory_space<semaphore_mem>> -> memref<1x!tpu.dma_semaphore, #tpu.memory_space<semaphore_mem>>
      %102 = tpu.memref_squeeze %101 : memref<1x!tpu.dma_semaphore, #tpu.memory_space<semaphore_mem>> -> memref<!tpu.dma_semaphore, #tpu.memory_space<semaphore_mem>>
      tpu.enqueue_dma source(%98 : memref<18x16x128xbf16, #tpu.memory_space<any>>) target(%100 : memref<18x16x128xbf16, #tpu.memory_space<vmem>>) target_semaphore(%102 : memref<!tpu.dma_semaphore, #tpu.memory_space<semaphore_mem>>)
      %cst_78 = arith.constant 0.000000e+00 : bf16
      %103 = vector.broadcast %cst_78 : bf16 to vector<18x1x128xbf16>
      %c0_79 = arith.constant 0 : index
      %c7_80 = arith.constant 7 : index
      %c0_81 = arith.constant 0 : index
      %104 = vector.load %arg13[%c0_79, %c7_80, %c0_81] : memref<18x25x128xbf16, #tpu.memory_space<vmem>>, vector<18x1x128xbf16>
      tpu.vector_store %arg13[%c0_79, %c7_80, %c0_81], %103 {strides = array<i32>} : memref<18x25x128xbf16, #tpu.memory_space<vmem>>, vector<18x1x128xbf16>,
      %cst_82 = arith.constant 0.000000e+00 : bf16
      %105 = vector.broadcast %cst_82 : bf16 to vector<18x1x128xbf16>
      %c0_83 = arith.constant 0 : index
      %c24 = arith.constant 24 : index
      %c0_84 = arith.constant 0 : index
      %106 = vector.load %arg13[%c0_83, %c24, %c0_84] : memref<18x25x128xbf16, #tpu.memory_space<vmem>>, vector<18x1x128xbf16>
      tpu.vector_store %arg13[%c0_83, %c24, %c0_84], %105 {strides = array<i32>} : memref<18x25x128xbf16, #tpu.memory_space<vmem>>, vector<18x1x128xbf16>,
    } else {
    }
    %c1_i32_6 = arith.constant 1 : i32
    %16 = arith.addi %arg2, %c1_i32_6 : i32
    %c1_i32_7 = arith.constant 1 : i32
    %17 = arith.cmpi slt, %16, %c1_i32_7 : i32
    %18 = arith.extui %17 : i1 to i32
    %c0_i32_8 = arith.constant 0 : i32
    %19 = arith.cmpi ne, %18, %c0_i32_8 : i32
    scf.if %19 {
      %c16_i32_71 = arith.constant 16 : i32
      %97 = arith.addi %2, %c16_i32_71 : i32
      %c1_i32_72 = arith.constant 1 : i32
      %98 = arith.subi %c1_i32_72, %13 : i32
      %c0_i32_73 = arith.constant 0 : i32
      %c0_i32_74 = arith.constant 0 : i32
      %99 = tpu.memref_slice %arg3[%arg1, %97, %c0_i32_73, %c0_i32_74] : memref<2x18x16x128xbf16, #tpu.memory_space<any>> -> memref<1x18x16x128xbf16, #tpu.memory_space<any>>
      %100 = tpu.memref_squeeze %99 : memref<1x18x16x128xbf16, #tpu.memory_space<any>> -> memref<18x16x128xbf16, #tpu.memory_space<any>>
      %c0_i32_75 = arith.constant 0 : i32
      %c0_i32_76 = arith.constant 0 : i32
      %c0_i32_77 = arith.constant 0 : i32
      %101 = tpu.memref_slice %arg11[%98, %c0_i32_75, %c0_i32_76, %c0_i32_77] : memref<2x18x16x128xbf16, #tpu.memory_space<vmem>> -> memref<1x18x16x128xbf16, #tpu.memory_space<vmem>>
      %102 = tpu.memref_squeeze %101 : memref<1x18x16x128xbf16, #tpu.memory_space<vmem>> -> memref<18x16x128xbf16, #tpu.memory_space<vmem>>
      %103 = tpu.memref_slice %arg12[%98] : memref<2x!tpu.dma_semaphore, #tpu.memory_space<semaphore_mem>> -> memref<1x!tpu.dma_semaphore, #tpu.memory_space<semaphore_mem>>
      %104 = tpu.memref_squeeze %103 : memref<1x!tpu.dma_semaphore, #tpu.memory_space<semaphore_mem>> -> memref<!tpu.dma_semaphore, #tpu.memory_space<semaphore_mem>>
      tpu.enqueue_dma source(%100 : memref<18x16x128xbf16, #tpu.memory_space<any>>) target(%102 : memref<18x16x128xbf16, #tpu.memory_space<vmem>>) target_semaphore(%104 : memref<!tpu.dma_semaphore, #tpu.memory_space<semaphore_mem>>)
    } else {
    }
    %c0_i32_9 = arith.constant 0 : i32
    %c0_i32_10 = arith.constant 0 : i32
    %20 = tpu.memref_slice %arg3[%arg1, %2, %c0_i32_9, %c0_i32_10] : memref<2x18x16x128xbf16, #tpu.memory_space<any>> -> memref<1x18x16x128xbf16, #tpu.memory_space<any>>
    %21 = tpu.memref_squeeze %20 : memref<1x18x16x128xbf16, #tpu.memory_space<any>> -> memref<18x16x128xbf16, #tpu.memory_space<any>>
    %c0_i32_11 = arith.constant 0 : i32
    %c0_i32_12 = arith.constant 0 : i32
    %c0_i32_13 = arith.constant 0 : i32
    %22 = tpu.memref_slice %arg11[%13, %c0_i32_11, %c0_i32_12, %c0_i32_13] : memref<2x18x16x128xbf16, #tpu.memory_space<vmem>> -> memref<1x18x16x128xbf16, #tpu.memory_space<vmem>>
    %23 = tpu.memref_squeeze %22 : memref<1x18x16x128xbf16, #tpu.memory_space<vmem>> -> memref<18x16x128xbf16, #tpu.memory_space<vmem>>
    %24 = tpu.memref_slice %arg12[%13] : memref<2x!tpu.dma_semaphore, #tpu.memory_space<semaphore_mem>> -> memref<1x!tpu.dma_semaphore, #tpu.memory_space<semaphore_mem>>
    %25 = tpu.memref_squeeze %24 : memref<1x!tpu.dma_semaphore, #tpu.memory_space<semaphore_mem>> -> memref<!tpu.dma_semaphore, #tpu.memory_space<semaphore_mem>>
    tpu.wait_dma2 semaphore(%25 : memref<!tpu.dma_semaphore, #tpu.memory_space<semaphore_mem>>) src(%21 : memref<18x16x128xbf16, #tpu.memory_space<any>>) dst(%23 : memref<18x16x128xbf16, #tpu.memory_space<vmem>>)
    %26 = arith.index_cast %13 : i32 to index
    %c0 = arith.constant 0 : index
    %c0_14 = arith.constant 0 : index
    %c0_15 = arith.constant 0 : index
    %27 = vector.load %arg11[%26, %c0, %c0_14, %c0_15] : memref<2x18x16x128xbf16, #tpu.memory_space<vmem>>, vector<1x18x16x128xbf16>
    %28 = vector.shape_cast %27 : vector<1x18x16x128xbf16> to vector<18x16x128xbf16>
    %29 = vector.shape_cast %28 : vector<18x16x128xbf16> to vector<288x128xbf16>
    %c0_16 = arith.constant 0 : index
    %c0_17 = arith.constant 0 : index
    %30 = vector.load %arg4[%c0_16, %c0_17] : memref<128x128xbf16, #tpu.memory_space<vmem>>, vector<128x128xbf16>
    %cst = arith.constant dense<0.000000e+00> : vector<288x128xf32>
    %31 = tpu.matmul %29, %30, %cst {dimension_numbers = #tpu.dot_dimension_numbers<[1], [0], [0], [1], [0, 0, 1, 1], [], []>} : vector<288x128xbf16>, vector<128x128xbf16>, vector<288x128xf32> -> vector<288x128xf32>
    %c0_18 = arith.constant 0 : index
    %c0_19 = arith.constant 0 : index
    %32 = vector.load %arg5[%c0_18, %c0_19] : memref<1x128xf32, #tpu.memory_space<vmem>>, vector<1x128xf32>
    %33 = vector.broadcast %32 : vector<1x128xf32> to vector<288x128xf32>
    %34 = arith.addf %31, %33 : vector<288x128xf32>
    %cst_20 = arith.constant 0.000000e+00 : f32
    %35 = vector.broadcast %cst_20 : f32 to vector<288x128xf32>
    %36 = arith.maximumf %34, %35 : vector<288x128xf32>
    %37 = vector.shape_cast %36 : vector<288x128xf32> to vector<18x16x128xf32>
    %38 = tpu.iota {dimensions = array<i32: 0>} : vector<18x16x1xi32>
    %39 = vector.broadcast %2 : i32 to vector<18x16x1xi32>
    %40 = arith.addi %38, %39 : vector<18x16x1xi32>
    %c1_i32_21 = arith.constant 1 : i32
    %41 = vector.broadcast %c1_i32_21 : i32 to vector<18x16x1xi32>
    %42 = arith.cmpi sge, %40, %41 : vector<18x16x1xi32>
    %c17_i32 = arith.constant 17 : i32
    %43 = vector.broadcast %c17_i32 : i32 to vector<18x16x1xi32>
    %44 = arith.cmpi slt, %40, %43 : vector<18x16x1xi32>
    %45 = arith.andi %42, %44 : vector<18x16x1xi1>
    %cst_22 = arith.constant 0.000000e+00 : f32
    %46 = vector.shape_cast %45 : vector<18x16x1xi1> to vector<18x16x1xi1>
    %47 = vector.broadcast %46 : vector<18x16x1xi1> to vector<18x16x128xi1>
    %48 = vector.broadcast %cst_22 : f32 to vector<18x16x128xf32>
    %49 = arith.select %47, %37, %48 : vector<18x16x128xi1>, vector<18x16x128xf32>
    %50 = arith.truncf %49 : vector<18x16x128xf32> to vector<18x16x128xbf16>
    %c0_23 = arith.constant 0 : index
    %c8 = arith.constant 8 : index
    %c0_24 = arith.constant 0 : index
    %51 = vector.load %arg13[%c0_23, %c8, %c0_24] : memref<18x25x128xbf16, #tpu.memory_space<vmem>>, vector<18x16x128xbf16>
    tpu.vector_store %arg13[%c0_23, %c8, %c0_24], %50 {strides = array<i32>} : memref<18x25x128xbf16, #tpu.memory_space<vmem>>, vector<18x16x128xbf16>,
    %c0_25 = arith.constant 0 : index
    %c7 = arith.constant 7 : index
    %c0_26 = arith.constant 0 : index
    %52 = vector.load %arg13[%c0_25, %c7, %c0_26] : memref<18x25x128xbf16, #tpu.memory_space<vmem>>, vector<16x16x128xbf16>
    %c0_27 = arith.constant 0 : index
    %c8_28 = arith.constant 8 : index
    %c0_29 = arith.constant 0 : index
    %53 = vector.load %arg13[%c0_27, %c8_28, %c0_29] : memref<18x25x128xbf16, #tpu.memory_space<vmem>>, vector<16x16x128xbf16>
    %c0_30 = arith.constant 0 : index
    %c9 = arith.constant 9 : index
    %c0_31 = arith.constant 0 : index
    %54 = vector.load %arg13[%c0_30, %c9, %c0_31] : memref<18x25x128xbf16, #tpu.memory_space<vmem>>, vector<16x16x128xbf16>
    %55 = tpu.concatenate %52, %53, %54 in 2 : vector<16x16x128xbf16>, vector<16x16x128xbf16>, vector<16x16x128xbf16> -> vector<16x16x384xbf16>
    %56 = vector.shape_cast %55 : vector<16x16x384xbf16> to vector<256x384xbf16>
    %c0_32 = arith.constant 0 : index
    %c0_33 = arith.constant 0 : index
    %57 = vector.load %arg6[%c0_32, %c0_33] : memref<1152x128xbf16, #tpu.memory_space<vmem>>, vector<384x128xbf16>
    %cst_34 = arith.constant dense<0.000000e+00> : vector<256x128xf32>
    %58 = tpu.matmul %56, %57, %cst_34 {dimension_numbers = #tpu.dot_dimension_numbers<[1], [0], [0], [1], [0, 0, 1, 1], [], []>} : vector<256x384xbf16>, vector<384x128xbf16>, vector<256x128xf32> -> vector<256x128xf32>
    %c1 = arith.constant 1 : index
    %c7_35 = arith.constant 7 : index
    %c0_36 = arith.constant 0 : index
    %59 = vector.load %arg13[%c1, %c7_35, %c0_36] : memref<18x25x128xbf16, #tpu.memory_space<vmem>>, vector<16x16x128xbf16>
    %c1_37 = arith.constant 1 : index
    %c8_38 = arith.constant 8 : index
    %c0_39 = arith.constant 0 : index
    %60 = vector.load %arg13[%c1_37, %c8_38, %c0_39] : memref<18x25x128xbf16, #tpu.memory_space<vmem>>, vector<16x16x128xbf16>
    %c1_40 = arith.constant 1 : index
    %c9_41 = arith.constant 9 : index
    %c0_42 = arith.constant 0 : index
    %61 = vector.load %arg13[%c1_40, %c9_41, %c0_42] : memref<18x25x128xbf16, #tpu.memory_space<vmem>>, vector<16x16x128xbf16>
    %62 = tpu.concatenate %59, %60, %61 in 2 : vector<16x16x128xbf16>, vector<16x16x128xbf16>, vector<16x16x128xbf16> -> vector<16x16x384xbf16>
    %63 = vector.shape_cast %62 : vector<16x16x384xbf16> to vector<256x384xbf16>
    %c384 = arith.constant 384 : index
    %c0_43 = arith.constant 0 : index
    %64 = vector.load %arg6[%c384, %c0_43] : memref<1152x128xbf16, #tpu.memory_space<vmem>>, vector<384x128xbf16>
    %cst_44 = arith.constant dense<0.000000e+00> : vector<256x128xf32>
    %65 = tpu.matmul %63, %64, %cst_44 {dimension_numbers = #tpu.dot_dimension_numbers<[1], [0], [0], [1], [0, 0, 1, 1], [], []>} : vector<256x384xbf16>, vector<384x128xbf16>, vector<256x128xf32> -> vector<256x128xf32>
    %66 = arith.addf %58, %65 : vector<256x128xf32>
    %c2 = arith.constant 2 : index
    %c7_45 = arith.constant 7 : index
    %c0_46 = arith.constant 0 : index
    %67 = vector.load %arg13[%c2, %c7_45, %c0_46] : memref<18x25x128xbf16, #tpu.memory_space<vmem>>, vector<16x16x128xbf16>
    %c2_47 = arith.constant 2 : index
    %c8_48 = arith.constant 8 : index
    %c0_49 = arith.constant 0 : index
    %68 = vector.load %arg13[%c2_47, %c8_48, %c0_49] : memref<18x25x128xbf16, #tpu.memory_space<vmem>>, vector<16x16x128xbf16>
    %c2_50 = arith.constant 2 : index
    %c9_51 = arith.constant 9 : index
    %c0_52 = arith.constant 0 : index
    %69 = vector.load %arg13[%c2_50, %c9_51, %c0_52] : memref<18x25x128xbf16, #tpu.memory_space<vmem>>, vector<16x16x128xbf16>
    %70 = tpu.concatenate %67, %68, %69 in 2 : vector<16x16x128xbf16>, vector<16x16x128xbf16>, vector<16x16x128xbf16> -> vector<16x16x384xbf16>
    %71 = vector.shape_cast %70 : vector<16x16x384xbf16> to vector<256x384xbf16>
    %c768 = arith.constant 768 : index
    %c0_53 = arith.constant 0 : index
    %72 = vector.load %arg6[%c768, %c0_53] : memref<1152x128xbf16, #tpu.memory_space<vmem>>, vector<384x128xbf16>
    %cst_54 = arith.constant dense<0.000000e+00> : vector<256x128xf32>
    %73 = tpu.matmul %71, %72, %cst_54 {dimension_numbers = #tpu.dot_dimension_numbers<[1], [0], [0], [1], [0, 0, 1, 1], [], []>} : vector<256x384xbf16>, vector<384x128xbf16>, vector<256x128xf32> -> vector<256x128xf32>
    %74 = arith.addf %66, %73 : vector<256x128xf32>
    %c0_55 = arith.constant 0 : index
    %c0_56 = arith.constant 0 : index
    %75 = vector.load %arg7[%c0_55, %c0_56] : memref<1x128xf32, #tpu.memory_space<vmem>>, vector<1x128xf32>
    %76 = vector.broadcast %75 : vector<1x128xf32> to vector<256x128xf32>
    %77 = arith.addf %74, %76 : vector<256x128xf32>
    %cst_57 = arith.constant 0.000000e+00 : f32
    %78 = vector.broadcast %cst_57 : f32 to vector<256x128xf32>
    %79 = arith.maximumf %77, %78 : vector<256x128xf32>
    %80 = arith.truncf %79 : vector<256x128xf32> to vector<256x128xbf16>
    %c0_58 = arith.constant 0 : index
    %c0_59 = arith.constant 0 : index
    %81 = vector.load %arg8[%c0_58, %c0_59] : memref<128x128xbf16, #tpu.memory_space<vmem>>, vector<128x128xbf16>
    %cst_60 = arith.constant dense<0.000000e+00> : vector<256x128xf32>
    %82 = tpu.matmul %80, %81, %cst_60 {dimension_numbers = #tpu.dot_dimension_numbers<[1], [0], [0], [1], [0, 0, 1, 1], [], []>} : vector<256x128xbf16>, vector<128x128xbf16>, vector<256x128xf32> -> vector<256x128xf32>
    %c0_61 = arith.constant 0 : index
    %c0_62 = arith.constant 0 : index
    %83 = vector.load %arg9[%c0_61, %c0_62] : memref<1x128xf32, #tpu.memory_space<vmem>>, vector<1x128xf32>
    %84 = vector.broadcast %83 : vector<1x128xf32> to vector<256x128xf32>
    %85 = arith.addf %82, %84 : vector<256x128xf32>
    %86 = vector.shape_cast %85 : vector<256x128xf32> to vector<16x16x128xf32>
    %87 = arith.index_cast %13 : i32 to index
    %c1_63 = arith.constant 1 : index
    %c0_64 = arith.constant 0 : index
    %c0_65 = arith.constant 0 : index
    %88 = vector.load %arg11[%87, %c1_63, %c0_64, %c0_65] : memref<2x18x16x128xbf16, #tpu.memory_space<vmem>>, vector<1x16x16x128xbf16>
    %89 = vector.shape_cast %88 : vector<1x16x16x128xbf16> to vector<16x16x128xbf16>
    %90 = arith.extf %89 : vector<16x16x128xbf16> to vector<16x16x128xf32>
    %91 = arith.addf %86, %90 : vector<16x16x128xf32>
    %cst_66 = arith.constant 0.000000e+00 : f32
    %92 = vector.broadcast %cst_66 : f32 to vector<16x16x128xf32>
    %93 = arith.maximumf %91, %92 : vector<16x16x128xf32>
    %c0_67 = arith.constant 0 : index
    %c0_68 = arith.constant 0 : index
    %c0_69 = arith.constant 0 : index
    %c0_70 = arith.constant 0 : index
    %94 = vector.load %arg10[%c0_67, %c0_68, %c0_69, %c0_70] : memref<1x16x16x128xf32, #tpu.memory_space<vmem>>, vector<1x16x16x128xf32>
    %95 = vector.shape_cast %94 : vector<1x16x16x128xf32> to vector<16x16x128xf32>
    %96 = vector.shape_cast %93 : vector<16x16x128xf32> to vector<1x16x16x128xf32>
    tpu.vector_store %arg10[%c0_67, %c0_68, %c0_69, %c0_70], %96 {strides = array<i32>} : memref<1x16x16x128xf32, #tpu.memory_space<vmem>>, vector<1x16x16x128xf32>,
    return
  }
  func.func @transform_1(%arg0: i32, %arg1: i32, %arg2: i32) -> (i32, i32) {
    %c0_i32 = arith.constant 0 : i32
    %c0_i32_0 = arith.constant 0 : i32
    %c0_i32_1 = arith.constant 0 : i32
    return %c0_i32, %c0_i32_0 : i32, i32
  }
  func.func @transform_2(%arg0: i32, %arg1: i32, %arg2: i32) -> (i32, i32) {
    %c0_i32 = arith.constant 0 : i32
    %c0_i32_0 = arith.constant 0 : i32
    %c0_i32_1 = arith.constant 0 : i32
    return %c0_i32, %c0_i32_0 : i32, i32
  }
  func.func @transform_3(%arg0: i32, %arg1: i32, %arg2: i32) -> (i32, i32) {
    %c0_i32 = arith.constant 0 : i32
    %c0_i32_0 = arith.constant 0 : i32
    %c0_i32_1 = arith.constant 0 : i32
    return %c0_i32, %c0_i32_0 : i32, i32
  }
  func.func @transform_4(%arg0: i32, %arg1: i32, %arg2: i32) -> (i32, i32) {
    %c0_i32 = arith.constant 0 : i32
    %c0_i32_0 = arith.constant 0 : i32
    %c0_i32_1 = arith.constant 0 : i32
    return %c0_i32, %c0_i32_0 : i32, i32
  }
  func.func @transform_5(%arg0: i32, %arg1: i32, %arg2: i32) -> (i32, i32) {
    %c0_i32 = arith.constant 0 : i32
    %c0_i32_0 = arith.constant 0 : i32
    %c0_i32_1 = arith.constant 0 : i32
    return %c0_i32, %c0_i32_0 : i32, i32
  }
  func.func @transform_6(%arg0: i32, %arg1: i32, %arg2: i32) -> (i32, i32) {
    %c0_i32 = arith.constant 0 : i32
    %c0_i32_0 = arith.constant 0 : i32
    %c0_i32_1 = arith.constant 0 : i32
    return %c0_i32, %c0_i32_0 : i32, i32
  }
  func.func @transform_7(%arg0: i32, %arg1: i32, %arg2: i32) -> (i32, i32, i32, i32) {
    %c1_i32 = arith.constant 1 : i32
    %0 = arith.muli %arg0, %c1_i32 : i32
    %1 = arith.addi %0, %arg2 : i32
    %c0_i32 = arith.constant 0 : i32
    %c0_i32_0 = arith.constant 0 : i32
    %c0_i32_1 = arith.constant 0 : i32
    return %arg1, %1, %c0_i32, %c0_i32_0 : i32, i32, i32, i32
  }
}

</mosaic_0001>

<bundles_post_ra>
// kernel: tpu_custom_call.1
= control target key start
LH: loop header
LB: loop body
LE: loop exit
PB: predicated region body
PF: predicated region fallthrough
CT: control target
= control target key end

     0   :  { %s10361_s0 = inlined_call_operand.hbm [shape: bf16[2,18,16,128], index: 0, kind: input, shape index: {}]   ;;  %s10362_s1 = inlined_call_operand.hbm [shape: bf16[128,128], index: 1, kind: input, shape index: {}]   ;;  %s10363_s2 = inlined_call_operand.vmem [shape: f32[1,128], index: 2, kind: input, shape index: {}]   ;;  %s10364_s3 = inlined_call_operand.hbm [shape: bf16[1152,128], index: 3, kind: input, shape index: {}]   ;;  %s10365_s4 = inlined_call_operand.vmem [shape: f32[1,128], index: 4, kind: input, shape index: {}]   ;;  %s10366_s5 = inlined_call_operand.hbm [shape: bf16[128,128], index: 5, kind: input, shape index: {}]   ;;  %s10367_s6 = inlined_call_operand.vmem [shape: f32[1,128], index: 6, kind: input, shape index: {}]   ;;  %s10368_s7 = inlined_call_operand.hbm [shape: f32[2,16,16,128], index: 7, kind: output, shape index: {}]  }
   0x1   :  { %10386 = sst [smem:[#allocation48_spill]] %s10364_s3 }
   0x2   :  { %12 = vsyncpa [#allocation6], 0 }
   0x3   :  { %13 = vsyncpa [#allocation9], 0 }
   0x4   :  { %14 = vsyncpa [#allocation7], 0 }
   0x5   :  { %16 = vsyncpa [#allocation7 + $0x1], 0  ;;  %s8731_s24 = smov 0   ;;  %s8733_s25 = smov 0  }
   0x6   :  { %s8735_s26 = smov 0   ;;  %s8737_s27 = smov 0  }
   0x7   :  { %s8739_s28 = smov 0   ;;  %s8741_s29 = smov 0  }
   0x8 LB: > { %10387 = sst [smem:[#allocation22_spill]] %s8667_s26  ;;  %s6810_s30 = sadd.s32 4294967295, %s8679_s29   ;;  %s8679_s29 = sphi %s8741_s29, %s22_s29   ;;  %s8675_s28 = sphi %s8739_s28, %s10484_s28   ;;  %s8671_s27 = sphi %s8737_s27, %s10483_s27   ;;  %s8667_s26 = sphi %s8735_s26, %s10482_s26   ;;  %s8663_s25 = sphi %s8733_s25, %s10486_s25   ;;  %s8659_s24 = sphi %s8731_s24, %s10485_s24  }
   0x9   : > { %10388 = sst [smem:[#allocation23_spill]] %s8675_s28  ;;  %s6811_s8 = sadd.s32 4294967294, %s8679_s29  }
   0xa   : > { %s37_s9 = sadd.s32 1, %s8675_s28  ;;  %s178_s10 = sadd.s32 1, %s8667_s26 }
   0xb   : > { %p39_p0 = scmp.ge.s32.totalorder %s37_s9, 2  ;;  %p188_p1 = scmp.ne.s32.totalorder %s8667_s26, %s8663_s25 }
   0xc   : > { %p189_p2 = scmp.eq.s32.totalorder %s6810_s30, 1  ;;  %p194_p3 = scmp.ne.s32.totalorder %s8663_s25, %s8659_s24 }
   0xd   : > { %s10488_s9 = smov (%p39_p0, %s37_s9), 0  ;;  %p195_p5 = scmp.eq.s32.totalorder %s6811_s8, 1 }
   0xe   : > { %10389 = sst [smem:[#allocation24_spill]] %s10488_s9  ;;  %p8771_p4 = por %p189_p2, %p188_p1 }
   0xf   : > { %s173_s12 = ssub.s32 %s8675_s28, %s10488_s9  ;;  %p6812_p6 = scmp.ge.s32.totalorder %s8679_s29, 1 }
  0x10   : > { %s10390_s11 = scalar_select %p8771_p4, 1, 0 }
  0x11   : > { %p176_p7 = scmp.eq.s32.totalorder %s173_s12, 0  ;;  %p8778_p8 = por %p195_p5, %p194_p3 }
  0x12   : > { %p202_p9 = scmp.lt.s32.totalorder %s8679_s29, 3  ;;  %p8790_p11 = scmp.eq.s32.totalorder %s6810_s30, 0 }
  0x13   : > { %s10391_s13 = scalar_select %p8778_p8, 1, 0 }
  0x14   : > { %s8784_s14 = scalar_select %p176_p7, %s8667_s26, %s178_s10  }
  0x15   : > { %p8786_p10 = pnand %p6812_p6, %p202_p9  ;;  %s8681_s17 = smov [#allocation8]  }
  0x16   : > { %10392 = sst [smem:[#allocation25_spill]] %s8784_s14  ;;  %s230_s18 = sshll.u32 %s8681_s17, 4  ;;  %s231_s18 = int_to_ptr.vmem [resolvable:$true] %s230_s18 }
  0x17   : > { %s10393_s15 = scalar_select %p8786_p10, 1, 0 }
  0x18   : > { %s10394_s16 = scalar_select %p8790_p11, 1, 0 }
  0x19   : > { %p8091_p12 = pneg %p8786_p10  ;;  %s8682_s20 = smov [#allocation5]  }
  0x1a   : > { %s214_s21 = sshll.u32 %s8682_s20, 4  ;;  %s10396_s3 = sld [smem:[#allocation48_spill]]  ;;  %s215_s21 = int_to_ptr.vmem [resolvable:$true] %s214_s21 }
  0x1b   : > { %p8798_p13 = pnand %p8790_p11, %p8091_p12 }
  0x1d   : > { %p8810_p1 = pneg %p8798_p13 }
  0x20   : > { %s8483_s30 = scalar_lea.hbm %s10396_s3, 9216 }
  0x21   : > { %p8484_p0 = scmp.ne.s32.totalorder %s10396_s3, %s8483_s30  ;;  %p8490_p5 = scmp.lt.u32.totalorder %s8483_s30, %s10396_s3 }
  0x23   : > { %p8486_p2 = pnand %p8810_p1, %p8484_p0 }
  0x25   : > { %p8487_p3 = pneg %p8486_p2 }
  0x27   : > { %p8492_p6 = pnand %p8490_p5, %p8487_p3 }
  0x29   : > { %8495 = shalt.err (!%p8492_p6)
}
  0x2a   : > { %s8496_s20 = scalar_lea.vmem %s231_s18, 9216  ;;  %p8504_p8 = scmp.lt.s32.totalorder %s231_s18, %s231_s18 }
  0x2b   : > { %p8497_p7 = scmp.ne.s32.totalorder %s231_s18, %s8496_s20  ;;  %p8505_p4 = scmp.lt.s32.totalorder %s8496_s20, %s8496_s20 }
  0x2d   : > { %p8499_p9 = pnand %p8497_p7, %p8810_p1  ;;  %p8506_p11 = por %p8505_p4, %p8504_p8 }
  0x2f   : > { %p8500_p12 = pneg %p8499_p9 }
  0x31   : > { %p8507_p10 = pnand %p8506_p11, %p8500_p12 }
  0x33   : > { %8510 = shalt.err (!%p8507_p10)
}
  0x34   : > { %s8683_s22 = smov 64   ;;  %s8684_s23 = smov 4  }
  0x35   : > { %8097 = dma.hbm_to_vmem [thread:$0]  (!%p8798_p13), %s10396_s3, 9216, %s231_s18, [#allocation9], %s8683_s22, %s8683_s22, %s8684_s23  }
  0x36   : > { %s8511_s17 = scalar_lea.hbm %s10362_s1, 1024 }
  0x37   : > { %p8512_p4 = scmp.ne.s32.totalorder %s10362_s1, %s8511_s17  ;;  %p8518_p11 = scmp.lt.u32.totalorder %s8511_s17, %s10362_s1 }
  0x39   : > { %p8514_p8 = pnand %p8512_p4, %p8810_p1 }
  0x3b   : > { %p8515_p10 = pneg %p8514_p8 }
  0x3d   : > { %p8520_p0 = pnand %p8518_p11, %p8515_p10 }
  0x3f   : > { %8523 = shalt.err (!%p8520_p0)
}
  0x40   : > { %s8524_s9 = scalar_lea.vmem %s215_s21, 1024  ;;  %p8532_p6 = scmp.lt.s32.totalorder %s215_s21, %s215_s21 }
  0x41   : > { %p8525_p2 = scmp.ne.s32.totalorder %s215_s21, %s8524_s9  ;;  %p8533_p7 = scmp.lt.s32.totalorder %s8524_s9, %s8524_s9 }
  0x43   : > { %p8527_p3 = pnand %p8525_p2, %p8810_p1  ;;  %p8534_p9 = por %p8533_p7, %p8532_p6 }
  0x45   : > { %p8528_p5 = pneg %p8527_p3 }
  0x47   : > { %p8535_p12 = pnand %p8534_p9, %p8528_p5 }
  0x49   : > { %8538 = shalt.err (!%p8535_p12)
}
  0x4a   : > { %8094 = dma.hbm_to_vmem [thread:$0]  (!%p8798_p13), %s10362_s1, 1024, %s215_s21, [#allocation6], %s8683_s22, %s8683_s22, %s8684_s23  }
  0x4b   : > { %s8685_s14 = smov [#allocation10]   ;;  %s8539_s10 = scalar_lea.hbm %s10366_s5, 1024 }
  0x4c   : > { %s246_s18 = sshll.u32 %s8685_s14, 4  ;;  %p8540_p4 = scmp.ne.s32.totalorder %s10366_s5, %s8539_s10  ;;  %s247_s18 = int_to_ptr.vmem [resolvable:$true] %s246_s18 }
  0x4d   : > { %p8546_p11 = scmp.lt.u32.totalorder %s8539_s10, %s10366_s5 }
  0x4e   : > { %p8542_p8 = pnand %p8540_p4, %p8810_p1 }
  0x50   : > { %p8543_p10 = pneg %p8542_p8 }
  0x52   : > { %p8548_p0 = pnand %p8546_p11, %p8543_p10 }
  0x54   : > { %8551 = shalt.err (!%p8548_p0)
}
  0x55   : > { %s8552_s21 = scalar_lea.vmem %s247_s18, 1024  ;;  %p8560_p6 = scmp.lt.s32.totalorder %s247_s18, %s247_s18 }
  0x56   : > { %p8553_p2 = scmp.ne.s32.totalorder %s247_s18, %s8552_s21  ;;  %p8561_p7 = scmp.lt.s32.totalorder %s8552_s21, %s8552_s21 }
  0x58   : > { %p8555_p3 = pnand %p8553_p2, %p8810_p1  ;;  %p8562_p9 = por %p8561_p7, %p8560_p6 }
  0x5a   : > { %p8556_p5 = pneg %p8555_p3 }
  0x5c   : > { %p8563_p12 = pnand %p8562_p9, %p8556_p5 }
  0x5e   : > { %8566 = shalt.err (!%p8563_p12)
}
  0x5f   : > { %8100 = dma.hbm_to_vmem [thread:$0]  (!%p8798_p13), %s10366_s5, 1024, %s247_s18, [#allocation9], %s8683_s22, %s8683_s22, %s8684_s23  }
  0x60   : > { %p10398_p4 = scmp.ne.s32.totalorder %s10393_s15, 0 }
  0x62   : > { %265 = sbr.rel (%p10398_p4) target bundleno = 1375 (0x55f), region = 44 }
  0x69   : > { %p10399_p1 = scmp.ne.s32.totalorder %s10394_s16, 0 }
  0x6b   : > { %8644 = dma.done.wait (%p10399_p1), [#allocation6], 1024  }
  0x6c   : > { %8646 = vsyncadd (%p10399_p1), [#allocation6], 4294966272 }
  0x6d   : > { %8648 = dma.done.wait (%p10399_p1), [#allocation9], 10240  }
  0x6e   : > { %8650 = vsyncadd (%p10399_p1), [#allocation9], 4294957056  ;;  %s295_s19 = sand.u32 1, %s8663_s25   ;;  %s7165_s12 = smul.u32 2304, %s8671_s27  ;;  %vm335_vm0 = vcmask 1043459  }
  0x6f   : > { %s8885_s15 = sshll.u32 %s295_s19, 8  ;;  %vm336_vm1 = vsmask.f32 7950  ;;  %s8686_s14 = smov [#allocation2]  }
  0x70   : > { %s323_s28 = scalar_lea.hbm %s10361_s0, %s7165_s12  ;;  %s331_s18 = sshll.u32 %s8686_s14, 4  ;;  %s332_s18 = int_to_ptr.vmem [resolvable:$true] %s331_s18 }
  0x71   : > { %s8567_s30 = scalar_lea.hbm %s323_s28, 2304  ;;  %s8569_s10 = scalar_lea.hbm %s10361_s0, 4608 }
  0x72   : > { %p8568_p13 = scmp.ne.s32.totalorder %s323_s28, %s8567_s30  ;;  %p8570_p8 = scmp.lt.u32.totalorder %s323_s28, %s10361_s0 }
  0x73   : > { %p8571_p10 = scmp.lt.u32.totalorder %s8569_s10, %s8567_s30  ;;  %p8573_p0 = scmp.lt.u32.totalorder %s8567_s30, %s323_s28 }
  0x75   : > { %p8572_p11 = por %p8571_p10, %p8570_p8 }
  0x77   : > { %p8574_p2 = por %p8573_p0, %p8572_p11 }
  0x79   : > { %p8575_p3 = pnand %p8574_p2, %p8568_p13 }
  0x7b   : > { %8578 = shalt.err (!%p8575_p3)  }
  0x7c   : > { %s8579_s9 = scalar_lea.vmem %s332_s18, 2304  ;;  %s8583_s21 = scalar_lea.vmem %s332_s18, 4608 }
  0x7d   : > { %p8580_p5 = scmp.ne.s32.totalorder %s332_s18, %s8579_s9  ;;  %p8584_p6 = scmp.lt.s32.totalorder %s332_s18, %s332_s18 }
  0x7e   : > { %p8585_p7 = scmp.lt.s32.totalorder %s8583_s21, %s8579_s9 }
  0x80   : > { %p8586_p9 = por %p8585_p7, %p8584_p6 }
  0x82   : > { %p8587_p12 = pnand %p8586_p9, %p8580_p5 }
  0x84   : > { %8590 = shalt.err (!%p8587_p12)  }
  0x85   : > { %334 = dma.hbm_to_vmem [thread:$0]  %s323_s28, 2304, %s332_s18, [#allocation3]  ;;  %vm8898_vm2 = vmand %vm335_vm0, %vm336_vm1  ;;  %vm393_vm3 = vsmask.f32 256  ;;  %v338_v1 = vld [vmem:[#allocation4] sm:$0x8] }
  0x86   : > { %v341_v2 = vld [vmem:[#allocation4 + $0x10] sm:$0x8]  ;;  %v344_v3 = vld [vmem:[#allocation4 + $0x20] sm:$0x8]  ;;  %v339_v4 = vsel %vm8898_vm2, 0, %v338_v1  ;;  %vm392_vm4 = vcmask 1040384  }
  0x87   : > { %v342_v5 = vsel %vm8898_vm2, 0, %v341_v2  ;;  %v345_v6 = vsel %vm8898_vm2, 0, %v344_v3  ;;  %v347_v7 = vld [vmem:[#allocation4 + $0x30] sm:$0x8]  ;;  %340 = vst [vmem:[#allocation4] sm:$0x8] %v339_v4  ;;  %vm8932_vm5 = vmand %vm392_vm4, %vm393_vm3 }
  0x88   : > { %343 = vst [vmem:[#allocation4 + $0x10] sm:$0x8] %v342_v5  ;;  %346 = vst [vmem:[#allocation4 + $0x20] sm:$0x8] %v345_v6  ;;  %v348_v8 = vsel %vm8898_vm2, 0, %v347_v7  ;;  %s8981_s3 = scalar_lea.vmem [#allocation11], %s8885_s15 }
  0x89   : > { %v350_v9 = vld [vmem:[#allocation4 + $0x40] sm:$0x8]  ;;  %v353_v10 = vld [vmem:[#allocation4 + $0x50] sm:$0x8]  ;;  %349 = vst [vmem:[#allocation4 + $0x30] sm:$0x8] %v348_v8 }
  0x8a   : > { %v351_v11 = vsel %vm8898_vm2, 0, %v350_v9  ;;  %v354_v12 = vsel %vm8898_vm2, 0, %v353_v10  ;;  %v356_v13 = vld [vmem:[#allocation4 + $0x60] sm:$0x8]  ;;  %v359_v14 = vld [vmem:[#allocation4 + $0x70] sm:$0x8] }
  0x8b   : > { %352 = vst [vmem:[#allocation4 + $0x40] sm:$0x8] %v351_v11  ;;  %355 = vst [vmem:[#allocation4 + $0x50] sm:$0x8] %v354_v12  ;;  %v357_v15 = vsel %vm8898_vm2, 0, %v356_v13  ;;  %v360_v16 = vsel %vm8898_vm2, 0, %v359_v14 }
  0x8c   : > { %v362_v17 = vld [vmem:[#allocation4 + $0x80] sm:$0x8]  ;;  %v365_v18 = vld [vmem:[#allocation4 + $0x90] sm:$0x8]  ;;  %358 = vst [vmem:[#allocation4 + $0x60] sm:$0x8] %v357_v15 }
  0x8d   : > { %361 = vst [vmem:[#allocation4 + $0x70] sm:$0x8] %v360_v16  ;;  %v363_v19 = vsel %vm8898_vm2, 0, %v362_v17  ;;  %v366_v20 = vsel %vm8898_vm2, 0, %v365_v18  ;;  %v368_v21 = vld [vmem:[#allocation4 + $0xa0] sm:$0x8] }
  0x8e   : > { %v371_v22 = vld [vmem:[#allocation4 + $0xb0] sm:$0x8]  ;;  %364 = vst [vmem:[#allocation4 + $0x80] sm:$0x8] %v363_v19  ;;  %367 = vst [vmem:[#allocation4 + $0x90] sm:$0x8] %v366_v20 }
  0x8f   : > { %v369_v23 = vsel %vm8898_vm2, 0, %v368_v21  ;;  %v372_v24 = vsel %vm8898_vm2, 0, %v371_v22  ;;  %v374_v25 = vld [vmem:[#allocation4 + $0xc0] sm:$0x8]  ;;  %v377_v26 = vld [vmem:[#allocation4 + $0xd0] sm:$0x8] }
  0x90   : > { %370 = vst [vmem:[#allocation4 + $0xa0] sm:$0x8] %v369_v23  ;;  %373 = vst [vmem:[#allocation4 + $0xb0] sm:$0x8] %v372_v24  ;;  %v375_v27 = vsel %vm8898_vm2, 0, %v374_v25  ;;  %v378_v28 = vsel %vm8898_vm2, 0, %v377_v26 }
  0x91   : > { %v380_v29 = vld [vmem:[#allocation4 + $0xe0] sm:$0x8]  ;;  %v383_v30 = vld [vmem:[#allocation4 + $0xf0] sm:$0x8]  ;;  %376 = vst [vmem:[#allocation4 + $0xc0] sm:$0x8] %v375_v27 }
  0x92   : > { %379 = vst [vmem:[#allocation4 + $0xd0] sm:$0x8] %v378_v28  ;;  %v381_v32 = vsel %vm8898_vm2, 0, %v380_v29  ;;  %v384_v33 = vsel %vm8898_vm2, 0, %v383_v30  ;;  %v386_v34 = vld [vmem:[#allocation4 + $0x100] sm:$0x8] }
  0x93   : > { %v389_v35 = vld [vmem:[#allocation4 + $0x110] sm:$0x8]  ;;  %382 = vst [vmem:[#allocation4 + $0xe0] sm:$0x8] %v381_v32  ;;  %385 = vst [vmem:[#allocation4 + $0xf0] sm:$0x8] %v384_v33 }
  0x94   : > { %v387_v36 = vsel %vm8898_vm2, 0, %v386_v34  ;;  %v390_v37 = vsel %vm8898_vm2, 0, %v389_v35  ;;  %v395_v38 = vld [vmem:[#allocation4 + $0xc] sm:$0x1]  ;;  %v398_v39 = vld [vmem:[#allocation4 + $0x1c] sm:$0x1] }
  0x95   : > { %388 = vst [vmem:[#allocation4 + $0x100] sm:$0x8] %v387_v36  ;;  %391 = vst [vmem:[#allocation4 + $0x110] sm:$0x8] %v390_v37  ;;  %v396_v40 = vsel %vm8932_vm5, 0, %v395_v38  ;;  %v399_v41 = vsel %vm8932_vm5, 0, %v398_v39 }
  0x96   : > { %v401_v42 = vld [vmem:[#allocation4 + $0x2c] sm:$0x1]  ;;  %v404_v43 = vld [vmem:[#allocation4 + $0x3c] sm:$0x1]  ;;  %397 = vst [vmem:[#allocation4 + $0xc] sm:$0x1] %v396_v40 }
  0x97   : > { %400 = vst [vmem:[#allocation4 + $0x1c] sm:$0x1] %v399_v41  ;;  %v402_v44 = vsel %vm8932_vm5, 0, %v401_v42  ;;  %v405_v45 = vsel %vm8932_vm5, 0, %v404_v43  ;;  %v407_v46 = vld [vmem:[#allocation4 + $0x4c] sm:$0x1] }
  0x98   : > { %v410_v47 = vld [vmem:[#allocation4 + $0x5c] sm:$0x1]  ;;  %403 = vst [vmem:[#allocation4 + $0x2c] sm:$0x1] %v402_v44  ;;  %406 = vst [vmem:[#allocation4 + $0x3c] sm:$0x1] %v405_v45 }
  0x99   : > { %v408_v48 = vsel %vm8932_vm5, 0, %v407_v46  ;;  %v411_v49 = vsel %vm8932_vm5, 0, %v410_v47  ;;  %v413_v50 = vld [vmem:[#allocation4 + $0x6c] sm:$0x1]  ;;  %v416_v51 = vld [vmem:[#allocation4 + $0x7c] sm:$0x1] }
  0x9a   : > { %409 = vst [vmem:[#allocation4 + $0x4c] sm:$0x1] %v408_v48  ;;  %412 = vst [vmem:[#allocation4 + $0x5c] sm:$0x1] %v411_v49  ;;  %v414_v52 = vsel %vm8932_vm5, 0, %v413_v50  ;;  %v417_v53 = vsel %vm8932_vm5, 0, %v416_v51 }
  0x9b   : > { %v419_v54 = vld [vmem:[#allocation4 + $0x8c] sm:$0x1]  ;;  %v422_v55 = vld [vmem:[#allocation4 + $0x9c] sm:$0x1]  ;;  %415 = vst [vmem:[#allocation4 + $0x6c] sm:$0x1] %v414_v52 }
  0x9c   : > { %418 = vst [vmem:[#allocation4 + $0x7c] sm:$0x1] %v417_v53  ;;  %v420_v56 = vsel %vm8932_vm5, 0, %v419_v54  ;;  %v423_v57 = vsel %vm8932_vm5, 0, %v422_v55  ;;  %v425_v58 = vld [vmem:[#allocation4 + $0xac] sm:$0x1] }
  0x9d   : > { %v428_v59 = vld [vmem:[#allocation4 + $0xbc] sm:$0x1]  ;;  %421 = vst [vmem:[#allocation4 + $0x8c] sm:$0x1] %v420_v56  ;;  %424 = vst [vmem:[#allocation4 + $0x9c] sm:$0x1] %v423_v57 }
  0x9e   : > { %v426_v60 = vsel %vm8932_vm5, 0, %v425_v58  ;;  %v429_v61 = vsel %vm8932_vm5, 0, %v428_v59  ;;  %v431_v62 = vld [vmem:[#allocation4 + $0xcc] sm:$0x1]  ;;  %v434_v63 = vld [vmem:[#allocation4 + $0xdc] sm:$0x1] }
  0x9f   : > { %427 = vst [vmem:[#allocation4 + $0xac] sm:$0x1] %v426_v60  ;;  %430 = vst [vmem:[#allocation4 + $0xbc] sm:$0x1] %v429_v61  ;;  %v432_v0 = vsel %vm8932_vm5, 0, %v431_v62  ;;  %v435_v1 = vsel %vm8932_vm5, 0, %v434_v63 }
  0xa0   : > { %v437_v2 = vld [vmem:[#allocation4 + $0xec] sm:$0x1]  ;;  %v440_v3 = vld [vmem:[#allocation4 + $0xfc] sm:$0x1]  ;;  %433 = vst [vmem:[#allocation4 + $0xcc] sm:$0x1] %v432_v0 }
  0xa1   : > { %436 = vst [vmem:[#allocation4 + $0xdc] sm:$0x1] %v435_v1  ;;  %v438_v4 = vsel %vm8932_vm5, 0, %v437_v2  ;;  %v441_v5 = vsel %vm8932_vm5, 0, %v440_v3  ;;  %v443_v6 = vld [vmem:[#allocation4 + $0x10c] sm:$0x1] }
  0xa2   : > { %v446_v7 = vld [vmem:[#allocation4 + $0x11c] sm:$0x1]  ;;  %439 = vst [vmem:[#allocation4 + $0xec] sm:$0x1] %v438_v4  ;;  %442 = vst [vmem:[#allocation4 + $0xfc] sm:$0x1] %v441_v5 }
  0xa3   : > { %v444_v8 = vsel %vm8932_vm5, 0, %v443_v6  ;;  %v447_v9 = vsel %vm8932_vm5, 0, %v446_v7 }
  0xa4   : > { %445 = vst [vmem:[#allocation4 + $0x10c] sm:$0x1] %v444_v8  ;;  %448 = vst [vmem:[#allocation4 + $0x11c] sm:$0x1] %v447_v9 }
  0xa5   : > { %8651 = dma.done.wait [#allocation3], 2304 }
  0xa6   : > { %8652 = vsyncadd [#allocation3], 4294964992  ;;  %v8169_v10 = vld [vmem:[#allocation5] sm:$0xff]   ;;  %v8170_v11 = vld [vmem:[#allocation5 + $0x8] sm:$0xff]   ;;  %vm1495_vm6 = vcmask 1042432   ;;  %s7198_s14 = sshll.u32 %s8671_s27, 12 }
  0xa7   : > { %7657 = vmatprep.subr.bf16.mxu0 %v8169_v10  ;;  %7901 = vmatprep.subr.bf16.mxu1 %v8169_v10  ;;  %v8171_v12 = vld [vmem:[#allocation5 + $0x10] sm:$0xff]   ;;  %v8172_v13 = vld [vmem:[#allocation5 + $0x18] sm:$0xff]   ;;  %v485_v14 = vld [vmem:[#allocation2] sm:$0xff]  ;;  %vm1544_vm7 = vsmask.f32 4352  ;;  %s6677_s18 = sshll.u32 %s8981_s3, 4  ;;  %s10306_s8 = scalar_lea.hbm %s10368_s7, %s7198_s14  ;;  %s10308_s18 = int_to_ptr.vmem [resolvable:$true] %s6677_s18 }
  0xa8   : > { %7658 = vmatpush3.bf16.msra.mxu0 %v8169_v10  ;;  %7909 = vmatpush3.bf16.msra.mxu1 %v8169_v10  ;;  %v493_v15 = vld [vmem:[#allocation2 + $0x40] sm:$0xff]  ;;  %v8174_v17 = vld [vmem:[#allocation5 + $0x28] sm:$0xff]   ;;  %v8175_v18 = vld [vmem:[#allocation5 + $0x30] sm:$0xff]   ;;  %s10315_s27 = scalar_lea.sflag [#allocation7], %s295_s19  ;;  %s8591_s10 = scalar_lea.vmem %s10308_s18, 4096 }
  0xa9   : > { %7659 = vmatprep.subr.bf16.mxu0 %v8170_v11  ;;  %7902 = vmatprep.subr.bf16.mxu1 %v8170_v11  ;;  %v8173_v16 = vld [vmem:[#allocation5 + $0x20] sm:$0xff]   ;;  %v8176_v19 = vld [vmem:[#allocation5 + $0x38] sm:$0xff]   ;;  %v486_v20 = vld [vmem:[#allocation2 + $0x8] sm:$0xff]  ;;  %p8592_p4 = scmp.ne.s32.totalorder %s10308_s18, %s8591_s10  ;;  %p10479_p1 = scmp.ne.s32.totalorder %s10390_s11, 0 }
  0xaa   : > { %7673 = vmatprep.mubr.bf16.mxu0 %v485_v14  ;;  %7689 = vmatprep.mubr.bf16.mxu1 %v493_v15  ;;  %v494_v21 = vld [vmem:[#allocation2 + $0x48] sm:$0xff]  ;;  %v487_v22 = vld [vmem:[#allocation2 + $0x10] sm:$0xff]  ;;  %v488_v24 = vld [vmem:[#allocation2 + $0x18] sm:$0xff]  ;;  %s8688_s17 = smov [#allocation11]  }
  0xab   : > { %v495_v23 = vld [vmem:[#allocation2 + $0x50] sm:$0xff]  ;;  %v496_v25 = vld [vmem:[#allocation2 + $0x58] sm:$0xff]  ;;  %v489_v26 = vld [vmem:[#allocation2 + $0x20] sm:$0xff]  ;;  %p8593_p13 = pnand %p8592_p4, %p10479_p1  ;;  %s8595_s20 = sshll.u32 %s8688_s17, 4  ;;  %s8596_s20 = int_to_ptr.vmem [resolvable:$false] %s8595_s20 }
  0xac   : > { %7660 = vmatpush3.bf16.msra.mxu0 %v8170_v11  ;;  %7910 = vmatpush3.bf16.msra.mxu1 %v8170_v11  ;;  %v497_v27 = vld [vmem:[#allocation2 + $0x60] sm:$0xff]  ;;  %v490_v28 = vld [vmem:[#allocation2 + $0x28] sm:$0xff]  ;;  %v491_v30 = vld [vmem:[#allocation2 + $0x30] sm:$0xff]  ;;  %s8597_s9 = scalar_lea.vmem %s8596_s20, 8192  ;;  %p8598_p10 = scmp.lt.s32.totalorder %s10308_s18, %s8596_s20 }
  0xad   : > { %7661 = vmatprep.subr.bf16.mxu0 %v8171_v12  ;;  %7903 = vmatprep.subr.bf16.mxu1 %v8171_v12  ;;  %v498_v29 = vld [vmem:[#allocation2 + $0x68] sm:$0xff]  ;;  %v499_v31 = vld [vmem:[#allocation2 + $0x70] sm:$0xff]  ;;  %v492_v32 = vld [vmem:[#allocation2 + $0x38] sm:$0xff]  ;;  %p8594_p8 = pneg %p8593_p13  ;;  %p8599_p11 = scmp.lt.s32.totalorder %s8597_s9, %s8591_s10 }
  0xae   : > { %v500_v33 = vld [vmem:[#allocation2 + $0x78] sm:$0xff]  ;;  %v501_v34 = vld [vmem:[#allocation2 + $0x80] sm:$0xff]  ;;  %v502_v35 = vld [vmem:[#allocation2 + $0x88] sm:$0xff] }
  0xaf   : > { %v8177_v36 = vld [vmem:[#allocation8 + $0x100] sm:$0xff]   ;;  %v8179_v38 = vld [vmem:[#allocation8 + $0x108] sm:$0xff]   ;;  %v8182_v41 = vld [vmem:[#allocation8 + $0x110] sm:$0xff]   ;;  %p8600_p0 = por %p8599_p11, %p8598_p10 }
  0xb0   : > { %7662 = vmatpush3.bf16.msra.mxu0 %v8171_v12  ;;  %7911 = vmatpush3.bf16.msra.mxu1 %v8171_v12  ;;  %v8178_v37 = vld [vmem:[#allocation8 + $0xc0] sm:$0xff]   ;;  %v8180_v39 = vld [vmem:[#allocation8 + $0xc8] sm:$0xff]   ;;  %v8183_v42 = vld [vmem:[#allocation8 + $0xd0] sm:$0xff]  }
  0xb1   : > { %7663 = vmatprep.subr.bf16.mxu0 %v8172_v13  ;;  %7904 = vmatprep.subr.bf16.mxu1 %v8172_v13  ;;  %v8181_v40 = vld [vmem:[#allocation8 + $0x140] sm:$0xff]   ;;  %v8184_v43 = vld [vmem:[#allocation8 + $0x148] sm:$0xff]   ;;  %v8185_v44 = vld [vmem:[#allocation8 + $0x118] sm:$0xff]   ;;  %p8601_p2 = pnand %p8600_p0, %p8594_p8 }
  0xb2   : > { %v8186_v45 = vld [vmem:[#allocation8 + $0xd8] sm:$0xff]   ;;  %v8187_v46 = vld [vmem:[#allocation8 + $0x150] sm:$0xff]   ;;  %v8188_v47 = vld [vmem:[#allocation8 + $0x120] sm:$0xff]  }
  0xb3   : > { %v8189_v48 = vld [vmem:[#allocation8 + $0xe0] sm:$0xff]   ;;  %v8190_v49 = vld [vmem:[#allocation8 + $0x158] sm:$0xff]   ;;  %v8191_v50 = vld [vmem:[#allocation8 + $0x128] sm:$0xff]  }
  0xb4   : > { %7664 = vmatpush3.bf16.msra.mxu0 %v8172_v13  ;;  %7912 = vmatpush3.bf16.msra.mxu1 %v8172_v13  ;;  %v8192_v51 = vld [vmem:[#allocation8 + $0xe8] sm:$0xff]   ;;  %v8193_v52 = vld [vmem:[#allocation8 + $0x160] sm:$0xff]   ;;  %v8194_v53 = vld [vmem:[#allocation8 + $0x130] sm:$0xff]  }
  0xb5   : > { %7665 = vmatprep.subr.bf16.mxu0 %v8173_v16  ;;  %7905 = vmatprep.subr.bf16.mxu1 %v8173_v16  ;;  %v8195_v54 = vld [vmem:[#allocation8 + $0xf0] sm:$0xff]   ;;  %v8196_v55 = vld [vmem:[#allocation8 + $0x168] sm:$0xff]   ;;  %v8197_v56 = vld [vmem:[#allocation8 + $0x138] sm:$0xff]  }
  0xb6   : > { %v8198_v57 = vld [vmem:[#allocation8 + $0xf8] sm:$0xff]   ;;  %v8199_v58 = vld [vmem:[#allocation8 + $0x170] sm:$0xff]   ;;  %v8983_v60 = vld [vmem:[#allocation8 + $0x80] sm:$0xff]  }
  0xb7   : > { %v8204_v59 = vld [vmem:[#allocation8 + $0x178] sm:$0xff]   ;;  %v8991_v62 = vld [vmem:[%s10363_s2] ss:$0 sm:$0xff]  ;;  %v8995_v0 = vld [vmem:[#allocation4 + $0x2c] ss:$0 sps:$4 sm:$0x11]  }
  0xb8   : > { %7666 = vmatpush3.bf16.msra.mxu0 %v8173_v16  ;;  %7913 = vmatpush3.bf16.msra.mxu1 %v8173_v16  ;;  %v8986_v61 = vld [vmem:[#allocation4 + $0x1c] ss:$0 sps:$4 sm:$0x11]   ;;  %v8997_v1 = vld [vmem:[#allocation4 + $0x4c] ss:$0 sps:$4 sm:$0x11]  }
  0xb9   : > { %7667 = vmatprep.subr.bf16.mxu0 %v8174_v17  ;;  %7906 = vmatprep.subr.bf16.mxu1 %v8174_v17  ;;  %v8993_v63 = vld [vmem:[#allocation4 + $0x3c] ss:$0 sps:$4 sm:$0x11]   ;;  %v9001_v5 = vld [vmem:[#allocation4 + $0x6c] ss:$0 sps:$4 sm:$0x11]  }
  0xba   : > { %v8999_v4 = vld [vmem:[#allocation4 + $0x5c] ss:$0 sps:$4 sm:$0x11]   ;;  %v2715_v10 = vrot.slane %v8986_v61, 5  ;;  %v2721_v16 = vrot.slane %v8993_v63, 5 }
  0xbb   : > { %v9006_v11 = vld [vmem:[#allocation4 + $0x7c] ss:$0 sps:$4 sm:$0x11]   ;;  %v9008_v12 = vld [vmem:[#allocation4 + $0x8c] ss:$0 sps:$4 sm:$0x11]  }
  0xbc   : > { %7668 = vmatpush3.bf16.msra.mxu0 %v8174_v17  ;;  %7914 = vmatpush3.bf16.msra.mxu1 %v8174_v17  ;;  %v9012_v17 = vld [vmem:[#allocation4 + $0x9c] ss:$0 sps:$4 sm:$0x11]  }
  0xbd   : > { %7669 = vmatprep.subr.bf16.mxu0 %v8175_v18  ;;  %7907 = vmatprep.subr.bf16.mxu1 %v8175_v18 }
  0xc0   : > { %7670 = vmatpush3.bf16.msra.mxu0 %v8175_v18  ;;  %7915 = vmatpush3.bf16.msra.mxu1 %v8175_v18  ;;  %v9014_v18 = vld [vmem:[#allocation4 + $0xac] ss:$0 sps:$4 sm:$0x11]  }
  0xc1   : > { %7671 = vmatprep.subr.bf16.mxu0 %v8176_v19  ;;  %7908 = vmatprep.subr.bf16.mxu1 %v8176_v19 }
  0xc4   : > { %7672 = vmatpush3.bf16.msra.mxu0 %v8176_v19  ;;  %7916 = vmatpush3.bf16.msra.mxu1 %v8176_v19  ;;  %v9016_v19 = vld [vmem:[#allocation4 + $0xbc] ss:$0 sps:$4 sm:$0x11]  }
  0xc5   : > { %7225 = vmatprep.subr.bf16.mxu1 %v8177_v36  ;;  %7709 = vmatprep.subr.bf16.mxu0 %v8181_v40  ;;  %v9027_v36 = vld [vmem:[#allocation4 + $0xec] ss:$0 sps:$4 sm:$0x11]  }
  0xc7   : > { %7674 = vmatmul.mubr.bf16.vlgmr.msra.gmra.mrb[0].mxu0 %v486_v20  ;;  %7690 = vmatmul.mubr.bf16.vlgmr.msra.gmra.mrb[0].mxu1 %v494_v21 }
  0xc8   : > { %7677 = vmatprep.mubr.bf16.mxu0 %v487_v22  ;;  %7693 = vmatprep.mubr.bf16.mxu1 %v495_v23 }
  0xc9   : > { %7226 = vmatpush3.bf16.msra.mxu1 %v8178_v37  ;;  %7710 = vmatpush3.bf16.msra.mxu0 %v8181_v40 }
  0xca   : > { %7227 = vmatprep.subr.bf16.mxu1 %v8179_v38  ;;  %7711 = vmatprep.subr.bf16.mxu0 %v8184_v43 }
  0xcd   : > { %7228 = vmatpush3.bf16.msra.mxu1 %v8180_v39  ;;  %7712 = vmatpush3.bf16.msra.mxu0 %v8184_v43 }
  0xce   : > { %7229 = vmatprep.subr.bf16.mxu1 %v8182_v41  ;;  %7713 = vmatprep.subr.bf16.mxu0 %v8187_v46  ;;  %v9031_v41 = vld [vmem:[#allocation4 + $0xfc] ss:$0 sps:$4 sm:$0x11]  }
  0xcf   : > { %7678 = vmatmul.mubr.bf16.gmra.mrb[4].mxu0 %v488_v24  ;;  %7694 = vmatmul.mubr.bf16.gmra.mrb[4].mxu1 %v496_v25 }
  0xd0   : > { %7681 = vmatprep.mubr.bf16.mxu0 %v489_v26  ;;  %7697 = vmatprep.mubr.bf16.mxu1 %v497_v27  ;;  %v9020_v26 = vld [vmem:[#allocation4 + $0xcc] ss:$0 sps:$4 sm:$0x11]  }
  0xd1   : > { %7230 = vmatpush3.bf16.msra.mxu1 %v8183_v42  ;;  %7714 = vmatpush3.bf16.msra.mxu0 %v8187_v46 }
  0xd2   : > { %7231 = vmatprep.subr.bf16.mxu1 %v8185_v44  ;;  %7715 = vmatprep.subr.bf16.mxu0 %v8190_v49 }
  0xd5   : > { %7232 = vmatpush3.bf16.msra.mxu1 %v8186_v45  ;;  %7716 = vmatpush3.bf16.msra.mxu0 %v8190_v49 }
  0xd6   : > { %7233 = vmatprep.subr.bf16.mxu1 %v8188_v47  ;;  %7717 = vmatprep.subr.bf16.mxu0 %v8193_v52 }
  0xd7   : > { %7682 = vmatmul.mubr.bf16.gmra.mrb[8].mxu0 %v490_v28  ;;  %7698 = vmatmul.mubr.bf16.gmra.mrb[8].mxu1 %v498_v29  ;;  %v2718_v29 = vrot.slane %v8995_v0, 5 }
  0xd8   : > { %7685 = vmatprep.mubr.bf16.mxu0 %v491_v30  ;;  %7701 = vmatprep.mubr.bf16.mxu1 %v499_v31  ;;  %v9025_v31 = vld [vmem:[#allocation4 + $0xdc] ss:$0 sps:$4 sm:$0x11]  }
  0xd9   : > { %7234 = vmatpush3.bf16.msra.mxu1 %v8189_v48  ;;  %7718 = vmatpush3.bf16.msra.mxu0 %v8193_v52 }
  0xda   : > { %7235 = vmatprep.subr.bf16.mxu1 %v8191_v50  ;;  %7719 = vmatprep.subr.bf16.mxu0 %v8196_v55 }
  0xdd   : > { %7236 = vmatpush3.bf16.msra.mxu1 %v8192_v51  ;;  %7720 = vmatpush3.bf16.msra.mxu0 %v8196_v55 }
  0xde   : > { %7237 = vmatprep.subr.bf16.mxu1 %v8194_v53  ;;  %7721 = vmatprep.subr.bf16.mxu0 %v8199_v58 }
  0xdf   : > { %7686 = vmatmul.mubr.bf16.gmra.mrb[12].mxu0 %v492_v32  ;;  %7702 = vmatmul.mubr.bf16.gmra.mrb[12].mxu1 %v500_v33 }
  0xe0   : > { %7705 = vmatprep.mubr.bf16.mxu1 %v501_v34 }
  0xe1   : > { %7238 = vmatpush3.bf16.msra.mxu1 %v8195_v54  ;;  %7722 = vmatpush3.bf16.msra.mxu0 %v8199_v58 }
  0xe2   : > { %7239 = vmatprep.subr.bf16.mxu1 %v8197_v56  ;;  %7723 = vmatprep.subr.bf16.mxu0 %v8204_v59 }
  0xe5   : > { %7240 = vmatpush3.bf16.msra.mxu1 %v8198_v57  ;;  %7724 = vmatpush3.bf16.msra.mxu0 %v8204_v59 }
  0xe6   : > { %7757 = vmatprep.subr.bf16.mxu0 %v8983_v60 }
  0xe7   : > { %7706 = vmatmul.mubr.bf16.gmra.mrb[16].mxu1 %v502_v35 }
 0x19a   : > { %v7675_v2 = vpop.f32.mrb[0].mxu0  ;;  %v7691_v3 = vpop.f32.mrb[0].mxu1 }
 0x19b   : > { %v617_v6 = vadd.f32 %v7675_v2, %v8991_v62  ;;  %v608_v7 = vpop.f32.mrb[1].mxu0  ;;  %v681_v8 = vadd.f32 %v7691_v3, %v8991_v62  ;;  %v672_v9 = vpop.f32.mrb[1].mxu1  ;;  %v2330_v2 = vld [vmem:[#allocation4 + $0x10] sm:$0x8] }
 0x19c   : > { %v7676_v13 = vpop.f32.mrb[2].mxu0  ;;  %v673_v14 = vadd.f32 %v8991_v62, %v672_v9  ;;  %v7692_v15 = vpop.f32.mrb[2].mxu1 }
 0x19d   : > { %v753_v20 = vmax.f32 %v617_v6, 0.0  ;;  %v620_v21 = vadd.f32 %v7676_v13, %v8991_v62  ;;  %v611_v22 = vpop.f32.mrb[3].mxu0  ;;  %v769_v23 = vmax.f32 %v681_v8, 0.0  ;;  %v684_v24 = vadd.f32 %v7692_v15, %v8991_v62  ;;  %v675_v25 = vpop.f32.mrb[3].mxu1 }
 0x19e   : > { %v767_v27 = vmax.f32 %v673_v14, 0.0  ;;  %v676_v28 = vadd.f32 %v8991_v62, %v675_v25  ;;  %v8257_v22 = vld [vmem:[#allocation8 + $0x40] sm:$0xff]  }
 0x19f   : > { %v7166_v32 = vpack.c.bf16 %v753_v20, %v753_v20  ;;  %v754_v33 = vmax.f32 %v620_v21, 0.0  ;;  %v7182_v34 = vpack.c.bf16 %v769_v23, %v769_v23  ;;  %v770_v35 = vmax.f32 %v684_v24, 0.0  ;;  %7361 = vmatprep.subr.bf16.mxu1 %v8257_v22 }
 0x1a0   : > { %v7180_v37 = vpack.c.bf16 %v767_v27, %v767_v27  ;;  %v768_v38 = vmax.f32 %v676_v28, 0.0  ;;  %v9050_v28 = vld [vmem:[#allocation4 + $0x10c] ss:$0 sps:$4 sm:$0x11]  }
 0x1a1   : > { %1077 = vst [vmem:[#allocation4 + $0x14] sm:$0xf] %v7166_v32  ;;  %v7167_v42 = vpack.c.bf16 %v754_v33, %v754_v33  ;;  %1093 = vst [vmem:[#allocation4 + $0x94] sm:$0xf] %v7182_v34  ;;  %v7183_v43 = vpack.c.bf16 %v770_v35, %v770_v35 }
 0x1a2   : > { %v7679_v46 = vpop.f32.mrb[4].mxu0  ;;  %1091 = vst [vmem:[#allocation4 + $0x84] sm:$0xf] %v7180_v37  ;;  %v7181_v47 = vpack.c.bf16 %v768_v38, %v768_v38  ;;  %v7695_v48 = vpop.f32.mrb[4].mxu1  ;;  %10404 = vst [vmem:[#allocation26_spill] sm:$0xff] %v9050_v28 }
 0x1a3   : > { %1078 = vst [vmem:[#allocation4 + $0x18] sm:$0xf] %v7167_v42  ;;  %v633_v52 = vadd.f32 %v7679_v46, %v8991_v62  ;;  %v624_v53 = vpop.f32.mrb[5].mxu0  ;;  %1094 = vst [vmem:[#allocation4 + $0x98] sm:$0xf] %v7183_v43  ;;  %v697_v54 = vadd.f32 %v7695_v48, %v8991_v62  ;;  %v688_v55 = vpop.f32.mrb[5].mxu1 }
 0x1a4   : > { %v625_v58 = vadd.f32 %v8991_v62, %v624_v53  ;;  %v7680_v59 = vpop.f32.mrb[6].mxu0  ;;  %1092 = vst [vmem:[#allocation4 + $0x88] sm:$0xf] %v7181_v47  ;;  %v689_v3 = vadd.f32 %v8991_v62, %v688_v55  ;;  %v7696_v6 = vpop.f32.mrb[6].mxu1  ;;  %v2351_v37 = vld [vmem:[#allocation4 + $0x80] sm:$0x8] }
 0x1a5   : > { %v757_v9 = vmax.f32 %v633_v52, 0.0  ;;  %v636_v13 = vadd.f32 %v7680_v59, %v8991_v62  ;;  %v627_v14 = vpop.f32.mrb[7].mxu0  ;;  %v773_v15 = vmax.f32 %v697_v54, 0.0  ;;  %v700_v20 = vadd.f32 %v7696_v6, %v8991_v62  ;;  %v691_v21 = vpop.f32.mrb[7].mxu1  ;;  %v2354_v38 = vld [vmem:[#allocation4 + $0x90] sm:$0x8] }
 0x1a6   : > { %v755_v23 = vmax.f32 %v625_v58, 0.0  ;;  %v628_v24 = vadd.f32 %v8991_v62, %v627_v14  ;;  %v771_v25 = vmax.f32 %v689_v3, 0.0  ;;  %v692_v27 = vadd.f32 %v8991_v62, %v691_v21 }
 0x1a7   : > { %v7170_v32 = vpack.c.bf16 %v757_v9, %v757_v9  ;;  %v758_v33 = vmax.f32 %v636_v13, 0.0  ;;  %v7186_v34 = vpack.c.bf16 %v773_v15, %v773_v15  ;;  %v774_v35 = vmax.f32 %v700_v20, 0.0 }
 0x1a8   : > { %v7168_v42 = vpack.c.bf16 %v755_v23, %v755_v23  ;;  %v756_v43 = vmax.f32 %v628_v24, 0.0  ;;  %v2331_v46 = vld [vmem:[#allocation4 + $0x14] sm:$0xf]  ;;  %v7184_v47 = vpack.c.bf16 %v771_v25, %v771_v25  ;;  %v772_v48 = vmax.f32 %v692_v27, 0.0 }
 0x1a9   : > { %v9052_v52 = vld [vmem:[#allocation4 + $0x94] sm:$0xf]  ;;  %1081 = vst [vmem:[#allocation4 + $0x34] sm:$0xf] %v7170_v32  ;;  %v7171_v53 = vpack.c.bf16 %v758_v33, %v758_v33  ;;  %v9054_v54 = vcombine.low %v2330_v2, %v2331_v46  ;;  %1097 = vst [vmem:[#allocation4 + $0xb4] sm:$0xf] %v7186_v34  ;;  %v7187_v55 = vpack.c.bf16 %v774_v35, %v774_v35 }
 0x1aa   : > { %v9056_v58 = vld [vmem:[#allocation4 + $0x84] sm:$0xf]  ;;  %1079 = vst [vmem:[#allocation4 + $0x24] sm:$0xf] %v7168_v42  ;;  %v7169_v3 = vpack.c.bf16 %v756_v43, %v756_v43  ;;  %v7683_v6 = vpop.f32.mrb[8].mxu0  ;;  %v7185_v13 = vpack.c.bf16 %v772_v48, %v772_v48  ;;  %v7699_v14 = vpop.f32.mrb[8].mxu1  ;;  %v9063_v20 = vcombine.low %v2354_v38, %v9052_v52 }
 0x1ab   : > { %v2332_v9 = vld [vmem:[#allocation4 + $0x18] sm:$0xf]  ;;  %1095 = vst [vmem:[#allocation4 + $0xa4] sm:$0xf] %v7184_v47  ;;  %v9060_v15 = vcombine.low %v2351_v37, %v9056_v58  ;;  %1082 = vst [vmem:[#allocation4 + $0x38] sm:$0xf] %v7171_v53  ;;  %v649_v2 = vadd.f32 %v7683_v6, %v8991_v62  ;;  %v9072_v34 = vadd.f32 %v7699_v14, %v8991_v62 }
 0x1ac   : > { %v640_v21 = vpop.f32.mrb[9].mxu0  ;;  %v6964_v22 = vcombine.low %v2331_v46, %v2332_v9  ;;  %v9066_v23 = vcombine.low %v2332_v9, %v2332_v9  ;;  %v2763_v24 = vshrl.u32 %v9054_v54, 16  ;;  %1098 = vst [vmem:[#allocation4 + $0xb8] sm:$0xf] %v7187_v55  ;;  %v704_v25 = vpop.f32.mrb[9].mxu1  ;;  %v2766_v33 = vshll.u32 %v9054_v54, 16 }
 0x1ad   : > { %1080 = vst [vmem:[#allocation4 + $0x28] sm:$0xf] %v7169_v3  ;;  %v641_v27 = vadd.f32 %v8991_v62, %v640_v21  ;;  %v7684_v32 = vpop.f32.mrb[10].mxu0  ;;  %1096 = vst [vmem:[#allocation4 + $0xa8] sm:$0xf] %v7185_v13  ;;  %v9075_v35 = vadd.f32 %v8991_v62, %v704_v25  ;;  %v9077_v37 = vpop.f32.mrb[10].mxu1 }
 0x1ae   : > { %v761_v38 = vmax.f32 %v649_v2, 0.0  ;;  %v652_v42 = vadd.f32 %v7684_v32, %v8991_v62  ;;  %v643_v43 = vpop.f32.mrb[11].mxu0  ;;  %v2714_v46 = vrot.slane %v6964_v22, 5  ;;  %v2539_v47 = vshrl.u32 %v6964_v22, 16  ;;  %v9080_v48 = vpop.f32.mrb[11].mxu1 }
 0x1af   : > { %v759_v53 = vmax.f32 %v641_v27, 0.0  ;;  %v644_v54 = vadd.f32 %v8991_v62, %v643_v43  ;;  %v2542_v55 = vshll.u32 %v6964_v22, 16  ;;  %v9083_v3 = vrot.slane %v2763_v24, 3 }
 0x1b0   : > { %v7174_v6 = vpack.c.bf16 %v761_v38, %v761_v38  ;;  %v762_v9 = vmax.f32 %v652_v42, 0.0  ;;  %v2716_v13 = vsel %vm1495_vm6, %v2714_v46, %v2715_v10  ;;  %v2789_v14 = vshrl.u32 %v2714_v46, 16  ;;  %v9106_v51 = vld [vmem:[#allocation4 + $0x34] sm:$0xf] }
 0x1b1   : > { %v7172_v2 = vpack.c.bf16 %v759_v53, %v759_v53  ;;  %v760_v21 = vmax.f32 %v644_v54, 0.0  ;;  %v2792_v25 = vshll.u32 %v2714_v46, 16  ;;  %v2797_v32 = vshrl.u32 %v2716_v13, 16 }
 0x1b2   : > { %1085 = vst [vmem:[#allocation4 + $0x54] sm:$0xf] %v7174_v6  ;;  %v7175_v59 = vpack.c.bf16 %v762_v9, %v762_v9  ;;  %v2791_v27 = vrot.slane %v2789_v14, 3  ;;  %v2800_v8 = vshll.u32 %v2716_v13, 16  ;;  %v2541_v43 = vrot.slane %v2539_v47, 4  ;;  %v7687_v24 = vpop.f32.mrb[12].mxu0 }
 0x1b3   : > { %1083 = vst [vmem:[#allocation4 + $0x44] sm:$0xf] %v7172_v2  ;;  %v7173_v22 = vpack.c.bf16 %v760_v21, %v760_v21  ;;  %v2794_v7 = vrot.slane %v2792_v25, 4  ;;  %v2799_v38 = vrot.slane %v2797_v32, 3  ;;  %v2544_v42 = vrot.slane %v2542_v55, 5  ;;  %v656_v10 = vpop.f32.mrb[13].mxu0 }
 0x1b4   : > { %1086 = vst [vmem:[#allocation4 + $0x58] sm:$0xf] %v7175_v59  ;;  %v665_v61 = vadd.f32 %v7687_v24, %v8991_v62  ;;  %v2802_v57 = vrot.slane %v2800_v8, 4  ;;  %v2768_v53 = vrot.slane %v2766_v33, 4  ;;  %v2771_v46 = vshrl.u32 %v9066_v23, 16  ;;  %v7688_v6 = vpop.f32.mrb[14].mxu0 }
 0x1b5   : > { %1084 = vst [vmem:[#allocation4 + $0x48] sm:$0xf] %v7173_v22  ;;  %v657_v54 = vadd.f32 %v8991_v62, %v656_v10  ;;  %v2795_v9 = vor.u32 %v2794_v7, %v2791_v27  ;;  %v2545_v47 = vor.u32 %v2544_v42, %v2541_v43  ;;  %v2774_v13 = vshll.u32 %v9066_v23, 16  ;;  %v9092_v14 = vpop.f32.mrb[12].mxu1  ;;  %v659_v55 = vpop.f32.mrb[15].mxu0 }
 0x1b6   : > { %v765_v2 = vmax.f32 %v665_v61, 0.0  ;;  %v668_v59 = vadd.f32 %v7688_v6, %v8991_v62  ;;  %v2803_v21 = vor.u32 %v2802_v57, %v2799_v38  ;;  %v2769_v8 = vor.u32 %v2768_v53, %v9083_v3  ;;  %v9096_v33 = vld [vmem:[#allocation4 + $0x38] sm:$0xf]  ;;  %v2333_v25 = vld [vmem:[#allocation4 + $0x20] sm:$0x8]  ;;  %v9098_v32 = vpop.f32.mrb[13].mxu1 }
 0x1b7   : > { %v763_v22 = vmax.f32 %v657_v54, 0.0  ;;  %v660_v7 = vadd.f32 %v8991_v62, %v659_v55  ;;  %v2780_v27 = vshrl.u32 %v2545_v47, 16  ;;  %v2783_v43 = vshll.u32 %v2545_v47, 16  ;;  %v2335_v23 = vld [vmem:[#allocation4 + $0x28] sm:$0xf]  ;;  %v9101_v24 = vpop.f32.mrb[14].mxu1 }
 0x1b8   : > { %v7178_v42 = vpack.c.bf16 %v765_v2, %v765_v2  ;;  %v766_v61 = vmax.f32 %v668_v59, 0.0  ;;  %v2804_v10 = vsel %vm1544_vm7, %v2795_v9, %v2803_v21  ;;  %v2773_v57 = vrot.slane %v2771_v46, 3  ;;  %v2334_v38 = vld [vmem:[#allocation4 + $0x24] sm:$0xf]  ;;  %v9104_v3 = vpop.f32.mrb[15].mxu1 }
 0x1b9   : > { %v7176_v53 = vpack.c.bf16 %v763_v22, %v763_v22  ;;  %v764_v6 = vmax.f32 %v660_v7, 0.0  ;;  %7725 = vmatprep.mubr.bf16.mxu0 %v2804_v10  ;;  %v2782_v56 = vrot.slane %v2780_v27, 3  ;;  %v2785_v54 = vrot.slane %v2783_v43, 4 }
 0x1ba   : > { %1089 = vst [vmem:[#allocation4 + $0x74] sm:$0xf] %v7178_v42  ;;  %v7179_v47 = vpack.c.bf16 %v766_v61, %v766_v61  ;;  %v2776_v55 = vrot.slane %v2774_v13, 4  ;;  %v6965_v50 = vcombine.low %v2334_v38, %v2335_v23  ;;  %v9110_v2 = vcombine.low %v9106_v51, %v9096_v33  ;;  %v7707_v22 = vpop.f32.mrb[16].mxu1  ;;  %v8260_v13 = vld [vmem:[#allocation8] sm:$0xff]  }
 0x1bb   : > { %1087 = vst [vmem:[#allocation4 + $0x64] sm:$0xf] %v7176_v53  ;;  %v7177_v46 = vpack.c.bf16 %v764_v6, %v764_v6  ;;  %v2786_v9 = vor.u32 %v2785_v54, %v2782_v56  ;;  %v6934_v59 = vcombine.low %v2333_v25, %v2334_v38  ;;  %v6935_v21 = vcombine.low %v2335_v23, %v2335_v23  ;;  %v9113_v42 = vpop.f32.mrb[17].mxu1 }
 0x1bc   : > { %1090 = vst [vmem:[#allocation4 + $0x78] sm:$0xf] %v7179_v47  ;;  %v2777_v7 = vor.u32 %v2776_v55, %v2773_v57  ;;  %v2717_v27 = vrot.slane %v6965_v50, 5  ;;  %v2720_v43 = vrot.slane %v9110_v2, 5  ;;  %v2547_v10 = vshrl.u32 %v6965_v50, 16  ;;  %v7708_v6 = vpop.f32.mrb[18].mxu1 }
 0x1bd   : > { %1088 = vst [vmem:[#allocation4 + $0x68] sm:$0xf] %v7177_v46  ;;  %3722 = vmatprep.mubr.bf16.mxu1 %v2786_v9  ;;  %v2550_v61 = vshll.u32 %v6965_v50, 16  ;;  %v2806_v49 = vshrl.u32 %v6934_v59, 16  ;;  %v2809_v45 = vshll.u32 %v6934_v59, 16  ;;  %v2814_v53 = vshrl.u32 %v6935_v21, 16 }
 0x1be   : > { %v2778_v56 = vsel %vm1544_vm7, %v2769_v8, %v2777_v7  ;;  %v2719_v25 = vsel %vm1495_vm6, %v2717_v27, %v2718_v29  ;;  %v2832_v23 = vshrl.u32 %v2717_v27, 16  ;;  %v2835_v57 = vshll.u32 %v2717_v27, 16  ;;  %v9119_v38 = vpop.f32.mrb[19].mxu1 }
 0x1bf   : > { %3723 = vmatmul.mubr.bf16.vlgmr.msra.gmra.mrb[20].mxu1 %v2778_v56  ;;  %v2840_v54 = vshrl.u32 %v2719_v25, 16  ;;  %v2843_v47 = vshll.u32 %v2719_v25, 16  ;;  %v2722_v50 = vsel %vm1495_vm6, %v2720_v43, %v2721_v16  ;;  %v2875_v55 = vshrl.u32 %v2720_v43, 16 }
 0x1c0   : > { %v2834_v46 = vrot.slane %v2832_v23, 3  ;;  %v2837_v9 = vrot.slane %v2835_v57, 4  ;;  %v2878_v59 = vshll.u32 %v2720_v43, 16  ;;  %v2883_v8 = vshrl.u32 %v2722_v50, 16  ;;  %7362 = vmatpush3.bf16.msra.mxu1 %v8260_v13  ;;  %v8212_v57 = vld [vmem:[#allocation8 + $0x88] sm:$0xff]  }
 0x1c1   : > { %v2842_v0 = vrot.slane %v2840_v54, 3  ;;  %v2845_v22 = vrot.slane %v2843_v47, 4  ;;  %v2877_v29 = vrot.slane %v2875_v55, 3  ;;  %v2886_v7 = vshll.u32 %v2722_v50, 16 }
 0x1c2   : > { %v2838_v27 = vor.u32 %v2837_v9, %v2834_v46  ;;  %v2880_v6 = vrot.slane %v2878_v59, 4  ;;  %v2885_v44 = vrot.slane %v2883_v8, 3  ;;  %v2549_v56 = vrot.slane %v2547_v10, 4 }
 0x1c3   : > { %v2846_v40 = vor.u32 %v2845_v22, %v2842_v0  ;;  %v2888_v25 = vrot.slane %v2886_v7, 4  ;;  %v2552_v39 = vrot.slane %v2550_v61, 5  ;;  %v2808_v63 = vrot.slane %v2806_v49, 3  ;;  %v9128_v61 = vld [vmem:[#allocation4 + $0x48] sm:$0xf] }
 0x1c4   : > { %v2881_v30 = vor.u32 %v2880_v6, %v2877_v29  ;;  %v2811_v16 = vrot.slane %v2809_v45, 4  ;;  %v2816_v28 = vrot.slane %v2814_v53, 3  ;;  %v2817_v23 = vshll.u32 %v6935_v21, 16  ;;  %v8277_v49 = vld [vmem:[#allocation8 + $0x48] sm:$0xff]   ;;  %v9135_v0 = vld [vmem:[#allocation4 + $0x58] sm:$0xf] }
 0x1c5   : > { %v2847_v43 = vsel %vm1544_vm7, %v2838_v27, %v2846_v40  ;;  %v2889_v13 = vor.u32 %v2888_v25, %v2885_v44  ;;  %v2553_v54 = vor.u32 %v2552_v39, %v2549_v56  ;;  %v2555_v47 = vshrl.u32 %v9110_v2, 16  ;;  %v8219_v39 = vld [vmem:[#allocation8 + $0x90] sm:$0xff]   ;;  %v8280_v53 = vld [vmem:[#allocation8 + $0x8] sm:$0xff]   ;;  %7363 = vmatprep.subr.bf16.mxu1 %v8277_v49 }
 0x1c6   : > { %7726 = vmatmul.mubr.bf16.vlgmr.msra.gmra.mrb[16].mxu0 %v2847_v43  ;;  %v2812_v50 = vor.u32 %v2811_v16, %v2808_v63  ;;  %v2819_v55 = vrot.slane %v2817_v23, 4  ;;  %v2558_v10 = vshll.u32 %v9110_v2, 16  ;;  %v777_v46 = vmax.f32 %v9072_v34, 0.0  ;;  %v9133_v34 = vld [vmem:[#allocation4 + $0x44] sm:$0xf]  ;;  %7364 = vmatpush3.bf16.msra.mxu1 %v8280_v53 }
 0x1c7   : > { %7758 = vmatpush3.bf16.msra.mxu0 %v8983_v60  ;;  %v2890_v45 = vsel %vm1544_vm7, %v2881_v30, %v2889_v13  ;;  %v2823_v21 = vshrl.u32 %v2553_v54, 16  ;;  %v2826_v40 = vshll.u32 %v2553_v54, 16  ;;  %v2557_v44 = vrot.slane %v2555_v47, 4  ;;  %v2336_v7 = vld [vmem:[#allocation4 + $0x30] sm:$0x8] }
 0x1c8   : > { %7729 = vmatprep.mubr.bf16.mxu0 %v2890_v45  ;;  %v2820_v9 = vor.u32 %v2819_v55, %v2816_v28  ;;  %v2560_v59 = vrot.slane %v2558_v10, 5  ;;  %v7190_v8 = vpack.c.bf16 %v777_v46, %v777_v46  ;;  %v775_v2 = vmax.f32 %v9075_v35, 0.0  ;;  %7759 = vmatprep.subr.bf16.mxu0 %v8212_v57  ;;  %v9146_v56 = vld [vmem:[#allocation4 + $0x54] sm:$0xf] }
 0x1c9   : > { %v2825_v22 = vrot.slane %v2823_v21, 3  ;;  %v2828_v60 = vrot.slane %v2826_v40, 4  ;;  %v716_v30 = vadd.f32 %v9077_v37, %v8991_v62  ;;  %v9141_v29 = vcombine.low %v9133_v34, %v9128_v61 }
 0x1ca   : > { %v2821_v28 = vsel %vm1544_vm7, %v2812_v50, %v2820_v9  ;;  %v2561_v27 = vor.u32 %v2560_v59, %v2557_v44  ;;  %1101 = vst [vmem:[#allocation4 + $0xd4] sm:$0xf] %v7190_v8  ;;  %v7188_v35 = vpack.c.bf16 %v775_v2, %v775_v2  ;;  %v708_v6 = vadd.f32 %v8991_v62, %v9080_v48  ;;  %v8226_v48 = vld [vmem:[#allocation8 + $0x98] sm:$0xff]   ;;  %v8233_v2 = vld [vmem:[#allocation8 + $0xa0] sm:$0xff]  }
 0x1cb   : > { %v2829_v25 = vor.u32 %v2828_v60, %v2825_v22  ;;  %v778_v63 = vmax.f32 %v716_v30, 0.0  ;;  %v2723_v37 = vrot.slane %v9141_v29, 5  ;;  %7760 = vmatpush3.bf16.msra.mxu0 %v8212_v57  ;;  %v9151_v16 = vcombine.low %v9146_v56, %v9135_v0 }
 0x1cc   : > { %v2866_v23 = vshrl.u32 %v2561_v27, 16  ;;  %v2869_v43 = vshll.u32 %v2561_v27, 16  ;;  %1099 = vst [vmem:[#allocation4 + $0xc4] sm:$0xf] %v7188_v35  ;;  %v776_v13 = vmax.f32 %v708_v6, 0.0  ;;  %v6936_v54 = vcombine.low %v2336_v7, %v9106_v51  ;;  %7761 = vmatprep.subr.bf16.mxu0 %v8219_v39 }
 0x1cd   : > { %3730 = vmatprep.mubr.bf16.mxu1 %v2829_v25  ;;  %v7191_v47 = vpack.c.bf16 %v778_v63, %v778_v63  ;;  %v10405_v50 = vrot.slane %v8997_v1, 5  ;;  %v2918_v10 = vshrl.u32 %v2723_v37, 16  ;;  %v2921_v57 = vshll.u32 %v2723_v37, 16 }
 0x1ce   : > { %3731 = vmatmul.mubr.bf16.gmra.mrb[24].mxu1 %v2821_v28  ;;  %v2868_v46 = vrot.slane %v2866_v23, 3  ;;  %v2871_v49 = vrot.slane %v2869_v43, 4  ;;  %v7189_v53 = vpack.c.bf16 %v776_v13, %v776_v13  ;;  %v2726_v51 = vrot.slane %v9151_v16, 5 }
 0x1cf   : > { %v2725_v55 = vsel %vm1495_vm6, %v2723_v37, %v10405_v50  ;;  %1102 = vst [vmem:[#allocation4 + $0xd8] sm:$0xf] %v7191_v47  ;;  %v2920_v40 = vrot.slane %v2918_v10, 3  ;;  %v2923_v44 = vrot.slane %v2921_v57, 4  ;;  %7762 = vmatpush3.bf16.msra.mxu0 %v8219_v39  ;;  %v6937_v1 = vcombine.low %v9096_v33, %v9096_v33 }
 0x1d0   : > { %v2926_v45 = vshrl.u32 %v2725_v55, 16  ;;  %v2929_v21 = vshll.u32 %v2725_v55, 16  ;;  %v2872_v9 = vor.u32 %v2871_v49, %v2868_v46  ;;  %7763 = vmatprep.subr.bf16.mxu0 %v8226_v48  ;;  %1100 = vst [vmem:[#allocation4 + $0xc8] sm:$0xf] %v7189_v53  ;;  %v10406_v60 = vrot.slane %v8999_v4, 5  ;;  %v8240_v4 = vld [vmem:[#allocation8 + $0xa8] sm:$0xff]  }
 0x1d1   : > { %v2924_v22 = vor.u32 %v2923_v44, %v2920_v40  ;;  %v2961_v7 = vshrl.u32 %v2726_v51, 16  ;;  %v2964_v28 = vshll.u32 %v2726_v51, 16  ;;  %v2849_v6 = vshrl.u32 %v6936_v54, 16 }
 0x1d2   : > { %v2928_v59 = vrot.slane %v2926_v45, 3  ;;  %v2931_v8 = vrot.slane %v2929_v21, 4  ;;  %v2728_v30 = vsel %vm1495_vm6, %v2726_v51, %v10406_v60  ;;  %3738 = vmatprep.mubr.bf16.mxu1 %v2872_v9  ;;  %v2852_v37 = vshll.u32 %v6936_v54, 16  ;;  %v9174_v51 = vld [vmem:[#allocation4 + $0x78] sm:$0xf] }
 0x1d3   : > { %v2969_v35 = vshrl.u32 %v2728_v30, 16  ;;  %v2972_v39 = vshll.u32 %v2728_v30, 16  ;;  %v2963_v25 = vrot.slane %v2961_v7, 3  ;;  %v2966_v63 = vrot.slane %v2964_v28, 4  ;;  %7764 = vmatpush3.bf16.msra.mxu0 %v8226_v48  ;;  %v9168_v48 = vld [vmem:[#allocation4 + $0x68] sm:$0xf] }
 0x1d4   : > { %v2932_v27 = vor.u32 %v2931_v8, %v2928_v59  ;;  %v2857_v23 = vshrl.u32 %v6937_v1, 16  ;;  %v2851_v47 = vrot.slane %v2849_v6, 3  ;;  %7765 = vmatprep.subr.bf16.mxu0 %v8233_v2  ;;  %v2854_v55 = vrot.slane %v2852_v37, 4 }
 0x1d5   : > { %v2971_v43 = vrot.slane %v2969_v35, 3  ;;  %v2974_v13 = vrot.slane %v2972_v39, 4  ;;  %v2967_v50 = vor.u32 %v2966_v63, %v2963_v25  ;;  %v2860_v57 = vshll.u32 %v6937_v1, 16  ;;  %v9177_v1 = vld [vmem:[#allocation4 + $0x64] sm:$0xf] }
 0x1d6   : > { %v2933_v33 = vsel %vm1544_vm7, %v2924_v22, %v2932_v27  ;;  %v2859_v10 = vrot.slane %v2857_v23, 3  ;;  %v2563_v49 = vshrl.u32 %v9141_v29, 16  ;;  %v2566_v45 = vshll.u32 %v9141_v29, 16  ;;  %v2339_v35 = vld [vmem:[#allocation4 + $0x40] sm:$0x8] }
 0x1d7   : > { %7730 = vmatmul.mubr.bf16.gmra.mrb[20].mxu0 %v2933_v33  ;;  %v2975_v46 = vor.u32 %v2974_v13, %v2971_v43  ;;  %v729_v54 = vadd.f32 %v9092_v14, %v8991_v62  ;;  %v2855_v21 = vor.u32 %v2854_v55, %v2851_v47  ;;  %v2862_v40 = vrot.slane %v2860_v57, 4  ;;  %v8247_v14 = vld [vmem:[#allocation8 + $0xb0] sm:$0xff]  }
 0x1d8   : > { %v721_v44 = vadd.f32 %v8991_v62, %v9098_v32  ;;  %v732_v53 = vadd.f32 %v9101_v24, %v8991_v62  ;;  %7766 = vmatpush3.bf16.msra.mxu0 %v8233_v2  ;;  %v2565_v59 = vrot.slane %v2563_v49, 4  ;;  %v2568_v29 = vrot.slane %v2566_v45, 5  ;;  %v9183_v24 = vld [vmem:[#allocation4 + $0x74] sm:$0xf] }
 0x1d9   : > { %v2976_v9 = vsel %vm1544_vm7, %v2967_v50, %v2975_v46  ;;  %v781_v8 = vmax.f32 %v729_v54, 0.0  ;;  %7767 = vmatprep.subr.bf16.mxu0 %v8240_v4  ;;  %v2863_v22 = vor.u32 %v2862_v40, %v2859_v10  ;;  %v9181_v32 = vcombine.low %v9177_v1, %v9168_v48 }
 0x1da   : > { %7733 = vmatprep.mubr.bf16.mxu0 %v2976_v9  ;;  %v779_v60 = vmax.f32 %v721_v44, 0.0  ;;  %v782_v30 = vmax.f32 %v732_v53, 0.0  ;;  %v2569_v2 = vor.u32 %v2568_v29, %v2565_v59  ;;  %v724_v28 = vadd.f32 %v8991_v62, %v9104_v3  ;;  %v8254_v3 = vld [vmem:[#allocation8 + $0xb8] sm:$0xff]   ;;  %v8295_v53 = vld [vmem:[#allocation8 + $0x50] sm:$0xff]  }
 0x1db   : > { %v7194_v7 = vpack.c.bf16 %v781_v8, %v781_v8  ;;  %v9189_v27 = vcombine.low %v9183_v24, %v9174_v51  ;;  %v2864_v39 = vsel %vm1544_vm7, %v2855_v21, %v2863_v22  ;;  %v2729_v63 = vrot.slane %v9181_v32, 5  ;;  %v8263_v8 = vld [vmem:[#allocation8 + $0x1c0] sm:$0xff]   ;;  %7365 = vmatprep.subr.bf16.mxu1 %v8295_v53 }
 0x1dc   : > { %v7192_v6 = vpack.c.bf16 %v779_v60, %v779_v60  ;;  %v7195_v25 = vpack.c.bf16 %v782_v30, %v782_v30  ;;  %7768 = vmatpush3.bf16.msra.mxu0 %v8240_v4  ;;  %3739 = vmatmul.mubr.bf16.gmra.mrb[28].mxu1 %v2864_v39  ;;  %v2909_v37 = vshrl.u32 %v2569_v2, 16  ;;  %v2912_v23 = vshll.u32 %v2569_v2, 16 }
 0x1dd   : > { %1105 = vst [vmem:[#allocation4 + $0xf4] sm:$0xf] %v7194_v7  ;;  %v780_v33 = vmax.f32 %v724_v28, 0.0  ;;  %v2732_v43 = vrot.slane %v9189_v27, 5  ;;  %7769 = vmatprep.subr.bf16.mxu0 %v8247_v14  ;;  %v10407_v13 = vrot.slane %v9001_v5, 5  ;;  %v3004_v50 = vshrl.u32 %v2729_v63, 16 }
 0x1de   : > { %1103 = vst [vmem:[#allocation4 + $0xe4] sm:$0xf] %v7192_v6  ;;  %1106 = vst [vmem:[#allocation4 + $0xf8] sm:$0xf] %v7195_v25  ;;  %v3007_v55 = vshll.u32 %v2729_v63, 16  ;;  %v6938_v10 = vcombine.low %v2339_v35, %v9133_v34  ;;  %v2911_v4 = vrot.slane %v2909_v37, 3 }
 0x1df   : > { %v2731_v47 = vsel %vm1495_vm6, %v2729_v63, %v10407_v13  ;;  %v2914_v57 = vrot.slane %v2912_v23, 4  ;;  %v3006_v45 = vrot.slane %v3004_v50, 3  ;;  %v7193_v21 = vpack.c.bf16 %v780_v33, %v780_v33  ;;  %v8298_v28 = vld [vmem:[#allocation8 + $0x10] sm:$0xff]  }
 0x1e0   : > { %v3012_v46 = vshrl.u32 %v2731_v47, 16  ;;  %v3015_v49 = vshll.u32 %v2731_v47, 16  ;;  %v3009_v54 = vrot.slane %v3007_v55, 4  ;;  %v10408_v40 = vrot.slane %v9006_v11, 5  ;;  %7770 = vmatpush3.bf16.msra.mxu0 %v8247_v14  ;;  %7366 = vmatpush3.bf16.msra.mxu1 %v8298_v28  ;;  %v2342_v55 = vld [vmem:[#allocation4 + $0x50] sm:$0x8] }
 0x1e1   : > { %v2915_v5 = vor.u32 %v2914_v57, %v2911_v4  ;;  %v3047_v29 = vshrl.u32 %v2732_v43, 16  ;;  %7771 = vmatprep.subr.bf16.mxu0 %v8254_v3  ;;  %1104 = vst [vmem:[#allocation4 + $0xe8] sm:$0xf] %v7193_v21  ;;  %v3050_v22 = vshll.u32 %v2732_v43, 16  ;;  %v6939_v11 = vcombine.low %v9128_v61, %v9128_v61 }
 0x1e2   : > { %v2734_v44 = vsel %vm1495_vm6, %v2732_v43, %v10408_v40  ;;  %v3014_v9 = vrot.slane %v3012_v46, 3  ;;  %v3017_v59 = vrot.slane %v3015_v49, 4  ;;  %v3010_v34 = vor.u32 %v3009_v54, %v3006_v45  ;;  %v9204_v43 = vld [vmem:[#allocation4 + $0x88] sm:$0xf]  ;;  %v9210_v46 = vld [vmem:[#allocation4 + $0x98] sm:$0xf] }
 0x1e3   : > { %v3055_v60 = vshrl.u32 %v2734_v44, 16  ;;  %v3058_v30 = vshll.u32 %v2734_v44, 16  ;;  %3746 = vmatprep.mubr.bf16.mxu1 %v2915_v5  ;;  %v3049_v7 = vrot.slane %v3047_v29, 3  ;;  %v2892_v14 = vshrl.u32 %v6938_v10, 16 }
 0x1e4   : > { %v3018_v2 = vor.u32 %v3017_v59, %v3014_v9  ;;  %v3052_v35 = vrot.slane %v3050_v22, 4  ;;  %v2895_v25 = vshll.u32 %v6938_v10, 16  ;;  %7772 = vmatpush3.bf16.msra.mxu0 %v8254_v3  ;;  %v2900_v23 = vshrl.u32 %v6939_v11, 16 }
 0x1e5   : > { %v3057_v39 = vrot.slane %v3055_v60, 3  ;;  %v3060_v6 = vrot.slane %v3058_v30, 4  ;;  %v2894_v37 = vrot.slane %v2892_v14, 3  ;;  %v2903_v33 = vshll.u32 %v6939_v11, 16  ;;  %7497 = vmatprep.subr.bf16.mxu0 %v8263_v8 }
 0x1e6   : > { %v3019_v63 = vsel %vm1544_vm7, %v3010_v34, %v3018_v2  ;;  %v3053_v13 = vor.u32 %v3052_v35, %v3049_v7  ;;  %v2897_v61 = vrot.slane %v2895_v25, 4  ;;  %v2571_v50 = vshrl.u32 %v9151_v16, 16 }
 0x1e7   : > { %7734 = vmatmul.mubr.bf16.gmra.mrb[24].mxu0 %v3019_v63  ;;  %v3061_v47 = vor.u32 %v3060_v6, %v3057_v39  ;;  %v2902_v4 = vrot.slane %v2900_v23, 3  ;;  %v2905_v57 = vrot.slane %v2903_v33, 4  ;;  %v2574_v3 = vshll.u32 %v9151_v16, 16 }
 0x1e8   : > { %v737_v10 = vadd.f32 %v8991_v62, %v9113_v42  ;;  %v2898_v45 = vor.u32 %v2897_v61, %v2894_v37  ;;  %v2573_v54 = vrot.slane %v2571_v50, 4  ;;  %v9215_v21 = vcombine.low %v9056_v58, %v9204_v43 }
 0x1e9   : > { %v3062_v49 = vsel %vm1544_vm7, %v3053_v13, %v3061_v47  ;;  %v2906_v40 = vor.u32 %v2905_v57, %v2902_v4  ;;  %v2576_v44 = vrot.slane %v2574_v3, 5  ;;  %v740_v16 = vadd.f32 %v8991_v62, %v9119_v38  ;;  %v9237_v4 = vld [vmem:[#allocation4 + $0xa8] sm:$0xf] }
 0x1ea   : > { %7737 = vmatprep.mubr.bf16.mxu0 %v3062_v49  ;;  %v783_v53 = vmax.f32 %v737_v10, 0.0  ;;  %v2735_v5 = vrot.slane %v9215_v21, 5  ;;  %v9222_v42 = vcombine.low %v9052_v52, %v9210_v46  ;;  %v6940_v9 = vcombine.low %v2342_v55, %v9146_v56  ;;  %v9235_v55 = vld [vmem:[#allocation4 + $0xa4] sm:$0xf]  ;;  %v9239_v49 = vld [vmem:[#allocation4 + $0xb4] sm:$0xf] }
 0x1eb   : > { %v6941_v59 = vcombine.low %v9135_v0, %v9135_v0  ;;  %v2907_v58 = vsel %vm1544_vm7, %v2898_v45, %v2906_v40  ;;  %v2577_v29 = vor.u32 %v2576_v44, %v2573_v54  ;;  %v784_v34 = vmax.f32 %v740_v16, 0.0 }
 0x1ec   : > { %v7196_v8 = vpack.c.bf16 %v783_v53, %v783_v53  ;;  %3747 = vmatmul.mubr.bf16.gmra.mrb[32].mxu1 %v2907_v58  ;;  %v10409_v22 = vrot.slane %v9008_v12, 5  ;;  %v3090_v38 = vshrl.u32 %v2735_v5, 16  ;;  %v3093_v60 = vshll.u32 %v2735_v5, 16  ;;  %v9242_v53 = vld [vmem:[#allocation4 + $0xb8] sm:$0xf] }
 0x1ed   : > { %v2738_v52 = vrot.slane %v9222_v42, 5  ;;  %v2952_v30 = vshrl.u32 %v2577_v29, 16  ;;  %v2955_v2 = vshll.u32 %v2577_v29, 16  ;;  %v7197_v14 = vpack.c.bf16 %v784_v34, %v784_v34 }
 0x1ee   : > { %v2737_v62 = vsel %vm1495_vm6, %v2735_v5, %v10409_v22  ;;  %1107 = vst [vmem:[#allocation4 + $0x104] sm:$0xf] %v7196_v8  ;;  %v3092_v0 = vrot.slane %v3090_v38, 3  ;;  %v3095_v11 = vrot.slane %v3093_v60, 4  ;;  %v10410_v28 = vrot.slane %v9012_v17, 5 }
 0x1ef   : > { %v3098_v56 = vshrl.u32 %v2737_v62, 16  ;;  %v3101_v7 = vshll.u32 %v2737_v62, 16  ;;  %v2954_v39 = vrot.slane %v2952_v30, 3  ;;  %v2957_v12 = vrot.slane %v2955_v2, 4  ;;  %1108 = vst [vmem:[#allocation4 + $0x108] sm:$0xf] %v7197_v14 }
 0x1f0   : > { %v2740_v35 = vsel %vm1495_vm6, %v2738_v52, %v10410_v28  ;;  %v3096_v63 = vor.u32 %v3095_v11, %v3092_v0  ;;  %v3133_v37 = vshrl.u32 %v2738_v52, 16  ;;  %v3136_v23 = vshll.u32 %v2738_v52, 16  ;;  %v2345_v8 = vld [vmem:[#allocation4 + $0x60] sm:$0x8]  ;;  %v8307_v0 = vld [vmem:[#allocation8 + $0x58] sm:$0xff]  }
 0x1f1   : > { %v3100_v6 = vrot.slane %v3098_v56, 3  ;;  %v3103_v25 = vrot.slane %v3101_v7, 4  ;;  %v3141_v33 = vshrl.u32 %v2740_v35, 16  ;;  %v2958_v13 = vor.u32 %v2957_v12, %v2954_v39  ;;  %7367 = vmatprep.subr.bf16.mxu1 %v8307_v0  ;;  %v9273_v0 = vld [vmem:[#allocation4 + $0xd4] sm:$0xf] }
 0x1f2   : > { %v3144_v61 = vshll.u32 %v2740_v35, 16  ;;  %v2935_v50 = vshrl.u32 %v6940_v9, 16  ;;  %v3135_v17 = vrot.slane %v3133_v37, 3  ;;  %v3138_v57 = vrot.slane %v3136_v23, 4  ;;  %v8309_v35 = vld [vmem:[#allocation8 + $0x18] sm:$0xff]  }
 0x1f3   : > { %v3104_v47 = vor.u32 %v3103_v25, %v3100_v6  ;;  %v3143_v3 = vrot.slane %v3141_v33, 3  ;;  %v2938_v10 = vshll.u32 %v6940_v9, 16  ;;  %3754 = vmatprep.mubr.bf16.mxu1 %v2958_v13  ;;  %v2943_v44 = vshrl.u32 %v6941_v59, 16  ;;  %7368 = vmatpush3.bf16.msra.mxu1 %v8309_v35 }
 0x1f4   : > { %v3146_v54 = vrot.slane %v3144_v61, 4  ;;  %v2937_v40 = vrot.slane %v2935_v50, 3  ;;  %v3139_v16 = vor.u32 %v3138_v57, %v3135_v17  ;;  %v2946_v58 = vshll.u32 %v6941_v59, 16 }
 0x1f5   : > { %v3105_v45 = vsel %vm1544_vm7, %v3096_v63, %v3104_v47  ;;  %v2940_v5 = vrot.slane %v2938_v10, 4  ;;  %v2579_v29 = vshrl.u32 %v9181_v32, 16  ;;  %v2945_v22 = vrot.slane %v2943_v44, 3 }
 0x1f6   : > { %7738 = vmatmul.mubr.bf16.gmra.mrb[28].mxu0 %v3105_v45  ;;  %v3147_v34 = vor.u32 %v3146_v54, %v3143_v3  ;;  %v2582_v9 = vshll.u32 %v9181_v32, 16  ;;  %v9248_v62 = vcombine.low %v9235_v55, %v9237_v4  ;;  %v2948_v60 = vrot.slane %v2946_v58, 4  ;;  %v9268_v58 = vld [vmem:[#allocation4 + $0xc4] sm:$0xf] }
 0x1f7   : > { %v2941_v38 = vor.u32 %v2940_v5, %v2937_v40  ;;  %v2581_v52 = vrot.slane %v2579_v29, 4  ;;  %v9252_v30 = vcombine.low %v9239_v49, %v9242_v53  ;;  %v6942_v7 = vcombine.low %v2345_v8, %v9177_v1  ;;  %v2348_v29 = vld [vmem:[#allocation4 + $0x70] sm:$0x8]  ;;  %v8317_v8 = vld [vmem:[#allocation8 + $0x60] sm:$0xff]  }
 0x1f8   : > { %v3148_v59 = vsel %vm1544_vm7, %v3139_v16, %v3147_v34  ;;  %v2584_v2 = vrot.slane %v2582_v9, 5  ;;  %v2741_v56 = vrot.slane %v9248_v62, 5  ;;  %v2949_v32 = vor.u32 %v2948_v60, %v2945_v22  ;;  %v9270_v60 = vld [vmem:[#allocation4 + $0xc8] sm:$0xf]  ;;  %7369 = vmatprep.subr.bf16.mxu1 %v8317_v8 }
 0x1f9   : > { %7741 = vmatprep.mubr.bf16.mxu0 %v3148_v59  ;;  %v2744_v11 = vrot.slane %v9252_v30, 5  ;;  %v6943_v14 = vcombine.low %v9168_v48, %v9168_v48  ;;  %v2587_v28 = vshrl.u32 %v9189_v27, 16  ;;  %v10411_v12 = vrot.slane %v9014_v18, 5 }
 0x1fa   : > { %v2585_v39 = vor.u32 %v2584_v2, %v2581_v52  ;;  %v3176_v25 = vshrl.u32 %v2741_v56, 16  ;;  %v3179_v63 = vshll.u32 %v2741_v56, 16  ;;  %v2950_v1 = vsel %vm1544_vm7, %v2941_v38, %v2949_v32  ;;  %v9275_v32 = vld [vmem:[#allocation4 + $0xd8] sm:$0xf] }
 0x1fb   : > { %v2743_v6 = vsel %vm1495_vm6, %v2741_v56, %v10411_v12  ;;  %v10412_v33 = vrot.slane %v9016_v19, 5  ;;  %3755 = vmatmul.mubr.bf16.gmra.mrb[36].mxu1 %v2950_v1  ;;  %v3219_v57 = vshrl.u32 %v2744_v11, 16  ;;  %v3222_v3 = vshll.u32 %v2744_v11, 16 }
 0x1fc   : > { %v3184_v37 = vshrl.u32 %v2743_v6, 16  ;;  %v3187_v23 = vshll.u32 %v2743_v6, 16  ;;  %v2995_v48 = vshrl.u32 %v2585_v39, 16  ;;  %v2998_v47 = vshll.u32 %v2585_v39, 16 }
 0x1fd   : > { %v2746_v13 = vsel %vm1495_vm6, %v2744_v11, %v10412_v33  ;;  %v3178_v61 = vrot.slane %v3176_v25, 3  ;;  %v3181_v50 = vrot.slane %v3179_v63, 4  ;;  %v3221_v16 = vrot.slane %v3219_v57, 3 }
 0x1fe   : > { %v3186_v18 = vrot.slane %v3184_v37, 3  ;;  %v3189_v17 = vrot.slane %v3187_v23, 4  ;;  %v2997_v10 = vrot.slane %v2995_v48, 3  ;;  %v3000_v45 = vrot.slane %v2998_v47, 4  ;;  %v8318_v48 = vld [vmem:[#allocation8 + $0x20] sm:$0xff]   ;;  %v8319_v47 = vld [vmem:[#allocation8 + $0x68] sm:$0xff]  }
 0x1ff   : > { %v3182_v54 = vor.u32 %v3181_v50, %v3178_v61  ;;  %v3227_v40 = vshrl.u32 %v2746_v13, 16  ;;  %v3224_v5 = vrot.slane %v3222_v3, 4  ;;  %v3230_v19 = vshll.u32 %v2746_v13, 16  ;;  %7370 = vmatpush3.bf16.msra.mxu1 %v8318_v48  ;;  %v8331_v48 = vld [vmem:[#allocation8 + $0x78] sm:$0xff]  }
 0x200   : > { %v3190_v44 = vor.u32 %v3189_v17, %v3186_v18  ;;  %v3001_v34 = vor.u32 %v3000_v45, %v2997_v10  ;;  %v2978_v9 = vshrl.u32 %v6942_v7, 16  ;;  %v2981_v38 = vshll.u32 %v6942_v7, 16  ;;  %7371 = vmatprep.subr.bf16.mxu1 %v8319_v47 }
 0x201   : > { %v3229_v22 = vrot.slane %v3227_v40, 3  ;;  %v3225_v59 = vor.u32 %v3224_v5, %v3221_v16  ;;  %v3232_v2 = vrot.slane %v3230_v19, 4  ;;  %v2986_v56 = vshrl.u32 %v6943_v14, 16 }
 0x202   : > { %v3191_v52 = vsel %vm1544_vm7, %v3182_v54, %v3190_v44  ;;  %3762 = vmatprep.mubr.bf16.mxu1 %v3001_v34  ;;  %v2980_v11 = vrot.slane %v2978_v9, 3  ;;  %v2983_v35 = vrot.slane %v2981_v38, 4  ;;  %v2989_v39 = vshll.u32 %v6943_v14, 16  ;;  %v8321_v54 = vld [vmem:[#allocation8 + $0x28] sm:$0xff]  }
 0x203   : > { %7742 = vmatmul.mubr.bf16.gmra.mrb[32].mxu0 %v3191_v52  ;;  %v2589_v12 = vrot.slane %v2587_v28, 4  ;;  %v3233_v6 = vor.u32 %v3232_v2, %v3229_v22  ;;  %v2988_v7 = vrot.slane %v2986_v56, 3  ;;  %v2590_v25 = vshll.u32 %v9189_v27, 16  ;;  %7372 = vmatpush3.bf16.msra.mxu1 %v8321_v54 }
 0x204   : > { %v9280_v63 = vcombine.low %v9268_v58, %v9270_v60  ;;  %v2984_v1 = vor.u32 %v2983_v35, %v2980_v11  ;;  %v2991_v37 = vrot.slane %v2989_v39, 4  ;;  %v9284_v23 = vcombine.low %v9273_v0, %v9275_v32  ;;  %v9301_v11 = vld [vmem:[#allocation4 + $0xe4] sm:$0xf]  ;;  %v2373_v35 = vld [vmem:[#allocation4 + $0xf4] sm:$0xf] }
 0x205   : > { %v6944_v33 = vcombine.low %v2348_v29, %v9183_v24  ;;  %v3234_v13 = vsel %vm1544_vm7, %v3225_v59, %v3233_v6  ;;  %v2592_v14 = vrot.slane %v2590_v25, 5  ;;  %v9291_v27 = vcombine.low %v9174_v51, %v9174_v51  ;;  %v8329_v25 = vld [vmem:[#allocation8 + $0x70] sm:$0xff]  }
 0x206   : > { %v2747_v28 = vrot.slane %v9280_v63, 5  ;;  %7745 = vmatprep.mubr.bf16.mxu0 %v3234_v13  ;;  %v2992_v61 = vor.u32 %v2991_v37, %v2988_v7  ;;  %v2750_v50 = vrot.slane %v9284_v23, 5  ;;  %v10413_v24 = vrot.slane %v9020_v26, 5  ;;  %7373 = vmatprep.subr.bf16.mxu1 %v8329_v25 }
 0x207   : > { %v3021_v18 = vshrl.u32 %v6944_v33, 16  ;;  %v3024_v17 = vshll.u32 %v6944_v33, 16  ;;  %v2593_v57 = vor.u32 %v2592_v14, %v2589_v12  ;;  %v10414_v16 = vrot.slane %v9025_v31, 5  ;;  %v2374_v31 = vld [vmem:[#allocation4 + $0xf8] sm:$0xf] }
 0x208   : > { %v2749_v3 = vsel %vm1495_vm6, %v2747_v28, %v10413_v24  ;;  %v3262_v10 = vshrl.u32 %v2747_v28, 16  ;;  %v3265_v45 = vshll.u32 %v2747_v28, 16  ;;  %v2993_v51 = vsel %vm1544_vm7, %v2984_v1, %v2992_v61  ;;  %v8330_v1 = vld [vmem:[#allocation8 + $0x30] sm:$0xff]   ;;  %v9303_v28 = vld [vmem:[#allocation4 + $0xe8] sm:$0xf] }
 0x209   : > { %v3270_v40 = vshrl.u32 %v2749_v3, 16  ;;  %v3273_v44 = vshll.u32 %v2749_v3, 16  ;;  %v2752_v5 = vsel %vm1495_vm6, %v2750_v50, %v10414_v16  ;;  %3763 = vmatmul.mubr.bf16.gmra.mrb[40].mxu1 %v2993_v51  ;;  %v3038_v19 = vshrl.u32 %v2593_v57, 16 }
 0x20a   : > { %v3041_v29 = vshll.u32 %v2593_v57, 16  ;;  %v3264_v8 = vrot.slane %v3262_v10, 3  ;;  %v3267_v26 = vrot.slane %v3265_v45, 4  ;;  %v3305_v9 = vshrl.u32 %v2750_v50, 16  ;;  %7374 = vmatpush3.bf16.msra.mxu1 %v8330_v1 }
 0x20b   : > { %v3272_v34 = vrot.slane %v3270_v40, 3  ;;  %v3275_v22 = vrot.slane %v3273_v44, 4  ;;  %v3308_v38 = vshll.u32 %v2750_v50, 16  ;;  %v3040_v52 = vrot.slane %v3038_v19, 3  ;;  %v8333_v40 = vld [vmem:[#allocation8 + $0x38] sm:$0xff]   ;;  %7375 = vmatprep.subr.bf16.mxu1 %v8331_v48 }
 0x20c   : > { %v3043_v59 = vrot.slane %v3041_v29, 4  ;;  %v3268_v2 = vor.u32 %v3267_v26, %v3264_v8  ;;  %v3313_v56 = vshrl.u32 %v2752_v5, 16  ;;  %v3307_v12 = vrot.slane %v3305_v9, 3 }
 0x20d   : > { %v3276_v39 = vor.u32 %v3275_v22, %v3272_v34  ;;  %v3310_v6 = vrot.slane %v3308_v38, 4  ;;  %v3316_v7 = vshll.u32 %v2752_v5, 16  ;;  %v3023_v13 = vrot.slane %v3021_v18, 3 }
 0x20e   : > { %v3044_v37 = vor.u32 %v3043_v59, %v3040_v52  ;;  %v3315_v33 = vrot.slane %v3313_v56, 3  ;;  %v3026_v14 = vrot.slane %v3024_v17, 4  ;;  %v3029_v57 = vshrl.u32 %v9291_v27, 16  ;;  %7376 = vmatpush3.bf16.msra.mxu1 %v8333_v40 }
 0x20f   : > { %v3277_v47 = vsel %vm1544_vm7, %v3268_v2, %v3276_v39  ;;  %v3311_v61 = vor.u32 %v3310_v6, %v3307_v12  ;;  %v3318_v50 = vrot.slane %v3316_v7, 4  ;;  %v3032_v3 = vshll.u32 %v9291_v27, 16 }
 0x210   : > { %3770 = vmatprep.mubr.bf16.mxu1 %v3044_v37  ;;  %7746 = vmatmul.mubr.bf16.gmra.mrb[36].mxu0 %v3277_v47  ;;  %v3027_v24 = vor.u32 %v3026_v14, %v3023_v13  ;;  %v2595_v10 = vshrl.u32 %v9215_v21, 16  ;;  %v2598_v18 = vshll.u32 %v9215_v21, 16  ;;  %v3031_v45 = vrot.slane %v3029_v57, 3  ;;  %v2376_v47 = vld [vmem:[#allocation4 + $0x104] sm:$0xf] }
 0x211   : > { %v3319_v17 = vor.u32 %v3318_v50, %v3315_v33  ;;  %v9312_v54 = vcombine.low %v9301_v11, %v9303_v28  ;;  %v9314_v51 = vcombine.low %v2373_v35, %v2374_v31  ;;  %v3034_v44 = vrot.slane %v3032_v3, 4  ;;  %v2377_v3 = vld [vmem:[#allocation4 + $0x108] sm:$0xf] }
 0x212   : > { %v2597_v16 = vrot.slane %v2595_v10, 4  ;;  %v2600_v5 = vrot.slane %v2598_v18, 5  ;;  %v6947_v27 = vcombine.low %v9204_v43, %v9204_v43  ;;  %v3064_v8 = vshrl.u32 %v9060_v15, 16 }
 0x213   : > { %v3320_v19 = vsel %vm1544_vm7, %v3311_v61, %v3319_v17  ;;  %v2753_v21 = vrot.slane %v9312_v54, 5  ;;  %v2756_v29 = vrot.slane %v9314_v51, 5  ;;  %v3035_v26 = vor.u32 %v3034_v44, %v3031_v45 }
 0x214   : > { %7749 = vmatprep.mubr.bf16.mxu0 %v3320_v19  ;;  %v2601_v34 = vor.u32 %v2600_v5, %v2597_v16  ;;  %v3067_v22 = vshll.u32 %v9060_v15, 16  ;;  %v3072_v9 = vshrl.u32 %v6947_v27, 16  ;;  %v10415_v38 = vrot.slane %v9027_v36, 5 }
 0x215   : > { %v3348_v43 = vshrl.u32 %v2753_v21, 16  ;;  %v3351_v59 = vshll.u32 %v2753_v21, 16  ;;  %v10416_v2 = vrot.slane %v9031_v41, 5  ;;  %v3036_v35 = vsel %vm1544_vm7, %v3027_v24, %v3035_v26 }
 0x216   : > { %v2755_v52 = vsel %vm1495_vm6, %v2753_v21, %v10415_v38  ;;  %v3081_v31 = vshrl.u32 %v2601_v34, 16  ;;  %v3084_v39 = vshll.u32 %v2601_v34, 16  ;;  %3771 = vmatmul.mubr.bf16.gmra.mrb[44].mxu1 %v3036_v35  ;;  %v3391_v25 = vshrl.u32 %v2756_v29, 16 }
 0x217   : > { %v2758_v56 = vsel %vm1495_vm6, %v2756_v29, %v10416_v2  ;;  %v3356_v12 = vshrl.u32 %v2755_v52, 16  ;;  %v3350_v6 = vrot.slane %v3348_v43, 3  ;;  %v3353_v15 = vrot.slane %v3351_v59, 4 }
 0x218   : > { %v3359_v7 = vshll.u32 %v2755_v52, 16  ;;  %v3083_v36 = vrot.slane %v3081_v31, 3  ;;  %v3086_v1 = vrot.slane %v3084_v39, 4  ;;  %v3394_v33 = vshll.u32 %v2756_v29, 16  ;;  %v10417_v31 = vld [vmem:[#allocation26_spill] sm:$0xff] }
 0x219   : > { %v3358_v37 = vrot.slane %v3356_v12, 3  ;;  %v3354_v13 = vor.u32 %v3353_v15, %v3350_v6  ;;  %v3393_v41 = vrot.slane %v3391_v25, 3  ;;  %v3399_v48 = vshrl.u32 %v2758_v56, 16 }
 0x21a   : > { %v3361_v14 = vrot.slane %v3359_v7, 4  ;;  %v3087_v61 = vor.u32 %v3086_v1, %v3083_v36  ;;  %v3396_v50 = vrot.slane %v3394_v33, 4  ;;  %v3402_v57 = vshll.u32 %v2758_v56, 16  ;;  %v9345_v1 = vld [vmem:[#allocation4 + $0xc] ss:$0 sps:$4 sm:$0x11]  }
 0x21b   : > { %v3066_v24 = vrot.slane %v3064_v8, 3  ;;  %v3401_v18 = vrot.slane %v3399_v48, 3  ;;  %v3069_v17 = vrot.slane %v3067_v22, 4  ;;  %v3074_v45 = vrot.slane %v3072_v9, 3 }
 0x21c   : > { %v3362_v10 = vor.u32 %v3361_v14, %v3358_v37  ;;  %3778 = vmatprep.mubr.bf16.mxu1 %v3087_v61  ;;  %v3397_v40 = vor.u32 %v3396_v50, %v3393_v41  ;;  %v3404_v44 = vrot.slane %v3402_v57, 4  ;;  %v3075_v16 = vshll.u32 %v6947_v27, 16  ;;  %v8265_v14 = vld [vmem:[#allocation4 + $0x1c] ss:$0 sps:$4 sm:$0x11]  }
 0x21d   : > { %v2603_v5 = vshrl.u32 %v9222_v42, 16  ;;  %v3070_v21 = vor.u32 %v3069_v17, %v3066_v24  ;;  %v2606_v29 = vshll.u32 %v9222_v42, 16  ;;  %v9333_v26 = vcombine.low %v2376_v47, %v2377_v3 }
 0x21e   : > { %v3363_v19 = vsel %vm1544_vm7, %v3354_v13, %v3362_v10  ;;  %v3405_v8 = vor.u32 %v3404_v44, %v3401_v18  ;;  %v3077_v34 = vrot.slane %v3075_v16, 4  ;;  %v6949_v22 = vcombine.low %v9210_v46, %v9210_v46  ;;  %v1116_v10 = vld [vmem:[#allocation4 + $0x18] sm:$0xf]  ;;  %v8268_v44 = vld [vmem:[#allocation4 + $0x2c] ss:$0 sps:$4 sm:$0x11]  }
 0x21f   : > { %7750 = vmatmul.mubr.bf16.gmra.mrb[40].mxu0 %v3363_v19  ;;  %v2605_v38 = vrot.slane %v2603_v5, 4  ;;  %v2608_v9 = vrot.slane %v2606_v29, 5  ;;  %v2759_v52 = vrot.slane %v9333_v26, 5  ;;  %v3107_v27 = vshrl.u32 %v9063_v20, 16  ;;  %v2357_v29 = vld [vmem:[#allocation4 + $0xa0] sm:$0x8] }
 0x220   : > { %v3110_v43 = vshll.u32 %v9063_v20, 16  ;;  %v3406_v59 = vsel %vm1544_vm7, %v3397_v40, %v3405_v8  ;;  %v3078_v2 = vor.u32 %v3077_v34, %v3074_v45  ;;  %v3115_v42 = vshrl.u32 %v6949_v22, 16 }
 0x221   : > { %v3118_v56 = vshll.u32 %v6949_v22, 16  ;;  %7753 = vmatprep.mubr.bf16.mxu0 %v3406_v59  ;;  %v2609_v35 = vor.u32 %v2608_v9, %v2605_v38  ;;  %v10418_v39 = vrot.slane %v10417_v31, 5  ;;  %v3434_v6 = vshrl.u32 %v2759_v52, 16 }
 0x222   : > { %v3437_v46 = vshll.u32 %v2759_v52, 16  ;;  %v3079_v15 = vsel %vm1544_vm7, %v3070_v21, %v3078_v2  ;;  %v3109_v36 = vrot.slane %v3107_v27, 3  ;;  %v3112_v47 = vrot.slane %v3110_v43, 4  ;;  %v1119_v21 = vld [vmem:[#allocation4 + $0x28] sm:$0xf] }
 0x223   : > { %v2761_v12 = vsel %vm1495_vm6, %v2759_v52, %v10418_v39  ;;  %3779 = vmatmul.mubr.bf16.gmra.mrb[48].mxu1 %v3079_v15  ;;  %v3124_v20 = vshrl.u32 %v2609_v35, 16  ;;  %v3127_v37 = vshll.u32 %v2609_v35, 16  ;;  %v3436_v33 = vrot.slane %v3434_v6, 3  ;;  %v1115_v52 = vld [vmem:[#allocation4 + $0x14] sm:$0xf] }
 0x224   : > { %v3442_v7 = vshrl.u32 %v2761_v12, 16  ;;  %v3445_v25 = vshll.u32 %v2761_v12, 16  ;;  %v3439_v13 = vrot.slane %v3437_v46, 4  ;;  %v3117_v61 = vrot.slane %v3115_v42, 3  ;;  %v1118_v2 = vld [vmem:[#allocation4 + $0x24] sm:$0xf] }
 0x225   : > { %v3126_v50 = vrot.slane %v3124_v20, 3  ;;  %v3129_v57 = vrot.slane %v3127_v37, 4  ;;  %v3120_v3 = vrot.slane %v3118_v56, 4  ;;  %v3113_v17 = vor.u32 %v3112_v47, %v3109_v36 }
 0x226   : > { %v3444_v41 = vrot.slane %v3442_v7, 3  ;;  %v3447_v48 = vrot.slane %v3445_v25, 4  ;;  %v3440_v24 = vor.u32 %v3439_v13, %v3436_v33  ;;  %v2611_v45 = vshrl.u32 %v9248_v62, 16 }
 0x227   : > { %v2614_v40 = vshll.u32 %v9248_v62, 16  ;;  %v3130_v16 = vor.u32 %v3129_v57, %v3126_v50  ;;  %v3121_v5 = vor.u32 %v3120_v3, %v3117_v61  ;;  %v1497_v19 = vrot.slane %v9345_v1, 5 }
 0x228   : > { %v3448_v18 = vor.u32 %v3447_v48, %v3444_v41  ;;  %v2613_v34 = vrot.slane %v2611_v45, 4  ;;  %v8687_v22 = vmov 0.0|0.0   ;;  %v9352_v62 = vcombine.low %v1115_v52, %v1116_v10  ;;  %v8273_v10 = vld [vmem:[#allocation4 + $0x3c] ss:$0 sps:$4 sm:$0x11]  }
 0x229   : > { %v2616_v38 = vrot.slane %v2614_v40, 5  ;;  %v6832_v9 = vcombine.low %v8687_v22, %v8687_v22  ;;  %3786 = vmatprep.mubr.bf16.mxu1 %v3130_v16  ;;  %v3122_v27 = vsel %vm1544_vm7, %v3113_v17, %v3121_v5  ;;  %v6833_v43 = vcombine.high %v8687_v22, %v8687_v22  ;;  %v1122_v52 = vld [vmem:[#allocation4 + $0x38] sm:$0xf] }
 0x22a   : > { %v3449_v8 = vsel %vm1544_vm7, %v3440_v24, %v3448_v18  ;;  %v1500_v59 = vrot.slane %v8265_v14, 5  ;;  %v9354_v56 = vcombine.low %v1118_v2, %v1119_v21  ;;  %v1503_v35 = vrot.slane %v8268_v44, 5 }
 0x22b   : > { %7754 = vmatmul.mubr.bf16.gmra.mrb[44].mxu0 %v3449_v8  ;;  %v2617_v42 = vor.u32 %v2616_v38, %v2613_v34  ;;  %1075 = vst [vmem:[#allocation4 + $0x4] sm:$0xf] %v6832_v9  ;;  %1109 = vst [vmem:[#allocation4 + $0x114] sm:$0xf] %v6832_v9  ;;  %v6950_v31 = vcombine.low %v2357_v29, %v9235_v55  ;;  %3787 = vmatmul.mubr.bf16.gmra.mrb[52].mxu1 %v3122_v27  ;;  %v1499_v39 = vrot.slane %v9352_v62, 5 }
 0x22c   : > { %1076 = vst [vmem:[#allocation4 + $0x8] sm:$0xf] %v6833_v43  ;;  %1110 = vst [vmem:[#allocation4 + $0x118] sm:$0xf] %v6833_v43  ;;  %v6951_v12 = vcombine.low %v9237_v4, %v9237_v4  ;;  %v2619_v6 = vshrl.u32 %v9252_v30, 16  ;;  %v2622_v46 = vshll.u32 %v9252_v30, 16 }
 0x22d   : > { %v3167_v15 = vshrl.u32 %v2617_v42, 16  ;;  %v3170_v7 = vshll.u32 %v2617_v42, 16  ;;  %v1502_v25 = vrot.slane %v9354_v56, 5  ;;  %v3150_v36 = vshrl.u32 %v6950_v31, 16 }
 0x22e   : > { %v1501_v20 = vsel %vm1495_vm6, %v1499_v39, %v1500_v59  ;;  %v1615_v55 = vshrl.u32 %v1499_v39, 16  ;;  %v1618_v37 = vshll.u32 %v1499_v39, 16  ;;  %v3153_v33 = vshll.u32 %v6950_v31, 16 }
 0x22f   : > { %v3169_v13 = vrot.slane %v3167_v15, 3  ;;  %v3172_v14 = vrot.slane %v3170_v7, 4  ;;  %v1623_v41 = vshrl.u32 %v1501_v20, 16  ;;  %v1626_v48 = vshll.u32 %v1501_v20, 16  ;;  %v1121_v15 = vld [vmem:[#allocation4 + $0x34] sm:$0xf] }
 0x230   : > { %v1617_v47 = vrot.slane %v1615_v55, 3  ;;  %v1620_v4 = vrot.slane %v1618_v37, 4  ;;  %v1504_v61 = vsel %vm1495_vm6, %v1502_v25, %v1503_v35  ;;  %v1658_v50 = vshrl.u32 %v1502_v25, 16  ;;  %v1125_v55 = vld [vmem:[#allocation4 + $0x48] sm:$0xf] }
 0x231   : > { %v3173_v30 = vor.u32 %v3172_v14, %v3169_v13  ;;  %v1625_v57 = vrot.slane %v1623_v41, 3  ;;  %v1628_v24 = vrot.slane %v1626_v48, 4  ;;  %v1661_v3 = vshll.u32 %v1502_v25, 16 }
 0x232   : > { %v9365_v18 = vld [vmem:[#allocation4 + $0x4] sm:$0xf]  ;;  %v1621_v17 = vor.u32 %v1620_v4, %v1617_v47  ;;  %v1660_v45 = vrot.slane %v1658_v50, 3  ;;  %v1666_v40 = vshrl.u32 %v1504_v61, 16  ;;  %v1669_v44 = vshll.u32 %v1504_v61, 16 }
 0x233   : > { %3794 = vmatprep.mubr.bf16.mxu1 %v3173_v30  ;;  %v9367_v16 = vld [vmem:[#allocation4 + $0x8] sm:$0xf]  ;;  %v1629_v5 = vor.u32 %v1628_v24, %v1625_v57  ;;  %v1663_v21 = vrot.slane %v1661_v3, 4  ;;  %v3152_v29 = vrot.slane %v3150_v36, 3  ;;  %v3155_v8 = vrot.slane %v3153_v33, 4 }
 0x234   : > { %v9371_v34 = vcombine.low %v9365_v18, %v9367_v16  ;;  %v1668_v38 = vrot.slane %v1666_v40, 3  ;;  %v1671_v22 = vrot.slane %v1669_v44, 4  ;;  %v3158_v9 = vshrl.u32 %v6951_v12, 16  ;;  %v8276_v24 = vld [vmem:[#allocation4 + $0x4c] ss:$0 sps:$4 sm:$0x11]  }
 0x235   : > { %v1630_v27 = vsel %vm1544_vm7, %v1621_v17, %v1629_v5  ;;  %v1664_v43 = vor.u32 %v1663_v21, %v1660_v45  ;;  %v3156_v59 = vor.u32 %v3155_v8, %v3152_v29  ;;  %v3161_v2 = vshll.u32 %v6951_v12, 16  ;;  %v8266_v44 = vld [vmem:[#allocation8 + $0x180] sm:$0xff]  }
 0x236   : > { %v1496_v42 = vrot.slane %v9371_v34, 5  ;;  %v1672_v35 = vor.u32 %v1671_v22, %v1668_v38  ;;  %v3160_v31 = vrot.slane %v3158_v9, 3  ;;  %v2621_v39 = vrot.slane %v2619_v6, 4  ;;  %v1124_v6 = vld [vmem:[#allocation4 + $0x44] sm:$0xf] }
 0x237   : > { %v3163_v7 = vrot.slane %v3161_v2, 4  ;;  %v2624_v25 = vrot.slane %v2622_v46, 5  ;;  %v9375_v36 = vcombine.low %v1121_v15, %v1122_v52  ;;  %v1506_v20 = vrot.slane %v8273_v10, 5  ;;  %v2360_v52 = vld [vmem:[#allocation4 + $0xb0] sm:$0x8] }
 0x238   : > { %v1498_v37 = vsel %vm1495_vm6, %v1496_v42, %v1497_v19  ;;  %v1572_v33 = vshrl.u32 %v1496_v42, 16  ;;  %v1575_v13 = vshll.u32 %v1496_v42, 16  ;;  %v1673_v12 = vsel %vm1544_vm7, %v1664_v43, %v1672_v35 }
 0x239   : > { %v1580_v14 = vshrl.u32 %v1498_v37, 16  ;;  %v1583_v41 = vshll.u32 %v1498_v37, 16  ;;  %v3164_v48 = vor.u32 %v3163_v7, %v3160_v31  ;;  %v2625_v47 = vor.u32 %v2624_v25, %v2621_v39 }
 0x23a   : > { %v1574_v4 = vrot.slane %v1572_v33, 3  ;;  %v1577_v61 = vrot.slane %v1575_v13, 4  ;;  %v1505_v46 = vrot.slane %v9375_v36, 5  ;;  %v9382_v50 = vcombine.low %v1124_v6, %v1125_v55  ;;  %v1128_v33 = vld [vmem:[#allocation4 + $0x58] sm:$0xf] }
 0x23b   : > { %v1582_v30 = vrot.slane %v1580_v14, 3  ;;  %v1585_v57 = vrot.slane %v1583_v41, 4  ;;  %v3165_v1 = vsel %vm1544_vm7, %v3156_v59, %v3164_v48  ;;  %v3210_v19 = vshrl.u32 %v2625_v47, 16  ;;  %v8271_v59 = vld [vmem:[#allocation8 + $0x1c8] sm:$0xff]  }
 0x23c   : > { %v1578_v3 = vor.u32 %v1577_v61, %v1574_v4  ;;  %3795 = vmatmul.mubr.bf16.gmra.mrb[56].mxu1 %v3165_v1  ;;  %v3213_v10 = vshll.u32 %v2625_v47, 16  ;;  %v1507_v17 = vsel %vm1495_vm6, %v1505_v46, %v1506_v20  ;;  %v1701_v45 = vshrl.u32 %v1505_v46, 16  ;;  %v8283_v13 = vld [vmem:[#allocation4 + $0x5c] ss:$0 sps:$4 sm:$0x11]   ;;  %v8274_v41 = vld [vmem:[#allocation8 + $0x188] sm:$0xff]  }
 0x23d   : > { %v1586_v40 = vor.u32 %v1585_v57, %v1582_v30  ;;  %v3212_v5 = vrot.slane %v3210_v19, 3  ;;  %v1704_v21 = vshll.u32 %v1505_v46, 16  ;;  %v1709_v29 = vshrl.u32 %v1507_v17, 16  ;;  %v1131_v4 = vld [vmem:[#allocation4 + $0x68] sm:$0xf] }
 0x23e   : > { %v3215_v8 = vrot.slane %v3213_v10, 4  ;;  %v1703_v38 = vrot.slane %v1701_v45, 3  ;;  %v1712_v22 = vshll.u32 %v1507_v17, 16  ;;  %v1508_v9 = vrot.slane %v9382_v50, 5  ;;  %v1127_v57 = vld [vmem:[#allocation4 + $0x54] sm:$0xf] }
 0x23f   : > { %v1587_v43 = vsel %vm1544_vm7, %v1578_v3, %v1586_v40  ;;  %v1706_v2 = vrot.slane %v1704_v21, 4  ;;  %v1711_v42 = vrot.slane %v1709_v29, 3  ;;  %v1509_v35 = vrot.slane %v8276_v24, 5  ;;  %v1130_v40 = vld [vmem:[#allocation4 + $0x64] sm:$0xf] }
 0x240   : > { %7773 = vmatprep.mubr.bf16.mxu0 %v1587_v43  ;;  %v3216_v31 = vor.u32 %v3215_v8, %v3212_v5  ;;  %v1714_v39 = vrot.slane %v1712_v22, 4  ;;  %v1744_v15 = vshrl.u32 %v1508_v9, 16  ;;  %v1747_v7 = vshll.u32 %v1508_v9, 16  ;;  %v8284_v8 = vld [vmem:[#allocation8 + $0x190] sm:$0xff]  }
 0x241   : > { %7774 = vmatmul.mubr.bf16.vlgmr.msra.gmra.mrb[16].mxu0 %v1630_v27  ;;  %v1707_v25 = vor.u32 %v1706_v2, %v1703_v38  ;;  %v1510_v20 = vsel %vm1495_vm6, %v1508_v9, %v1509_v35  ;;  %v6952_v55 = vcombine.low %v2360_v52, %v9239_v49  ;;  %v6953_v37 = vcombine.low %v9242_v53, %v9242_v53  ;;  %v8281_v49 = vld [vmem:[#allocation8 + $0x1d0] sm:$0xff]   ;;  %v2363_v38 = vld [vmem:[#allocation4 + $0xc0] sm:$0x8] }
 0x242   : > { %7498 = vmatpush3.bf16.msra.mxu0 %v8266_v44  ;;  %7777 = vmatprep.mubr.bf16.mxu0 %v1673_v12  ;;  %v1715_v14 = vor.u32 %v1714_v39, %v1711_v42  ;;  %v1746_v48 = vrot.slane %v1744_v15, 3  ;;  %v1749_v47 = vrot.slane %v1747_v7, 4  ;;  %v1752_v6 = vshrl.u32 %v1510_v20, 16  ;;  %v8286_v12 = vld [vmem:[#allocation4 + $0x6c] ss:$0 sps:$4 sm:$0x11]  }
 0x243   : > { %3802 = vmatprep.mubr.bf16.mxu1 %v3216_v31  ;;  %7499 = vmatprep.subr.bf16.mxu0 %v8271_v59  ;;  %v1755_v27 = vshll.u32 %v1510_v20, 16  ;;  %v3193_v61 = vshrl.u32 %v6952_v55, 16  ;;  %v3196_v46 = vshll.u32 %v6952_v55, 16  ;;  %v3201_v30 = vshrl.u32 %v6953_v37, 16  ;;  %v8289_v59 = vld [vmem:[#allocation8 + $0x1d8] sm:$0xff]  }
 0x244   : > { %v1716_v53 = vsel %vm1544_vm7, %v1707_v25, %v1715_v14  ;;  %v1750_v1 = vor.u32 %v1749_v47, %v1746_v48  ;;  %v1754_v19 = vrot.slane %v1752_v6, 3  ;;  %v3204_v24 = vshll.u32 %v6953_v37, 16  ;;  %v8299_v47 = vld [vmem:[#allocation8 + $0x1e0] sm:$0xff]  }
 0x245   : > { %v1757_v3 = vrot.slane %v1755_v27, 4  ;;  %v3195_v10 = vrot.slane %v3193_v61, 3  ;;  %v3198_v17 = vrot.slane %v3196_v46, 4  ;;  %v3203_v45 = vrot.slane %v3201_v30, 3 }
 0x246   : > { %7500 = vmatpush3.bf16.msra.mxu0 %v8274_v41  ;;  %v3206_v44 = vrot.slane %v3204_v24, 4  ;;  %v2627_v5 = vshrl.u32 %v9280_v63, 16  ;;  %v2630_v21 = vshll.u32 %v9280_v63, 16  ;;  %v9395_v29 = vcombine.low %v1127_v57, %v1128_v33  ;;  %v8292_v33 = vld [vmem:[#allocation8 + $0x198] sm:$0xff]  }
 0x247   : > { %v1758_v22 = vor.u32 %v1757_v3, %v1754_v19  ;;  %v3199_v9 = vor.u32 %v3198_v17, %v3195_v10  ;;  %7501 = vmatprep.subr.bf16.mxu0 %v8281_v49  ;;  %v1512_v52 = vrot.slane %v8283_v13, 5  ;;  %v9397_v43 = vcombine.low %v1130_v40, %v1131_v4  ;;  %v1134_v17 = vld [vmem:[#allocation4 + $0x78] sm:$0xf] }
 0x248   : > { %v3207_v2 = vor.u32 %v3206_v44, %v3203_v45  ;;  %v2629_v42 = vrot.slane %v2627_v5, 4  ;;  %v2632_v35 = vrot.slane %v2630_v21, 5  ;;  %v1511_v31 = vrot.slane %v9395_v29, 5  ;;  %v8302_v45 = vld [vmem:[#allocation8 + $0x1a0] sm:$0xff]  }
 0x249   : > { %7778 = vmatmul.mubr.bf16.gmra.mrb[20].mxu0 %v1716_v53  ;;  %v1759_v39 = vsel %vm1544_vm7, %v1750_v1, %v1758_v22  ;;  %v1514_v63 = vrot.slane %v9397_v43, 5  ;;  %v1515_v15 = vrot.slane %v8286_v12, 5  ;;  %v6954_v7 = vcombine.low %v2363_v38, %v9268_v58  ;;  %v8291_v38 = vld [vmem:[#allocation4 + $0x7c] ss:$0 sps:$4 sm:$0x11]   ;;  %v8308_v22 = vld [vmem:[#allocation8 + $0x1e8] sm:$0xff]  }
 0x24a   : > { %7781 = vmatprep.mubr.bf16.mxu0 %v1759_v39  ;;  %v3208_v25 = vsel %vm1544_vm7, %v3199_v9, %v3207_v2  ;;  %v2633_v20 = vor.u32 %v2632_v35, %v2629_v42  ;;  %v1513_v55 = vsel %vm1495_vm6, %v1511_v31, %v1512_v52  ;;  %v1787_v37 = vshrl.u32 %v1511_v31, 16  ;;  %7502 = vmatpush3.bf16.msra.mxu0 %v8284_v8  ;;  %v1133_v8 = vld [vmem:[#allocation4 + $0x74] sm:$0xf]  ;;  %v1136_v42 = vld [vmem:[#allocation4 + $0x84] sm:$0xf] }
 0x24b   : > { %3803 = vmatmul.mubr.bf16.gmra.mrb[60].mxu1 %v3208_v25  ;;  %v1790_v13 = vshll.u32 %v1511_v31, 16  ;;  %v1795_v14 = vshrl.u32 %v1513_v55, 16  ;;  %v1798_v41 = vshll.u32 %v1513_v55, 16  ;;  %v1516_v48 = vsel %vm1495_vm6, %v1514_v63, %v1515_v15  ;;  %7503 = vmatprep.subr.bf16.mxu0 %v8289_v59  ;;  %v8294_v35 = vld [vmem:[#allocation4 + $0x8c] ss:$0 sps:$4 sm:$0x11]  }
 0x24c   : > { %v3253_v6 = vshrl.u32 %v2633_v20, 16  ;;  %v3256_v4 = vshll.u32 %v2633_v20, 16  ;;  %v1789_v58 = vrot.slane %v1787_v37, 3  ;;  %v1830_v27 = vshrl.u32 %v1514_v63, 16  ;;  %v1137_v25 = vld [vmem:[#allocation4 + $0x88] sm:$0xf] }
 0x24d   : > { %v1792_v61 = vrot.slane %v1790_v13, 4  ;;  %v1797_v46 = vrot.slane %v1795_v14, 3  ;;  %v1800_v30 = vrot.slane %v1798_v41, 4  ;;  %v1833_v49 = vshll.u32 %v1514_v63, 16  ;;  %v8312_v13 = vld [vmem:[#allocation8 + $0x1a8] sm:$0xff]  }
 0x24e   : > { %v3255_v57 = vrot.slane %v3253_v6, 3  ;;  %v3258_v53 = vrot.slane %v3256_v4, 4  ;;  %v1832_v1 = vrot.slane %v1830_v27, 3  ;;  %v1838_v19 = vshrl.u32 %v1516_v48, 16  ;;  %7504 = vmatpush3.bf16.msra.mxu0 %v8292_v33  ;;  %v2366_v33 = vld [vmem:[#allocation4 + $0xd0] sm:$0x8] }
 0x24f   : > { %v1793_v24 = vor.u32 %v1792_v61, %v1789_v58  ;;  %v1801_v12 = vor.u32 %v1800_v30, %v1797_v46  ;;  %v1835_v3 = vrot.slane %v1833_v49, 4  ;;  %v1841_v10 = vshll.u32 %v1516_v48, 16  ;;  %7505 = vmatprep.subr.bf16.mxu0 %v8299_v47  ;;  %v8320_v47 = vld [vmem:[#allocation8 + $0x1f0] sm:$0xff]  }
 0x250   : > { %v3259_v40 = vor.u32 %v3258_v53, %v3255_v57  ;;  %v1840_v44 = vrot.slane %v1838_v19, 3  ;;  %v6955_v5 = vcombine.low %v9270_v60, %v9270_v60  ;;  %v3236_v21 = vshrl.u32 %v6954_v7, 16  ;;  %v8324_v19 = vld [vmem:[#allocation8 + $0x1b0] sm:$0xff]  }
 0x251   : > { %v1802_v9 = vsel %vm1544_vm7, %v1793_v24, %v1801_v12  ;;  %v1836_v52 = vor.u32 %v1835_v3, %v1832_v1  ;;  %v1843_v59 = vrot.slane %v1841_v10, 4  ;;  %v3239_v2 = vshll.u32 %v6954_v7, 16 }
 0x252   : > { %3810 = vmatprep.mubr.bf16.mxu1 %v3259_v40  ;;  %7782 = vmatmul.mubr.bf16.gmra.mrb[24].mxu0 %v1802_v9  ;;  %v3238_v31 = vrot.slane %v3236_v21, 3  ;;  %v3244_v39 = vshrl.u32 %v6955_v5, 16  ;;  %v3247_v63 = vshll.u32 %v6955_v5, 16  ;;  %v2635_v15 = vshrl.u32 %v9284_v23, 16 }
 0x253   : > { %v1844_v60 = vor.u32 %v1843_v59, %v1840_v44  ;;  %v3241_v20 = vrot.slane %v3239_v2, 4  ;;  %v2638_v55 = vshll.u32 %v9284_v23, 16  ;;  %v9411_v37 = vcombine.low %v1133_v8, %v1134_v17  ;;  %7506 = vmatpush3.bf16.msra.mxu0 %v8302_v45  ;;  %v8332_v17 = vld [vmem:[#allocation8 + $0x1f8] sm:$0xff]  }
 0x254   : > { %v3246_v7 = vrot.slane %v3244_v39, 3  ;;  %v3249_v14 = vrot.slane %v3247_v63, 4  ;;  %v2637_v41 = vrot.slane %v2635_v15, 4  ;;  %v1518_v48 = vrot.slane %v8291_v38, 5  ;;  %7507 = vmatprep.subr.bf16.mxu0 %v8308_v22  ;;  %v1139_v39 = vld [vmem:[#allocation4 + $0x94] sm:$0xf] }
 0x255   : > { %v1845_v6 = vsel %vm1544_vm7, %v1836_v52, %v1844_v60  ;;  %v3242_v4 = vor.u32 %v3241_v20, %v3238_v31  ;;  %v2640_v58 = vrot.slane %v2638_v55, 5  ;;  %v1517_v27 = vrot.slane %v9411_v37, 5  ;;  %v1140_v63 = vld [vmem:[#allocation4 + $0x98] sm:$0xf] }
 0x256   : > { %7785 = vmatprep.mubr.bf16.mxu0 %v1845_v6  ;;  %v3250_v61 = vor.u32 %v3249_v14, %v3246_v7  ;;  %v9415_v23 = vcombine.low %v1136_v42, %v1137_v25  ;;  %v1521_v46 = vrot.slane %v8294_v35, 5  ;;  %v6956_v30 = vcombine.low %v2366_v33, %v9273_v0  ;;  %v8336_v15 = vld [vmem:[#allocation8 + $0x1b8] sm:$0xff]  }
 0x257   : > { %v2641_v49 = vor.u32 %v2640_v58, %v2637_v41  ;;  %v1519_v57 = vsel %vm1495_vm6, %v1517_v27, %v1518_v48  ;;  %v1873_v53 = vshrl.u32 %v1517_v27, 16  ;;  %v1876_v1 = vshll.u32 %v1517_v27, 16  ;;  %7508 = vmatpush3.bf16.msra.mxu0 %v8312_v13  ;;  %v8301_v33 = vld [vmem:[#allocation4 + $0x9c] ss:$0 sps:$4 sm:$0x11]   ;;  %v9424_v13 = vld [vmem:[#allocation8 + $0x200] sm:$0xff]  }
 0x258   : > { %v3251_v24 = vsel %vm1544_vm7, %v3242_v4, %v3250_v61  ;;  %v1881_v12 = vshrl.u32 %v1519_v57, 16  ;;  %v1884_v3 = vshll.u32 %v1519_v57, 16  ;;  %v1520_v10 = vrot.slane %v9415_v23, 5  ;;  %7509 = vmatprep.subr.bf16.mxu0 %v8320_v47  ;;  %v1142_v47 = vld [vmem:[#allocation4 + $0xa4] sm:$0xf] }
 0x259   : > { %3811 = vmatmul.mubr.bf16.gmra.mrb[64].mxu1 %v3251_v24  ;;  %v3296_v45 = vshrl.u32 %v2641_v49, 16  ;;  %v3299_v40 = vshll.u32 %v2641_v49, 16  ;;  %v1875_v44 = vrot.slane %v1873_v53, 3  ;;  %v1878_v0 = vrot.slane %v1876_v1, 4  ;;  %v1143_v53 = vld [vmem:[#allocation4 + $0xa8] sm:$0xf] }
 0x25a   : > { %v1883_v5 = vrot.slane %v1881_v12, 3  ;;  %v1886_v21 = vrot.slane %v1884_v3, 4  ;;  %v1522_v8 = vsel %vm1495_vm6, %v1520_v10, %v1521_v46  ;;  %v1916_v38 = vshrl.u32 %v1520_v10, 16  ;;  %v8304_v61 = vld [vmem:[#allocation4 + $0xac] ss:$0 sps:$4 sm:$0x11]  }
 0x25b   : > { %v3298_v22 = vrot.slane %v3296_v45, 3  ;;  %v3301_v9 = vrot.slane %v3299_v40, 4  ;;  %v1879_v52 = vor.u32 %v1878_v0, %v1875_v44  ;;  %v1919_v59 = vshll.u32 %v1520_v10, 16  ;;  %7510 = vmatpush3.bf16.msra.mxu0 %v8324_v19  ;;  %v2369_v12 = vld [vmem:[#allocation4 + $0xe0] sm:$0x8] }
 0x25c   : > { %v1887_v2 = vor.u32 %v1886_v21, %v1883_v5  ;;  %v1918_v42 = vrot.slane %v1916_v38, 3  ;;  %v1924_v35 = vshrl.u32 %v1522_v8, 16  ;;  %v1927_v31 = vshll.u32 %v1522_v8, 16  ;;  %7511 = vmatprep.subr.bf16.mxu0 %v8332_v17 }
 0x25d   : > { %v3302_v25 = vor.u32 %v3301_v9, %v3298_v22  ;;  %v1921_v60 = vrot.slane %v1919_v59, 4  ;;  %v6957_v20 = vcombine.low %v9275_v32, %v9275_v32  ;;  %v3279_v55 = vshrl.u32 %v6956_v30, 16 }
 0x25e   : > { %v1888_v7 = vsel %vm1544_vm7, %v1879_v52, %v1887_v2  ;;  %v1926_v14 = vrot.slane %v1924_v35, 3  ;;  %v1929_v41 = vrot.slane %v1927_v31, 4  ;;  %v3282_v48 = vshll.u32 %v6956_v30, 16 }
 0x25f   : > { %3818 = vmatprep.mubr.bf16.mxu1 %v3302_v25  ;;  %7786 = vmatmul.mubr.bf16.gmra.mrb[28].mxu0 %v1888_v7  ;;  %v1922_v6 = vor.u32 %v1921_v60, %v1918_v42  ;;  %v3281_v4 = vrot.slane %v3279_v55, 3  ;;  %v3287_v58 = vshrl.u32 %v6957_v20, 16  ;;  %v3290_v27 = vshll.u32 %v6957_v20, 16 }
 0x260   : > { %v1930_v46 = vor.u32 %v1929_v41, %v1926_v14  ;;  %v3284_v49 = vrot.slane %v3282_v48, 4  ;;  %v2643_v32 = vshrl.u32 %v9312_v54, 16  ;;  %v2646_v57 = vshll.u32 %v9312_v54, 16  ;;  %7512 = vmatpush3.bf16.msra.mxu0 %v8336_v15  ;;  %v1145_v41 = vld [vmem:[#allocation4 + $0xb4] sm:$0xf] }
 0x261   : > { %v3289_v1 = vrot.slane %v3287_v58, 3  ;;  %v3292_v19 = vrot.slane %v3290_v27, 4  ;;  %v9429_v24 = vcombine.low %v1139_v39, %v1140_v63  ;;  %v1524_v30 = vrot.slane %v8301_v33, 5  ;;  %7805 = vmatprep.subr.bf16.mxu0 %v9424_v13  ;;  %v8311_v48 = vld [vmem:[#allocation4 + $0xbc] ss:$0 sps:$4 sm:$0x11]  }
 0x262   : > { %v1931_v3 = vsel %vm1544_vm7, %v1922_v6, %v1930_v46  ;;  %v3285_v10 = vor.u32 %v3284_v49, %v3281_v4  ;;  %v2645_v17 = vrot.slane %v2643_v32, 4  ;;  %v2648_v45 = vrot.slane %v2646_v57, 5  ;;  %v1146_v27 = vld [vmem:[#allocation4 + $0xb8] sm:$0xf] }
 0x263   : > { %7789 = vmatprep.mubr.bf16.mxu0 %v1931_v3  ;;  %v3293_v40 = vor.u32 %v3292_v19, %v3289_v1  ;;  %v1523_v44 = vrot.slane %v9429_v24, 5  ;;  %v9434_v54 = vcombine.low %v1142_v47, %v1143_v53  ;;  %v1527_v0 = vrot.slane %v8304_v61, 5  ;;  %v1148_v61 = vld [vmem:[#allocation4 + $0xc4] sm:$0xf]  ;;  %v1149_v53 = vld [vmem:[#allocation4 + $0xc8] sm:$0xf] }
 0x264   : > { %v2649_v5 = vor.u32 %v2648_v45, %v2645_v17  ;;  %v6958_v21 = vcombine.low %v2369_v12, %v9301_v11  ;;  %v6959_v8 = vcombine.low %v9303_v28, %v9303_v28  ;;  %v2651_v38 = vshrl.u32 %v9314_v51, 16  ;;  %v8314_v3 = vld [vmem:[#allocation4 + $0xcc] ss:$0 sps:$4 sm:$0x11]  }
 0x265   : > { %v3294_v22 = vsel %vm1544_vm7, %v3285_v10, %v3293_v40  ;;  %v1525_v9 = vsel %vm1495_vm6, %v1523_v44, %v1524_v30  ;;  %v1959_v52 = vshrl.u32 %v1523_v44, 16  ;;  %v1962_v59 = vshll.u32 %v1523_v44, 16 }
 0x266   : > { %3819 = vmatmul.mubr.bf16.gmra.mrb[68].mxu1 %v3294_v22  ;;  %v3339_v2 = vshrl.u32 %v2649_v5, 16  ;;  %v3342_v42 = vshll.u32 %v2649_v5, 16  ;;  %v1967_v35 = vshrl.u32 %v1525_v9, 16  ;;  %v1970_v31 = vshll.u32 %v1525_v9, 16 }
 0x267   : > { %v1961_v39 = vrot.slane %v1959_v52, 3  ;;  %v1964_v63 = vrot.slane %v1962_v59, 4  ;;  %v1526_v11 = vrot.slane %v9434_v54, 5  ;;  %v3322_v15 = vshrl.u32 %v6958_v21, 16 }
 0x268   : > { %v3341_v25 = vrot.slane %v3339_v2, 3  ;;  %v3344_v28 = vrot.slane %v3342_v42, 4  ;;  %v1969_v60 = vrot.slane %v1967_v35, 3  ;;  %v1972_v20 = vrot.slane %v1970_v31, 4 }
 0x269   : > { %v1965_v55 = vor.u32 %v1964_v63, %v1961_v39  ;;  %v1528_v33 = vsel %vm1495_vm6, %v1526_v11, %v1527_v0  ;;  %v2002_v7 = vshrl.u32 %v1526_v11, 16  ;;  %v2005_v14 = vshll.u32 %v1526_v11, 16  ;;  %v8449_v63 = vld [vmem:[#allocation4 + $0xf4] sm:$0xf]  ;;  %v8450_v11 = vld [vmem:[#allocation4 + $0xf8] sm:$0xf] }
 0x26a   : > { %v3345_v47 = vor.u32 %v3344_v28, %v3341_v25  ;;  %v1973_v6 = vor.u32 %v1972_v20, %v1969_v60  ;;  %v2010_v4 = vshrl.u32 %v1528_v33, 16  ;;  %v2013_v58 = vshll.u32 %v1528_v33, 16 }
 0x26b   : > { %v2004_v46 = vrot.slane %v2002_v7, 3  ;;  %v2007_v49 = vrot.slane %v2005_v14, 4  ;;  %v3324_v32 = vrot.slane %v3322_v15, 3  ;;  %v3325_v57 = vshll.u32 %v6958_v21, 16  ;;  %v2372_v21 = vld [vmem:[#allocation4 + $0xf0] sm:$0x8] }
 0x26c   : > { %3826 = vmatprep.mubr.bf16.mxu1 %v3345_v47  ;;  %v1974_v1 = vsel %vm1544_vm7, %v1965_v55, %v1973_v6  ;;  %v2012_v19 = vrot.slane %v2010_v4, 3  ;;  %v2015_v30 = vrot.slane %v2013_v58, 4  ;;  %v3330_v12 = vshrl.u32 %v6959_v8, 16 }
 0x26d   : > { %7790 = vmatmul.mubr.bf16.gmra.mrb[32].mxu0 %v1974_v1  ;;  %v2008_v10 = vor.u32 %v2007_v49, %v2004_v46  ;;  %v3327_v17 = vrot.slane %v3325_v57, 4  ;;  %v3333_v45 = vshll.u32 %v6959_v8, 16  ;;  %v2653_v40 = vrot.slane %v2651_v38, 4  ;;  %v1152_v1 = vld [vmem:[#allocation4 + $0xd8] sm:$0xf] }
 0x26e   : > { %v2016_v44 = vor.u32 %v2015_v30, %v2012_v19  ;;  %v3332_v0 = vrot.slane %v3330_v12, 3  ;;  %v2654_v5 = vshll.u32 %v9314_v51, 16  ;;  %v9446_v22 = vcombine.low %v1145_v41, %v1146_v27 }
 0x26f   : > { %v3328_v9 = vor.u32 %v3327_v17, %v3324_v32  ;;  %v3335_v52 = vrot.slane %v3333_v45, 4  ;;  %v1530_v59 = vrot.slane %v8311_v48, 5  ;;  %v9448_v2 = vcombine.low %v1148_v61, %v1149_v53  ;;  %v1151_v53 = vld [vmem:[#allocation4 + $0xd4] sm:$0xf] }
 0x270   : > { %v2017_v42 = vsel %vm1544_vm7, %v2008_v10, %v2016_v44  ;;  %v2656_v35 = vrot.slane %v2654_v5, 5  ;;  %v1529_v31 = vrot.slane %v9446_v22, 5  ;;  %v1533_v39 = vrot.slane %v8314_v3, 5  ;;  %v8323_v10 = vld [vmem:[#allocation4 + $0xdc] ss:$0 sps:$4 sm:$0x11]  }
 0x271   : > { %7793 = vmatprep.mubr.bf16.mxu0 %v2017_v42  ;;  %v3336_v8 = vor.u32 %v3335_v52, %v3332_v0  ;;  %v1532_v38 = vrot.slane %v9448_v2, 5  ;;  %v6960_v51 = vcombine.low %v2372_v21, %v8449_v63  ;;  %v6961_v15 = vcombine.low %v8450_v11, %v8450_v11  ;;  %v1154_v0 = vld [vmem:[#allocation4 + $0xe4] sm:$0xf] }
 0x272   : > { %v2657_v25 = vor.u32 %v2656_v35, %v2653_v40  ;;  %v1531_v28 = vsel %vm1495_vm6, %v1529_v31, %v1530_v59  ;;  %v2045_v60 = vshrl.u32 %v1529_v31, 16  ;;  %v2048_v20 = vshll.u32 %v1529_v31, 16  ;;  %v8326_v59 = vld [vmem:[#allocation4 + $0xec] ss:$0 sps:$4 sm:$0x11]  }
 0x273   : > { %v3337_v55 = vsel %vm1544_vm7, %v3328_v9, %v3336_v8  ;;  %v2053_v33 = vshrl.u32 %v1531_v28, 16  ;;  %v2056_v7 = vshll.u32 %v1531_v28, 16  ;;  %v1534_v14 = vsel %vm1495_vm6, %v1532_v38, %v1533_v39  ;;  %v1155_v8 = vld [vmem:[#allocation4 + $0xe8] sm:$0xf] }
 0x274   : > { %3827 = vmatmul.mubr.bf16.gmra.mrb[72].mxu1 %v3337_v55  ;;  %v3382_v41 = vshrl.u32 %v2657_v25, 16  ;;  %v3385_v48 = vshll.u32 %v2657_v25, 16  ;;  %v2047_v47 = vrot.slane %v2045_v60, 3  ;;  %v2050_v6 = vrot.slane %v2048_v20, 4  ;;  %v2375_v25 = vld [vmem:[#allocation4 + $0x100] sm:$0x8] }
 0x275   : > { %v2055_v4 = vrot.slane %v2053_v33, 3  ;;  %v2058_v58 = vrot.slane %v2056_v7, 4  ;;  %v2088_v27 = vshrl.u32 %v1532_v38, 16  ;;  %v2091_v61 = vshll.u32 %v1532_v38, 16 }
 0x276   : > { %v3384_v46 = vrot.slane %v3382_v41, 3  ;;  %v3387_v49 = vrot.slane %v3385_v48, 4  ;;  %v2051_v32 = vor.u32 %v2050_v6, %v2047_v47  ;;  %v2096_v57 = vshrl.u32 %v1534_v14, 16  ;;  %v8451_v47 = vld [vmem:[#allocation4 + $0x104] sm:$0xf] }
 0x277   : > { %v2059_v19 = vor.u32 %v2058_v58, %v2055_v4  ;;  %v2090_v30 = vrot.slane %v2088_v27, 3  ;;  %v2093_v12 = vrot.slane %v2091_v61, 4  ;;  %v2099_v3 = vshll.u32 %v1534_v14, 16 }
 0x278   : > { %v3388_v17 = vor.u32 %v3387_v49, %v3384_v46  ;;  %v2098_v45 = vrot.slane %v2096_v57, 3  ;;  %v3365_v40 = vshrl.u32 %v6960_v51, 16  ;;  %v3368_v44 = vshll.u32 %v6960_v51, 16 }
 0x279   : > { %v2060_v5 = vsel %vm1544_vm7, %v2051_v32, %v2059_v19  ;;  %v2094_v21 = vor.u32 %v2093_v12, %v2090_v30  ;;  %v2101_v9 = vrot.slane %v2099_v3, 4  ;;  %v3373_v52 = vshrl.u32 %v6961_v15, 16 }
 0x27a   : > { %3834 = vmatprep.mubr.bf16.mxu1 %v3388_v17  ;;  %7794 = vmatmul.mubr.bf16.gmra.mrb[36].mxu0 %v2060_v5  ;;  %v3367_v42 = vrot.slane %v3365_v40, 3  ;;  %v3370_v35 = vrot.slane %v3368_v44, 4  ;;  %v3376_v31 = vshll.u32 %v6961_v15, 16  ;;  %v2659_v39 = vshrl.u32 %v9333_v26, 16 }
 0x27b   : > { %v2102_v38 = vor.u32 %v2101_v9, %v2098_v45  ;;  %v3375_v63 = vrot.slane %v3373_v52, 3  ;;  %v2662_v11 = vshll.u32 %v9333_v26, 16  ;;  %v9459_v51 = vcombine.low %v1151_v53, %v1152_v1  ;;  %v8452_v26 = vld [vmem:[#allocation4 + $0x108] sm:$0xf] }
 0x27c   : > { %v3371_v28 = vor.u32 %v3370_v35, %v3367_v42  ;;  %v3378_v60 = vrot.slane %v3376_v31, 4  ;;  %v2661_v20 = vrot.slane %v2659_v39, 4  ;;  %v1536_v55 = vrot.slane %v8323_v10, 5  ;;  %v8335_v35 = vld [vmem:[#allocation4 + $0xfc] ss:$0 sps:$4 sm:$0x11]  }
 0x27d   : > { %v2103_v33 = vsel %vm1544_vm7, %v2094_v21, %v2102_v38  ;;  %v2664_v7 = vrot.slane %v2662_v11, 5  ;;  %v1535_v14 = vrot.slane %v9459_v51, 5  ;;  %v9463_v15 = vcombine.low %v1154_v0, %v1155_v8  ;;  %v1157_v21 = vld [vmem:[#allocation4 + $0xf4] sm:$0xf] }
 0x27e   : > { %7797 = vmatprep.mubr.bf16.mxu0 %v2103_v33  ;;  %v3379_v41 = vor.u32 %v3378_v60, %v3375_v63  ;;  %v1539_v48 = vrot.slane %v8326_v59, 5  ;;  %v6962_v6 = vcombine.low %v2375_v25, %v8451_v47  ;;  %v6963_v4 = vcombine.low %v8452_v26, %v8452_v26  ;;  %v1158_v63 = vld [vmem:[#allocation4 + $0xf8] sm:$0xf] }
 0x27f   : > { %v2665_v58 = vor.u32 %v2664_v7, %v2661_v20  ;;  %v1537_v27 = vsel %vm1495_vm6, %v1535_v14, %v1536_v55  ;;  %v2131_v61 = vshrl.u32 %v1535_v14, 16  ;;  %v2134_v46 = vshll.u32 %v1535_v14, 16  ;;  %v9470_v20 = vld [vmem:[#allocation4 + $0x28] sm:$0xf] }
 0x280   : > { %v3380_v49 = vsel %vm1544_vm7, %v3371_v28, %v3379_v41  ;;  %v2139_v32 = vshrl.u32 %v1537_v27, 16  ;;  %v2142_v57 = vshll.u32 %v1537_v27, 16  ;;  %v1538_v53 = vrot.slane %v9463_v15, 5  ;;  %v1111_v41 = vld [vmem:[#allocation4] sm:$0x8] }
 0x281   : > { %3835 = vmatmul.mubr.bf16.gmra.mrb[76].mxu1 %v3380_v49  ;;  %v3425_v1 = vshrl.u32 %v2665_v58, 16  ;;  %v3428_v19 = vshll.u32 %v2665_v58, 16  ;;  %v2133_v30 = vrot.slane %v2131_v61, 3  ;;  %v2136_v12 = vrot.slane %v2134_v46, 4  ;;  %v4480_v58 = vld [vmem:[#allocation4 + $0x24] sm:$0xf] }
 0x282   : > { %v2141_v3 = vrot.slane %v2139_v32, 3  ;;  %v2144_v10 = vrot.slane %v2142_v57, 4  ;;  %v1540_v17 = vsel %vm1495_vm6, %v1538_v53, %v1539_v48  ;;  %v2174_v45 = vshrl.u32 %v1538_v53, 16 }
 0x283   : > { %v3427_v40 = vrot.slane %v3425_v1, 3  ;;  %v3430_v44 = vrot.slane %v3428_v19, 4  ;;  %v2137_v0 = vor.u32 %v2136_v12, %v2133_v30  ;;  %v2177_v5 = vshll.u32 %v1538_v53, 16 }
 0x284   : > { %v2145_v9 = vor.u32 %v2144_v10, %v2141_v3  ;;  %v2176_v52 = vrot.slane %v2174_v45, 3  ;;  %v2182_v59 = vshrl.u32 %v1540_v17, 16  ;;  %v2185_v42 = vshll.u32 %v1540_v17, 16 }
 0x285   : > { %v3431_v31 = vor.u32 %v3430_v44, %v3427_v40  ;;  %v2179_v39 = vrot.slane %v2177_v5, 4  ;;  %v3408_v8 = vshrl.u32 %v6962_v6, 16  ;;  %v3411_v38 = vshll.u32 %v6962_v6, 16 }
 0x286   : > { %v2146_v11 = vsel %vm1544_vm7, %v2137_v0, %v2145_v9  ;;  %v2184_v25 = vrot.slane %v2182_v59, 3  ;;  %v2187_v28 = vrot.slane %v2185_v42, 4  ;;  %v3416_v60 = vshrl.u32 %v6963_v4, 16 }
 0x287   : > { %3842 = vmatprep.mubr.bf16.mxu1 %v3431_v31  ;;  %7798 = vmatmul.mubr.bf16.gmra.mrb[40].mxu0 %v2146_v11  ;;  %v2180_v55 = vor.u32 %v2179_v39, %v2176_v52  ;;  %v3410_v33 = vrot.slane %v3408_v8, 3  ;;  %v3413_v7 = vrot.slane %v3411_v38, 4  ;;  %v3419_v14 = vshll.u32 %v6963_v4, 16 }
 0x288   : > { %v2188_v48 = vor.u32 %v2187_v28, %v2184_v25  ;;  %v3418_v47 = vrot.slane %v3416_v60, 3  ;;  %v9472_v26 = vcombine.low %v1157_v21, %v1158_v63  ;;  %v1542_v6 = vrot.slane %v8335_v35, 5 }
 0x289   : > { %v3414_v27 = vor.u32 %v3413_v7, %v3410_v33  ;;  %v3421_v61 = vrot.slane %v3419_v14, 4  ;;  %v9475_v46 = vcombine.low %v4480_v58, %v9470_v20  ;;  %v1320_v49 = vshrl.u32 %v9371_v34, 16  ;;  %v4479_v14 = vld [vmem:[#allocation4 + $0x20] sm:$0x8] }
 0x28a   : > { %v2189_v32 = vsel %vm1544_vm7, %v2180_v55, %v2188_v48  ;;  %v1541_v57 = vrot.slane %v9472_v26, 5  ;;  %v1323_v4 = vshll.u32 %v9371_v34, 16  ;;  %v6868_v53 = vcombine.low %v1111_v41, %v9365_v18 }
 0x28b   : > { %7801 = vmatprep.mubr.bf16.mxu0 %v2189_v32  ;;  %v3422_v1 = vor.u32 %v3421_v61, %v3418_v47  ;;  %v4688_v19 = vshrl.u32 %v9475_v46, 16  ;;  %v4691_v30 = vshll.u32 %v9475_v46, 16  ;;  %v1322_v12 = vrot.slane %v1320_v49, 4 }
 0x28c   : > { %v1543_v3 = vsel %vm1495_vm6, %v1541_v57, %v1542_v6  ;;  %v2217_v10 = vshrl.u32 %v1541_v57, 16  ;;  %v2220_v17 = vshll.u32 %v1541_v57, 16  ;;  %v1325_v45 = vrot.slane %v1323_v4, 5 }
 0x28d   : > { %v3423_v40 = vsel %vm1544_vm7, %v3414_v27, %v3422_v1  ;;  %v2225_v44 = vshrl.u32 %v1543_v3, 16  ;;  %v2228_v0 = vshll.u32 %v1543_v3, 16  ;;  %v4690_v5 = vrot.slane %v4688_v19, 4  ;;  %v9493_v19 = vld [vmem:[#allocation4 + $0x34] sm:$0xf] }
 0x28e   : > { %3843 = vmatmul.mubr.bf16.gmra.mrb[80].mxu1 %v3423_v40  ;;  %v2219_v34 = vrot.slane %v2217_v10, 3  ;;  %v2222_v18 = vrot.slane %v2220_v17, 4  ;;  %v4693_v21 = vrot.slane %v4691_v30, 5  ;;  %v1326_v9 = vor.u32 %v1325_v45, %v1322_v12 }
 0x28f   : > { %v2227_v52 = vrot.slane %v2225_v44, 3  ;;  %v2230_v59 = vrot.slane %v2228_v0, 4  ;;  %v6869_v42 = vcombine.low %v9367_v16, %v9367_v16  ;;  %v1546_v35 = vshrl.u32 %v6868_v53, 16  ;;  %v9489_v16 = vld [vmem:[#allocation4 + $0x38] sm:$0xf] }
 0x290   : > { %v2223_v31 = vor.u32 %v2222_v18, %v2219_v34  ;;  %v4694_v39 = vor.u32 %v4693_v21, %v4690_v5  ;;  %v1563_v8 = vshrl.u32 %v1326_v9, 16  ;;  %v1566_v38 = vshll.u32 %v1326_v9, 16 }
 0x291   : > { %v2231_v63 = vor.u32 %v2230_v59, %v2227_v52  ;;  %v1548_v11 = vrot.slane %v1546_v35, 3  ;;  %v1549_v25 = vshll.u32 %v6868_v53, 16  ;;  %v1554_v28 = vshrl.u32 %v6869_v42, 16 }
 0x292   : > { %v4929_v60 = vshrl.u32 %v4694_v39, 16  ;;  %v4932_v55 = vshll.u32 %v4694_v39, 16  ;;  %v1565_v33 = vrot.slane %v1563_v8, 3  ;;  %v1568_v7 = vrot.slane %v1566_v38, 4  ;;  %v9501_v17 = vpop.f32.mrb[20].mxu1 }
 0x293   : > { %v2232_v41 = vsel %vm1544_vm7, %v2223_v31, %v2231_v63  ;;  %v1551_v48 = vrot.slane %v1549_v25, 4  ;;  %v1556_v47 = vrot.slane %v1554_v28, 3  ;;  %v1557_v6 = vshll.u32 %v6869_v42, 16  ;;  %v8453_v28 = vld [vmem:[#allocation4 + $0x14] sm:$0xf] }
 0x294   : > { %7802 = vmatmul.mubr.bf16.gmra.mrb[44].mxu0 %v2232_v41  ;;  %v4931_v27 = vrot.slane %v4929_v60, 3  ;;  %v4934_v61 = vrot.slane %v4932_v55, 4  ;;  %v1569_v49 = vor.u32 %v1568_v7, %v1565_v33  ;;  %v1328_v32 = vshrl.u32 %v9352_v62, 16  ;;  %v8454_v7 = vld [vmem:[#allocation4 + $0x18] sm:$0xf] }
 0x295   : > { %v1552_v57 = vor.u32 %v1551_v48, %v1548_v11  ;;  %v1559_v4 = vrot.slane %v1557_v6, 4  ;;  %v1331_v53 = vshll.u32 %v9352_v62, 16  ;;  %v7044_v1 = vcombine.low %v4479_v14, %v4480_v58  ;;  %v1114_v62 = vld [vmem:[#allocation4 + $0x10] sm:$0x8]  ;;  %v9503_v58 = vpop.f32.mrb[21].mxu1 }
 0x296   : > { %v4935_v30 = vor.u32 %v4934_v61, %v4931_v27  ;;  %4188 = vmatprep.mubr.bf16.mxu1 %v1569_v49  ;;  %v1330_v12 = vrot.slane %v1328_v32, 4  ;;  %v7045_v3 = vcombine.low %v9470_v20, %v9470_v20  ;;  %v9499_v10 = vcombine.low %v9493_v19, %v9489_v16  ;;  %v9507_v21 = vpop.f32.mrb[22].mxu1  ;;  %v4482_v48 = vld [vmem:[#allocation4 + $0x30] sm:$0x8]  ;;  %v8351_v49 = vld [vmem:[#allocation8 + $0x208] sm:$0xff]  }
 0x297   : > { %v1560_v45 = vor.u32 %v1559_v4, %v1556_v47  ;;  %v1333_v40 = vrot.slane %v1331_v53, 5  ;;  %v4912_v44 = vshrl.u32 %v7044_v1, 16  ;;  %v4915_v0 = vshll.u32 %v7044_v1, 16  ;;  %v9510_v35 = vpop.f32.mrb[23].mxu1  ;;  %v1117_v1 = vld [vmem:[#allocation4 + $0x20] sm:$0x8] }
 0x298   : > { %5871 = vmatprep.mubr.bf16.mxu0 %v4935_v30  ;;  %v4920_v5 = vshrl.u32 %v7045_v3, 16  ;;  %v4923_v34 = vshll.u32 %v7045_v3, 16  ;;  %v4696_v18 = vshrl.u32 %v9499_v10, 16  ;;  %v4699_v20 = vshll.u32 %v9499_v10, 16 }
 0x299   : > { %v1561_v9 = vsel %vm1544_vm7, %v1552_v57, %v1560_v45  ;;  %v1334_v52 = vor.u32 %v1333_v40, %v1330_v12  ;;  %v4914_v59 = vrot.slane %v4912_v44, 3  ;;  %v4917_v42 = vrot.slane %v4915_v0, 4  ;;  %v9514_v40 = vld [vmem:[#allocation4 + $0x48] sm:$0xf] }
 0x29a   : > { %4189 = vmatmul.mubr.bf16.vlgmr.msra.gmra.mrb[84].mxu1 %v1561_v9  ;;  %v4922_v31 = vrot.slane %v4920_v5, 3  ;;  %v4925_v39 = vrot.slane %v4923_v34, 4  ;;  %v4698_v8 = vrot.slane %v4696_v18, 4  ;;  %v4701_v38 = vrot.slane %v4699_v20, 5 }
 0x29b   : > { %v1606_v63 = vshrl.u32 %v1334_v52, 16  ;;  %v1609_v11 = vshll.u32 %v1334_v52, 16  ;;  %v4918_v25 = vor.u32 %v4917_v42, %v4914_v59  ;;  %v6870_v60 = vcombine.low %v1114_v62, %v8453_v28  ;;  %v9519_v52 = vld [vmem:[#allocation4 + $0x44] sm:$0xf]  ;;  %v8362_v59 = vld [vmem:[#allocation8 + $0x210] sm:$0xff]  }
 0x29c   : > { %v4926_v55 = vor.u32 %v4925_v39, %v4922_v31  ;;  %v4702_v33 = vor.u32 %v4701_v38, %v4698_v8  ;;  %v6871_v14 = vcombine.low %v8454_v7, %v8454_v7  ;;  %v1336_v41 = vshrl.u32 %v9354_v56, 16  ;;  %v8455_v39 = vld [vmem:[#allocation4 + $0x24] sm:$0xf] }
 0x29d   : > { %v1608_v47 = vrot.slane %v1606_v63, 3  ;;  %v1611_v6 = vrot.slane %v1609_v11, 4  ;;  %v1589_v27 = vshrl.u32 %v6870_v60, 16  ;;  %v1592_v61 = vshll.u32 %v6870_v60, 16 }
 0x29e   : > { %v4927_v32 = vsel %vm1544_vm7, %v4918_v25, %v4926_v55  ;;  %v4972_v57 = vshrl.u32 %v4702_v33, 16  ;;  %v4975_v4 = vshll.u32 %v4702_v33, 16  ;;  %v1597_v53 = vshrl.u32 %v6871_v14, 16 }
 0x29f   : > { %v1612_v30 = vor.u32 %v1611_v6, %v1608_v47  ;;  %5872 = vmatmul.mubr.bf16.vlgmr.msra.gmra.mrb[48].mxu0 %v4927_v32  ;;  %v1591_v12 = vrot.slane %v1589_v27, 3  ;;  %v1594_v3 = vrot.slane %v1592_v61, 4  ;;  %v1600_v45 = vshll.u32 %v6871_v14, 16  ;;  %v8373_v14 = vld [vmem:[#allocation8 + $0x218] sm:$0xff]  }
 0x2a0   : > { %7806 = vmatpush3.bf16.msra.mxu0 %v9424_v13  ;;  %v4974_v44 = vrot.slane %v4972_v57, 3  ;;  %v4977_v0 = vrot.slane %v4975_v4, 4  ;;  %v1599_v62 = vrot.slane %v1597_v53, 3  ;;  %v1338_v5 = vrot.slane %v1336_v41, 4 }
 0x2a1   : > { %4196 = vmatprep.mubr.bf16.mxu1 %v1612_v30  ;;  %v1595_v34 = vor.u32 %v1594_v3, %v1591_v12  ;;  %v1602_v18 = vrot.slane %v1600_v45, 4  ;;  %v1339_v20 = vshll.u32 %v9354_v56, 16  ;;  %v7046_v9 = vcombine.low %v4482_v48, %v9493_v19  ;;  %7807 = vmatprep.subr.bf16.mxu0 %v8351_v49  ;;  %v9530_v41 = vpop.f32.mrb[24].mxu1 }
 0x2a2   : > { %v4978_v42 = vor.u32 %v4977_v0, %v4974_v44  ;;  %v7047_v31 = vcombine.low %v9489_v16, %v9489_v16  ;;  %v9525_v13 = vcombine.low %v9519_v52, %v9514_v40  ;;  %v6872_v8 = vcombine.low %v1117_v1, %v8455_v39  ;;  %v9532_v61 = vpop.f32.mrb[25].mxu1  ;;  %v8384_v39 = vld [vmem:[#allocation8 + $0x220] sm:$0xff]  }
 0x2a3   : > { %v1603_v38 = vor.u32 %v1602_v18, %v1599_v62  ;;  %v1341_v63 = vrot.slane %v1339_v20, 5  ;;  %v4955_v11 = vshrl.u32 %v7046_v9, 16  ;;  %v4958_v56 = vshll.u32 %v7046_v9, 16  ;;  %v9534_v1 = vpop.f32.mrb[26].mxu1 }
 0x2a4   : > { %10419 = vst [vmem:[#allocation26_spill] sm:$0xff] %v9525_v13  ;;  %5879 = vmatprep.mubr.bf16.mxu0 %v4978_v42  ;;  %v4963_v19 = vshrl.u32 %v7047_v31, 16  ;;  %v4966_v25 = vshll.u32 %v7047_v31, 16  ;;  %v4704_v28 = vshrl.u32 %v9525_v13, 16  ;;  %v4707_v60 = vshll.u32 %v9525_v13, 16  ;;  %7808 = vmatpush3.bf16.msra.mxu0 %v8351_v49  ;;  %v9536_v44 = vpop.f32.mrb[27].mxu1 }
 0x2a5   : > { %v1604_v16 = vsel %vm1544_vm7, %v1595_v34, %v1603_v38  ;;  %v1342_v55 = vor.u32 %v1341_v63, %v1338_v5  ;;  %v4957_v33 = vrot.slane %v4955_v11, 3  ;;  %v4960_v7 = vrot.slane %v4958_v56, 4  ;;  %7809 = vmatprep.subr.bf16.mxu0 %v8362_v59  ;;  %v8456_v49 = vld [vmem:[#allocation4 + $0x28] sm:$0xf]  ;;  %v4485_v31 = vld [vmem:[#allocation4 + $0x40] sm:$0x8] }
 0x2a6   : > { %4197 = vmatmul.mubr.bf16.gmra.mrb[88].mxu1 %v1604_v16  ;;  %v4965_v48 = vrot.slane %v4963_v19, 3  ;;  %v4968_v47 = vrot.slane %v4966_v25, 4  ;;  %v4706_v6 = vrot.slane %v4704_v28, 4  ;;  %v4709_v27 = vrot.slane %v4707_v60, 5 }
 0x2a7   : > { %v1649_v32 = vshrl.u32 %v1342_v55, 16  ;;  %v1652_v57 = vshll.u32 %v1342_v55, 16  ;;  %v4961_v4 = vor.u32 %v4960_v7, %v4957_v33  ;;  %v6873_v53 = vcombine.low %v8456_v49, %v8456_v49  ;;  %v9546_v7 = vld [vmem:[#allocation4 + $0x54] sm:$0xf] }
 0x2a8   : > { %v4969_v30 = vor.u32 %v4968_v47, %v4965_v48  ;;  %v4710_v12 = vor.u32 %v4709_v27, %v4706_v6  ;;  %v1632_v3 = vshrl.u32 %v6872_v8, 16  ;;  %v1635_v45 = vshll.u32 %v6872_v8, 16  ;;  %7810 = vmatpush3.bf16.msra.mxu0 %v8362_v59  ;;  %v9539_v59 = vld [vmem:[#allocation4 + $0x58] sm:$0xf] }
 0x2a9   : > { %v1651_v0 = vrot.slane %v1649_v32, 3  ;;  %v1654_v62 = vrot.slane %v1652_v57, 4  ;;  %v1640_v5 = vshrl.u32 %v6873_v53, 16  ;;  %v1643_v34 = vshll.u32 %v6873_v53, 16  ;;  %7811 = vmatprep.subr.bf16.mxu0 %v8373_v14  ;;  %v1120_v32 = vld [vmem:[#allocation4 + $0x30] sm:$0x8] }
 0x2aa   : > { %v4970_v18 = vsel %vm1544_vm7, %v4961_v4, %v4969_v30  ;;  %v5015_v20 = vshrl.u32 %v4710_v12, 16  ;;  %v5018_v9 = vshll.u32 %v4710_v12, 16  ;;  %v1634_v42 = vrot.slane %v1632_v3, 3 }
 0x2ab   : > { %v1655_v38 = vor.u32 %v1654_v62, %v1651_v0  ;;  %5880 = vmatmul.mubr.bf16.gmra.mrb[52].mxu0 %v4970_v18  ;;  %v1637_v63 = vrot.slane %v1635_v45, 4  ;;  %v1642_v11 = vrot.slane %v1640_v5, 3  ;;  %v1645_v8 = vrot.slane %v1643_v34, 4  ;;  %v8457_v0 = vld [vmem:[#allocation4 + $0x34] sm:$0xf] }
 0x2ac   : > { %v5017_v56 = vrot.slane %v5015_v20, 3  ;;  %v5020_v19 = vrot.slane %v5018_v9, 4  ;;  %v1344_v25 = vshrl.u32 %v9375_v36, 16  ;;  %v1347_v28 = vshll.u32 %v9375_v36, 16  ;;  %7812 = vmatpush3.bf16.msra.mxu0 %v8373_v14  ;;  %v8395_v36 = vld [vmem:[#allocation8 + $0x228] sm:$0xff]   ;;  %v8406_v9 = vld [vmem:[#allocation8 + $0x230] sm:$0xff]  }
 0x2ad   : > { %4204 = vmatprep.mubr.bf16.mxu1 %v1655_v38  ;;  %v1638_v60 = vor.u32 %v1637_v63, %v1634_v42  ;;  %v1646_v16 = vor.u32 %v1645_v8, %v1642_v11  ;;  %v7048_v55 = vcombine.low %v4485_v31, %v9519_v52  ;;  %v7049_v33 = vcombine.low %v9514_v40, %v9514_v40  ;;  %v8458_v38 = vld [vmem:[#allocation4 + $0x38] sm:$0xf] }
 0x2ae   : > { %v5021_v48 = vor.u32 %v5020_v19, %v5017_v56  ;;  %v1346_v47 = vrot.slane %v1344_v25, 4  ;;  %v1349_v6 = vrot.slane %v1347_v28, 5  ;;  %v9550_v27 = vcombine.low %v9546_v7, %v9539_v59  ;;  %7813 = vmatprep.subr.bf16.mxu0 %v8384_v39 }
 0x2af   : > { %v1647_v14 = vsel %vm1544_vm7, %v1638_v60, %v1646_v16  ;;  %v4998_v57 = vshrl.u32 %v7048_v55, 16  ;;  %v5001_v4 = vshll.u32 %v7048_v55, 16  ;;  %v5006_v52 = vshrl.u32 %v7049_v33, 16  ;;  %v9555_v8 = vpop.f32.mrb[28].mxu1 }
 0x2b0   : > { %10420 = vst [vmem:[#allocation27_spill] sm:$0xff] %v9550_v27  ;;  %5887 = vmatprep.mubr.bf16.mxu0 %v5021_v48  ;;  %4205 = vmatmul.mubr.bf16.gmra.mrb[92].mxu1 %v1647_v14  ;;  %v1350_v40 = vor.u32 %v1349_v6, %v1346_v47  ;;  %v5009_v49 = vshll.u32 %v7049_v33, 16  ;;  %v4712_v53 = vshrl.u32 %v9550_v27, 16  ;;  %v4715_v30 = vshll.u32 %v9550_v27, 16  ;;  %v9557_v60 = vpop.f32.mrb[29].mxu1 }
 0x2b1   : > { %v5000_v12 = vrot.slane %v4998_v57, 3  ;;  %v5003_v3 = vrot.slane %v5001_v4, 4  ;;  %v5008_v45 = vrot.slane %v5006_v52, 3  ;;  %v6874_v62 = vcombine.low %v1120_v32, %v8457_v0  ;;  %7814 = vmatpush3.bf16.msra.mxu0 %v8384_v39  ;;  %v4488_v48 = vld [vmem:[#allocation4 + $0x50] sm:$0x8]  ;;  %v9559_v47 = vpop.f32.mrb[30].mxu1 }
 0x2b2   : > { %v1692_v5 = vshrl.u32 %v1350_v40, 16  ;;  %v1695_v34 = vshll.u32 %v1350_v40, 16  ;;  %v5011_v18 = vrot.slane %v5009_v49, 4  ;;  %v4714_v20 = vrot.slane %v4712_v53, 4  ;;  %7815 = vmatprep.subr.bf16.mxu0 %v8395_v36  ;;  %v9563_v4 = vpop.f32.mrb[31].mxu1 }
 0x2b3   : > { %v5004_v42 = vor.u32 %v5003_v3, %v5000_v12  ;;  %v4717_v31 = vrot.slane %v4715_v30, 5  ;;  %v6875_v63 = vcombine.low %v8458_v38, %v8458_v38  ;;  %v1675_v11 = vshrl.u32 %v6874_v62, 16  ;;  %v9565_v30 = vld [vmem:[#allocation4 + $0x68] sm:$0xf] }
 0x2b4   : > { %v1694_v56 = vrot.slane %v1692_v5, 3  ;;  %v1697_v19 = vrot.slane %v1695_v34, 4  ;;  %v5012_v25 = vor.u32 %v5011_v18, %v5008_v45  ;;  %v1678_v28 = vshll.u32 %v6874_v62, 16  ;;  %v4492_v18 = vld [vmem:[#allocation4 + $0x64] sm:$0xf] }
 0x2b5   : > { %v4718_v39 = vor.u32 %v4717_v31, %v4714_v20  ;;  %v1677_v16 = vrot.slane %v1675_v11, 3  ;;  %v1683_v55 = vshrl.u32 %v6875_v63, 16  ;;  %v1686_v33 = vshll.u32 %v6875_v63, 16  ;;  %7816 = vmatpush3.bf16.msra.mxu0 %v8395_v36  ;;  %v1123_v63 = vld [vmem:[#allocation4 + $0x40] sm:$0x8] }
 0x2b6   : > { %v1698_v6 = vor.u32 %v1697_v19, %v1694_v56  ;;  %v5013_v32 = vsel %vm1544_vm7, %v5004_v42, %v5012_v25  ;;  %v1680_v14 = vrot.slane %v1678_v28, 4  ;;  %v1352_v57 = vshrl.u32 %v9382_v50, 16  ;;  %7817 = vmatprep.subr.bf16.mxu0 %v8406_v9 }
 0x2b7   : > { %5888 = vmatmul.mubr.bf16.gmra.mrb[56].mxu0 %v5013_v32  ;;  %v5058_v52 = vshrl.u32 %v4718_v39, 16  ;;  %v5061_v40 = vshll.u32 %v4718_v39, 16  ;;  %v1685_v49 = vrot.slane %v1683_v55, 3  ;;  %v1688_v53 = vrot.slane %v1686_v33, 4  ;;  %v8459_v55 = vld [vmem:[#allocation4 + $0x44] sm:$0xf] }
 0x2b8   : > { %4212 = vmatprep.mubr.bf16.mxu1 %v1698_v6  ;;  %v1681_v36 = vor.u32 %v1680_v14, %v1677_v16  ;;  %v1354_v12 = vrot.slane %v1352_v57, 4  ;;  %v1355_v3 = vshll.u32 %v9382_v50, 16  ;;  %v7050_v45 = vcombine.low %v4488_v48, %v9546_v7 }
 0x2b9   : > { %v5060_v0 = vrot.slane %v5058_v52, 3  ;;  %v5063_v62 = vrot.slane %v5061_v40, 4  ;;  %v1689_v5 = vor.u32 %v1688_v53, %v1685_v49  ;;  %v7051_v34 = vcombine.low %v9539_v59, %v9539_v59  ;;  %7818 = vmatpush3.bf16.msra.mxu0 %v8406_v9  ;;  %v8460_v40 = vld [vmem:[#allocation4 + $0x48] sm:$0xf] }
 0x2ba   : > { %v1357_v20 = vrot.slane %v1355_v3, 5  ;;  %v5041_v42 = vshrl.u32 %v7050_v45, 16  ;;  %v5044_v31 = vshll.u32 %v7050_v45, 16  ;;  %v9572_v38 = vcombine.low %v4492_v18, %v9565_v30 }
 0x2bb   : > { %v5064_v11 = vor.u32 %v5063_v62, %v5060_v0  ;;  %v1690_v50 = vsel %vm1544_vm7, %v1681_v36, %v1689_v5  ;;  %v5049_v56 = vshrl.u32 %v7051_v34, 16  ;;  %v5052_v7 = vshll.u32 %v7051_v34, 16 }
 0x2bc   : > { %10421 = vst [vmem:[#allocation28_spill] sm:$0xff] %v9572_v38  ;;  %4213 = vmatmul.mubr.bf16.gmra.mrb[96].mxu1 %v1690_v50  ;;  %v1358_v19 = vor.u32 %v1357_v20, %v1354_v12  ;;  %v5043_v25 = vrot.slane %v5041_v42, 3  ;;  %v5046_v28 = vrot.slane %v5044_v31, 4  ;;  %v4720_v59 = vshrl.u32 %v9572_v38, 16  ;;  %v4491_v20 = vld [vmem:[#allocation4 + $0x60] sm:$0x8] }
 0x2bd   : > { %5895 = vmatprep.mubr.bf16.mxu0 %v5064_v11  ;;  %v5051_v9 = vrot.slane %v5049_v56, 3  ;;  %v5054_v39 = vrot.slane %v5052_v7, 4  ;;  %v4723_v16 = vshll.u32 %v9572_v38, 16  ;;  %v6876_v33 = vcombine.low %v1123_v63, %v8459_v55  ;;  %v9579_v50 = vld [vmem:[#allocation4 + $0x78] sm:$0xf] }
 0x2be   : > { %v1735_v48 = vshrl.u32 %v1358_v19, 16  ;;  %v1738_v6 = vshll.u32 %v1358_v19, 16  ;;  %v5047_v32 = vor.u32 %v5046_v28, %v5043_v25  ;;  %v4722_v14 = vrot.slane %v4720_v59, 4 }
 0x2bf   : > { %v5055_v57 = vor.u32 %v5054_v39, %v5051_v9  ;;  %v4725_v52 = vrot.slane %v4723_v16, 5  ;;  %v6877_v49 = vcombine.low %v8460_v40, %v8460_v40  ;;  %v1718_v53 = vshrl.u32 %v6876_v33, 16  ;;  %v9581_v56 = vpop.f32.mrb[32].mxu1 }
 0x2c0   : > { %v1737_v36 = vrot.slane %v1735_v48, 3  ;;  %v1740_v12 = vrot.slane %v1738_v6, 4  ;;  %v1721_v3 = vshll.u32 %v6876_v33, 16  ;;  %v1360_v45 = vshrl.u32 %v9395_v29, 16  ;;  %v9584_v59 = vpop.f32.mrb[33].mxu1  ;;  %v8417_v6 = vld [vmem:[#allocation8 + $0x238] sm:$0xff]  }
 0x2c1   : > { %v5056_v0 = vsel %vm1544_vm7, %v5047_v32, %v5055_v57  ;;  %v4726_v62 = vor.u32 %v4725_v52, %v4722_v14  ;;  %v1720_v5 = vrot.slane %v1718_v53, 3  ;;  %v1726_v34 = vshrl.u32 %v6877_v49, 16  ;;  %v4495_v33 = vld [vmem:[#allocation4 + $0x74] sm:$0xf]  ;;  %v9588_v48 = vpop.f32.mrb[34].mxu1  ;;  %7819 = vmatprep.subr.bf16.mxu0 %v8417_v6 }
 0x2c2   : > { %v1741_v42 = vor.u32 %v1740_v12, %v1737_v36  ;;  %5896 = vmatmul.mubr.bf16.gmra.mrb[60].mxu0 %v5056_v0  ;;  %v1723_v31 = vrot.slane %v1721_v3, 4  ;;  %v1729_v63 = vshll.u32 %v6877_v49, 16  ;;  %v1362_v11 = vrot.slane %v1360_v45, 4  ;;  %v1126_v45 = vld [vmem:[#allocation4 + $0x50] sm:$0x8] }
 0x2c3   : > { %v5101_v7 = vshrl.u32 %v4726_v62, 16  ;;  %v5104_v19 = vshll.u32 %v4726_v62, 16  ;;  %v1728_v25 = vrot.slane %v1726_v34, 3  ;;  %v1363_v28 = vshll.u32 %v9395_v29, 16  ;;  %v9593_v29 = vpop.f32.mrb[35].mxu1  ;;  %7820 = vmatpush3.bf16.msra.mxu0 %v8417_v6 }
 0x2c4   : > { %4220 = vmatprep.mubr.bf16.mxu1 %v1741_v42  ;;  %v1724_v9 = vor.u32 %v1723_v31, %v1720_v5  ;;  %v1731_v39 = vrot.slane %v1729_v63, 4  ;;  %v7052_v16 = vcombine.low %v4491_v20, %v4492_v18  ;;  %v7053_v55 = vcombine.low %v9565_v30, %v9565_v30 }
 0x2c5   : > { %v5103_v32 = vrot.slane %v5101_v7, 3  ;;  %v5106_v14 = vrot.slane %v5104_v19, 4  ;;  %v1365_v57 = vrot.slane %v1363_v28, 5  ;;  %v9591_v52 = vcombine.low %v4495_v33, %v9579_v50  ;;  %v8462_v28 = vld [vmem:[#allocation4 + $0x58] sm:$0xf] }
 0x2c6   : > { %v1732_v40 = vor.u32 %v1731_v39, %v1728_v25  ;;  %v5084_v49 = vshrl.u32 %v7052_v16, 16  ;;  %v5087_v53 = vshll.u32 %v7052_v16, 16  ;;  %v5092_v36 = vshrl.u32 %v7053_v55, 16 }
 0x2c7   : > { %10422 = vst [vmem:[#allocation29_spill] sm:$0xff] %v9591_v52  ;;  %v5107_v18 = vor.u32 %v5106_v14, %v5103_v32  ;;  %v1366_v12 = vor.u32 %v1365_v57, %v1362_v11  ;;  %v5095_v30 = vshll.u32 %v7053_v55, 16  ;;  %v4728_v3 = vshrl.u32 %v9591_v52, 16  ;;  %v8461_v11 = vld [vmem:[#allocation4 + $0x54] sm:$0xf] }
 0x2c8   : > { %v1733_v0 = vsel %vm1544_vm7, %v1724_v9, %v1732_v40  ;;  %v5086_v62 = vrot.slane %v5084_v49, 3  ;;  %v5089_v5 = vrot.slane %v5087_v53, 4  ;;  %v5094_v34 = vrot.slane %v5092_v36, 3  ;;  %v4494_v49 = vld [vmem:[#allocation4 + $0x70] sm:$0x8] }
 0x2c9   : > { %5903 = vmatprep.mubr.bf16.mxu0 %v5107_v18  ;;  %4221 = vmatmul.mubr.bf16.gmra.mrb[100].mxu1 %v1733_v0  ;;  %v1778_v20 = vshrl.u32 %v1366_v12, 16  ;;  %v1781_v42 = vshll.u32 %v1366_v12, 16  ;;  %v5097_v31 = vrot.slane %v5095_v30, 4  ;;  %v4730_v63 = vrot.slane %v4728_v3, 4  ;;  %v9600_v30 = vld [vmem:[#allocation4 + $0x84] sm:$0xf] }
 0x2ca   : > { %v5090_v7 = vor.u32 %v5089_v5, %v5086_v62  ;;  %v4731_v19 = vshll.u32 %v9591_v52, 16  ;;  %v6878_v25 = vcombine.low %v1126_v45, %v8461_v11  ;;  %v6879_v39 = vcombine.low %v8462_v28, %v8462_v28  ;;  %v9602_v3 = vld [vmem:[#allocation4 + $0x88] sm:$0xf] }
 0x2cb   : > { %v1780_v16 = vrot.slane %v1778_v20, 3  ;;  %v1783_v55 = vrot.slane %v1781_v42, 4  ;;  %v5098_v6 = vor.u32 %v5097_v31, %v5094_v34  ;;  %v1368_v9 = vshrl.u32 %v9397_v43, 16 }
 0x2cc   : > { %v4733_v32 = vrot.slane %v4731_v19, 5  ;;  %v1761_v14 = vshrl.u32 %v6878_v25, 16  ;;  %v1764_v57 = vshll.u32 %v6878_v25, 16  ;;  %v1769_v40 = vshrl.u32 %v6879_v39, 16 }
 0x2cd   : > { %v1784_v53 = vor.u32 %v1783_v55, %v1780_v16  ;;  %v5099_v36 = vsel %vm1544_vm7, %v5090_v7, %v5098_v6  ;;  %v1772_v18 = vshll.u32 %v6879_v39, 16  ;;  %v1370_v12 = vrot.slane %v1368_v9, 4 }
 0x2ce   : > { %5904 = vmatmul.mubr.bf16.gmra.mrb[64].mxu0 %v5099_v36  ;;  %v4734_v45 = vor.u32 %v4733_v32, %v4730_v63  ;;  %v1763_v0 = vrot.slane %v1761_v14, 3  ;;  %v1766_v62 = vrot.slane %v1764_v57, 4  ;;  %v1771_v5 = vrot.slane %v1769_v40, 3  ;;  %v9611_v55 = vpop.f32.mrb[36].mxu1 }
 0x2cf   : > { %4228 = vmatprep.mubr.bf16.mxu1 %v1784_v53  ;;  %v1774_v34 = vrot.slane %v1772_v18, 4  ;;  %v1371_v20 = vshll.u32 %v9397_v43, 16  ;;  %v7054_v42 = vcombine.low %v4494_v49, %v4495_v33  ;;  %v7055_v31 = vcombine.low %v9579_v50, %v9579_v50  ;;  %v9613_v32 = vpop.f32.mrb[37].mxu1  ;;  %v1129_v49 = vld [vmem:[#allocation4 + $0x60] sm:$0x8] }
 0x2d0   : > { %v5144_v7 = vshrl.u32 %v4734_v45, 16  ;;  %v5147_v19 = vshll.u32 %v4734_v45, 16  ;;  %v1767_v11 = vor.u32 %v1766_v62, %v1763_v0  ;;  %v9609_v25 = vcombine.low %v9600_v30, %v9602_v3  ;;  %v9616_v53 = vpop.f32.mrb[38].mxu1 }
 0x2d1   : > { %v1775_v28 = vor.u32 %v1774_v34, %v1771_v5  ;;  %v1373_v63 = vrot.slane %v1371_v20, 5  ;;  %v5127_v39 = vshrl.u32 %v7054_v42, 16  ;;  %v5130_v16 = vshll.u32 %v7054_v42, 16  ;;  %v9619_v62 = vpop.f32.mrb[39].mxu1 }
 0x2d2   : > { %10423 = vst [vmem:[#allocation30_spill] sm:$0xff] %v9609_v25  ;;  %v5146_v6 = vrot.slane %v5144_v7, 3  ;;  %v5149_v9 = vrot.slane %v5147_v19, 4  ;;  %v5135_v43 = vshrl.u32 %v7055_v31, 16  ;;  %v5138_v33 = vshll.u32 %v7055_v31, 16 }
 0x2d3   : > { %v1776_v50 = vsel %vm1544_vm7, %v1767_v11, %v1775_v28  ;;  %v1374_v14 = vor.u32 %v1373_v63, %v1370_v12  ;;  %v5129_v57 = vrot.slane %v5127_v39, 3  ;;  %v5132_v40 = vrot.slane %v5130_v16, 4  ;;  %v8463_v7 = vld [vmem:[#allocation4 + $0x64] sm:$0xf]  ;;  %v8464_v11 = vld [vmem:[#allocation4 + $0x68] sm:$0xf] }
 0x2d4   : > { %v5150_v36 = vor.u32 %v5149_v9, %v5146_v6  ;;  %4229 = vmatmul.mubr.bf16.gmra.mrb[104].mxu1 %v1776_v50  ;;  %v5137_v18 = vrot.slane %v5135_v43, 3  ;;  %v5140_v45 = vrot.slane %v5138_v33, 4  ;;  %v4736_v0 = vshrl.u32 %v9609_v25, 16 }
 0x2d5   : > { %v1821_v5 = vshrl.u32 %v1374_v14, 16  ;;  %v1824_v34 = vshll.u32 %v1374_v14, 16  ;;  %v5133_v20 = vor.u32 %v5132_v40, %v5129_v57  ;;  %v4739_v42 = vshll.u32 %v9609_v25, 16  ;;  %v4497_v14 = vld [vmem:[#allocation4 + $0x80] sm:$0x8] }
 0x2d6   : > { %5911 = vmatprep.mubr.bf16.mxu0 %v5150_v36  ;;  %v5141_v12 = vor.u32 %v5140_v45, %v5137_v18  ;;  %v4738_v31 = vrot.slane %v4736_v0, 4  ;;  %v6880_v19 = vcombine.low %v1129_v49, %v8463_v7  ;;  %v6881_v28 = vcombine.low %v8464_v11, %v8464_v11  ;;  %v9624_v45 = vld [vmem:[#allocation4 + $0x94] sm:$0xf]  ;;  %v9626_v49 = vld [vmem:[#allocation4 + $0x98] sm:$0xf] }
 0x2d7   : > { %v1823_v63 = vrot.slane %v1821_v5, 3  ;;  %v1826_v39 = vrot.slane %v1824_v34, 4  ;;  %v4741_v16 = vrot.slane %v4739_v42, 5  ;;  %v1376_v6 = vshrl.u32 %v9411_v37, 16 }
 0x2d8   : > { %v5142_v9 = vsel %vm1544_vm7, %v5133_v20, %v5141_v12  ;;  %v1804_v43 = vshrl.u32 %v6880_v19, 16  ;;  %v1807_v33 = vshll.u32 %v6880_v19, 16  ;;  %v1812_v50 = vshrl.u32 %v6881_v28, 16 }
 0x2d9   : > { %v1827_v57 = vor.u32 %v1826_v39, %v1823_v63  ;;  %5912 = vmatmul.mubr.bf16.gmra.mrb[68].mxu0 %v5142_v9  ;;  %v4742_v40 = vor.u32 %v4741_v16, %v4738_v31  ;;  %v1815_v36 = vshll.u32 %v6881_v28, 16  ;;  %v1378_v18 = vrot.slane %v1376_v6, 4 }
 0x2da   : > { %v1806_v0 = vrot.slane %v1804_v43, 3  ;;  %v1809_v5 = vrot.slane %v1807_v33, 4  ;;  %v1814_v34 = vrot.slane %v1812_v50, 3  ;;  %v1379_v42 = vshll.u32 %v9411_v37, 16 }
 0x2db   : > { %4236 = vmatprep.mubr.bf16.mxu1 %v1827_v57  ;;  %v5187_v20 = vshrl.u32 %v4742_v40, 16  ;;  %v5190_v12 = vshll.u32 %v4742_v40, 16  ;;  %v1817_v7 = vrot.slane %v1815_v36, 4  ;;  %v7056_v19 = vcombine.low %v4497_v14, %v9600_v30  ;;  %v1132_v57 = vld [vmem:[#allocation4 + $0x70] sm:$0x8] }
 0x2dc   : > { %v1810_v11 = vor.u32 %v1809_v5, %v1806_v0  ;;  %v1381_v63 = vrot.slane %v1379_v42, 5  ;;  %v7057_v31 = vcombine.low %v9602_v3, %v9602_v3  ;;  %v9634_v28 = vcombine.low %v9624_v45, %v9626_v49  ;;  %v9636_v40 = vpop.f32.mrb[40].mxu1 }
 0x2dd   : > { %v5189_v39 = vrot.slane %v5187_v20, 3  ;;  %v5192_v16 = vrot.slane %v5190_v12, 4  ;;  %v1818_v6 = vor.u32 %v1817_v7, %v1814_v34  ;;  %v5170_v9 = vshrl.u32 %v7056_v19, 16  ;;  %v9640_v0 = vpop.f32.mrb[41].mxu1 }
 0x2de   : > { %10424 = vst [vmem:[#allocation31_spill] sm:$0xff] %v9634_v28  ;;  %v1382_v37 = vor.u32 %v1381_v63, %v1378_v18  ;;  %v5173_v43 = vshll.u32 %v7056_v19, 16  ;;  %v5178_v33 = vshrl.u32 %v7057_v31, 16  ;;  %v5181_v50 = vshll.u32 %v7057_v31, 16  ;;  %v9642_v18 = vpop.f32.mrb[42].mxu1 }
 0x2df   : > { %v5193_v30 = vor.u32 %v5192_v16, %v5189_v39  ;;  %v1819_v14 = vsel %vm1544_vm7, %v1810_v11, %v1818_v6  ;;  %v5172_v36 = vrot.slane %v5170_v9, 3  ;;  %v4744_v3 = vshrl.u32 %v9634_v28, 16  ;;  %v8465_v63 = vld [vmem:[#allocation4 + $0x74] sm:$0xf]  ;;  %v9645_v11 = vpop.f32.mrb[43].mxu1 }
 0x2e0   : > { %4237 = vmatmul.mubr.bf16.gmra.mrb[108].mxu1 %v1819_v14  ;;  %v1864_v5 = vshrl.u32 %v1382_v37, 16  ;;  %v1867_v42 = vshll.u32 %v1382_v37, 16  ;;  %v5175_v34 = vrot.slane %v5173_v43, 4  ;;  %v5180_v20 = vrot.slane %v5178_v33, 3  ;;  %v8466_v9 = vld [vmem:[#allocation4 + $0x78] sm:$0xf] }
 0x2e1   : > { %5919 = vmatprep.mubr.bf16.mxu0 %v5193_v30  ;;  %v5183_v12 = vrot.slane %v5181_v50, 4  ;;  %v4746_v7 = vrot.slane %v4744_v3, 4  ;;  %v4747_v19 = vshll.u32 %v9634_v28, 16  ;;  %v6882_v31 = vcombine.low %v1132_v57, %v8465_v63  ;;  %v4500_v3 = vld [vmem:[#allocation4 + $0x90] sm:$0x8] }
 0x2e2   : > { %v1866_v39 = vrot.slane %v1864_v5, 3  ;;  %v1869_v16 = vrot.slane %v1867_v42, 4  ;;  %v5176_v6 = vor.u32 %v5175_v34, %v5172_v36  ;;  %v6883_v14 = vcombine.low %v8466_v9, %v8466_v9  ;;  %v9649_v5 = vld [vmem:[#allocation4 + $0xa4] sm:$0xf]  ;;  %v9651_v36 = vld [vmem:[#allocation4 + $0xa8] sm:$0xf] }
 0x2e3   : > { %v5184_v25 = vor.u32 %v5183_v12, %v5180_v20  ;;  %v4749_v37 = vrot.slane %v4747_v19, 5  ;;  %v1847_v43 = vshrl.u32 %v6882_v31, 16  ;;  %v1850_v33 = vshll.u32 %v6882_v31, 16 }
 0x2e4   : > { %v1870_v52 = vor.u32 %v1869_v16, %v1866_v39  ;;  %v1855_v38 = vshrl.u32 %v6883_v14, 16  ;;  %v1858_v30 = vshll.u32 %v6883_v14, 16  ;;  %v1384_v50 = vshrl.u32 %v9415_v23, 16 }
 0x2e5   : > { %v5185_v28 = vsel %vm1544_vm7, %v5176_v6, %v5184_v25  ;;  %v4750_v57 = vor.u32 %v4749_v37, %v4746_v7  ;;  %v1849_v63 = vrot.slane %v1847_v43, 3  ;;  %v1852_v27 = vrot.slane %v1850_v33, 4  ;;  %v1135_v33 = vld [vmem:[#allocation4 + $0x80] sm:$0x8] }
 0x2e6   : > { %4244 = vmatprep.mubr.bf16.mxu1 %v1870_v52  ;;  %5920 = vmatmul.mubr.bf16.gmra.mrb[72].mxu0 %v5185_v28  ;;  %v1857_v42 = vrot.slane %v1855_v38, 3  ;;  %v1860_v34 = vrot.slane %v1858_v30, 4  ;;  %v1386_v20 = vrot.slane %v1384_v50, 4  ;;  %v1387_v12 = vshll.u32 %v9415_v23, 16 }
 0x2e7   : > { %v5230_v19 = vshrl.u32 %v4750_v57, 16  ;;  %v5233_v31 = vshll.u32 %v4750_v57, 16  ;;  %v1853_v39 = vor.u32 %v1852_v27, %v1849_v63  ;;  %v7058_v16 = vcombine.low %v4500_v3, %v9624_v45 }
 0x2e8   : > { %v1861_v25 = vor.u32 %v1860_v34, %v1857_v42  ;;  %v1389_v7 = vrot.slane %v1387_v12, 5  ;;  %v7059_v6 = vcombine.low %v9626_v49, %v9626_v49  ;;  %v9659_v9 = vcombine.low %v9649_v5, %v9651_v36 }
 0x2e9   : > { %v5232_v52 = vrot.slane %v5230_v19, 3  ;;  %v5235_v38 = vrot.slane %v5233_v31, 4  ;;  %v5213_v28 = vshrl.u32 %v7058_v16, 16  ;;  %v5216_v14 = vshll.u32 %v7058_v16, 16  ;;  %v9663_v3 = vpop.f32.mrb[44].mxu1 }
 0x2ea   : > { %10425 = vst [vmem:[#allocation32_spill] sm:$0xff] %v9659_v9  ;;  %v1862_v23 = vsel %vm1544_vm7, %v1853_v39, %v1861_v25  ;;  %v1390_v37 = vor.u32 %v1389_v7, %v1386_v20  ;;  %v5221_v43 = vshrl.u32 %v7059_v6, 16  ;;  %v5224_v27 = vshll.u32 %v7059_v6, 16  ;;  %v9665_v12 = vpop.f32.mrb[45].mxu1  ;;  %v8467_v39 = vld [vmem:[#allocation4 + $0x84] sm:$0xf] }
 0x2eb   : > { %v5236_v45 = vor.u32 %v5235_v38, %v5232_v52  ;;  %4245 = vmatmul.mubr.bf16.gmra.mrb[112].mxu1 %v1862_v23  ;;  %v5215_v30 = vrot.slane %v5213_v28, 3  ;;  %v5218_v50 = vrot.slane %v5216_v14, 4  ;;  %v4752_v49 = vshrl.u32 %v9659_v9, 16  ;;  %v9668_v25 = vpop.f32.mrb[46].mxu1  ;;  %v8468_v38 = vld [vmem:[#allocation4 + $0x88] sm:$0xf] }
 0x2ec   : > { %v1907_v57 = vshrl.u32 %v1390_v37, 16  ;;  %v1910_v63 = vshll.u32 %v1390_v37, 16  ;;  %v5223_v42 = vrot.slane %v5221_v43, 3  ;;  %v5226_v34 = vrot.slane %v5224_v27, 4  ;;  %v9670_v14 = vpop.f32.mrb[47].mxu1 }
 0x2ed   : > { %5927 = vmatprep.mubr.bf16.mxu0 %v5236_v45  ;;  %v5219_v19 = vor.u32 %v5218_v50, %v5215_v30  ;;  %v4754_v20 = vrot.slane %v4752_v49, 4  ;;  %v4755_v31 = vshll.u32 %v9659_v9, 16  ;;  %v6884_v16 = vcombine.low %v1135_v33, %v8467_v39  ;;  %10426 = vst [vmem:[#allocation33_spill] sm:$0xff] %v9670_v14  ;;  %v4503_v45 = vld [vmem:[#allocation4 + $0xa0] sm:$0x8] }
 0x2ee   : > { %v1909_v7 = vrot.slane %v1907_v57, 3  ;;  %v1912_v6 = vrot.slane %v1910_v63, 4  ;;  %v5227_v52 = vor.u32 %v5226_v34, %v5223_v42  ;;  %v6885_v28 = vcombine.low %v8468_v38, %v8468_v38 }
 0x2ef   : > { %v4757_v23 = vrot.slane %v4755_v31, 5  ;;  %v1890_v37 = vshrl.u32 %v6884_v16, 16  ;;  %v1893_v43 = vshll.u32 %v6884_v16, 16  ;;  %v1392_v27 = vshrl.u32 %v9429_v24, 16 }
 0x2f0   : > { %v1913_v30 = vor.u32 %v1912_v6, %v1909_v7  ;;  %v5228_v50 = vsel %vm1544_vm7, %v5219_v19, %v5227_v52  ;;  %v1898_v49 = vshrl.u32 %v6885_v28, 16  ;;  %v1901_v33 = vshll.u32 %v6885_v28, 16  ;;  %v4507_v7 = vld [vmem:[#allocation4 + $0xb4] sm:$0xf] }
 0x2f1   : > { %5928 = vmatmul.mubr.bf16.gmra.mrb[76].mxu0 %v5228_v50  ;;  %v4758_v39 = vor.u32 %v4757_v23, %v4754_v20  ;;  %v1892_v57 = vrot.slane %v1890_v37, 3  ;;  %v1895_v63 = vrot.slane %v1893_v43, 4  ;;  %v1394_v42 = vrot.slane %v1392_v27, 4  ;;  %v4508_v23 = vld [vmem:[#allocation4 + $0xb8] sm:$0xf] }
 0x2f2   : > { %4252 = vmatprep.mubr.bf16.mxu1 %v1913_v30  ;;  %v1900_v34 = vrot.slane %v1898_v49, 3  ;;  %v1903_v38 = vrot.slane %v1901_v33, 4  ;;  %v1395_v31 = vshll.u32 %v9429_v24, 16  ;;  %v7060_v16 = vcombine.low %v4503_v45, %v9649_v5  ;;  %v1138_v50 = vld [vmem:[#allocation4 + $0x90] sm:$0x8] }
 0x2f3   : > { %v5273_v9 = vshrl.u32 %v4758_v39, 16  ;;  %v5276_v13 = vshll.u32 %v4758_v39, 16  ;;  %v1896_v14 = vor.u32 %v1895_v63, %v1892_v57  ;;  %v7061_v19 = vcombine.low %v9651_v36, %v9651_v36 }
 0x2f4   : > { %v1904_v6 = vor.u32 %v1903_v38, %v1900_v34  ;;  %v1397_v52 = vrot.slane %v1395_v31, 5  ;;  %v5256_v20 = vshrl.u32 %v7060_v16, 16  ;;  %v5259_v28 = vshll.u32 %v7060_v16, 16 }
 0x2f5   : > { %v5275_v37 = vrot.slane %v5273_v9, 3  ;;  %v5278_v43 = vrot.slane %v5276_v13, 4  ;;  %v5264_v27 = vshrl.u32 %v7061_v19, 16  ;;  %v5267_v30 = vshll.u32 %v7061_v19, 16  ;;  %v8469_v13 = vld [vmem:[#allocation4 + $0x94] sm:$0xf] }
 0x2f6   : > { %v1905_v24 = vsel %vm1544_vm7, %v1896_v14, %v1904_v6  ;;  %v1398_v5 = vor.u32 %v1397_v52, %v1394_v42  ;;  %v5258_v45 = vrot.slane %v5256_v20, 3  ;;  %v5261_v49 = vrot.slane %v5259_v28, 4  ;;  %v9681_v63 = vpop.f32.mrb[48].mxu1  ;;  %v8470_v6 = vld [vmem:[#allocation4 + $0x98] sm:$0xf] }
 0x2f7   : > { %v5279_v33 = vor.u32 %v5278_v43, %v5275_v37  ;;  %4253 = vmatmul.mubr.bf16.gmra.mrb[116].mxu1 %v1905_v24  ;;  %v5266_v39 = vrot.slane %v5264_v27, 3  ;;  %v5269_v36 = vrot.slane %v5267_v30, 4  ;;  %v9679_v57 = vcombine.low %v4507_v7, %v4508_v23  ;;  %v9683_v16 = vpop.f32.mrb[49].mxu1 }
 0x2f8   : > { %v1950_v34 = vshrl.u32 %v1398_v5, 16  ;;  %v1953_v38 = vshll.u32 %v1398_v5, 16  ;;  %v5262_v9 = vor.u32 %v5261_v49, %v5258_v45  ;;  %v6886_v31 = vcombine.low %v1138_v50, %v8469_v13  ;;  %10428 = vst [vmem:[#allocation35_spill] sm:$0xff] %v9683_v16  ;;  %v9687_v20 = vpop.f32.mrb[50].mxu1  ;;  %v4506_v49 = vld [vmem:[#allocation4 + $0xb0] sm:$0x8] }
 0x2f9   : > { %10427 = vst [vmem:[#allocation34_spill] sm:$0xff] %v9679_v57  ;;  %5935 = vmatprep.mubr.bf16.mxu0 %v5279_v33  ;;  %v5270_v14 = vor.u32 %v5269_v36, %v5266_v39  ;;  %v4760_v42 = vshrl.u32 %v9679_v57, 16  ;;  %v4763_v19 = vshll.u32 %v9679_v57, 16  ;;  %v6887_v52 = vcombine.low %v8470_v6, %v8470_v6  ;;  %10429 = vst [vmem:[#allocation36_spill] sm:$0xff] %v9687_v20  ;;  %v9689_v30 = vpop.f32.mrb[51].mxu1 }
 0x2fa   : > { %v1952_v28 = vrot.slane %v1950_v34, 3  ;;  %v1955_v37 = vrot.slane %v1953_v38, 4  ;;  %v1933_v43 = vshrl.u32 %v6886_v31, 16  ;;  %v1936_v27 = vshll.u32 %v6886_v31, 16  ;;  %10430 = vst [vmem:[#allocation37_spill] sm:$0xff] %v9689_v30 }
 0x2fb   : > { %v5271_v50 = vsel %vm1544_vm7, %v5262_v9, %v5270_v14  ;;  %v4762_v24 = vrot.slane %v4760_v42, 4  ;;  %v4765_v5 = vrot.slane %v4763_v19, 5  ;;  %v1941_v45 = vshrl.u32 %v6887_v52, 16 }
 0x2fc   : > { %v1956_v33 = vor.u32 %v1955_v37, %v1952_v28  ;;  %5936 = vmatmul.mubr.bf16.gmra.mrb[80].mxu0 %v5271_v50  ;;  %v1935_v39 = vrot.slane %v1933_v43, 3  ;;  %v1938_v36 = vrot.slane %v1936_v27, 4  ;;  %v1944_v13 = vshll.u32 %v6887_v52, 16  ;;  %v1141_v28 = vld [vmem:[#allocation4 + $0xa0] sm:$0x8] }
 0x2fd   : > { %v4766_v6 = vor.u32 %v4765_v5, %v4762_v24  ;;  %v1943_v57 = vrot.slane %v1941_v45, 3  ;;  %v1400_v34 = vshrl.u32 %v9434_v54, 16  ;;  %v1403_v38 = vshll.u32 %v9434_v54, 16  ;;  %v4510_v24 = vld [vmem:[#allocation4 + $0xc4] sm:$0xf] }
 0x2fe   : > { %4260 = vmatprep.mubr.bf16.mxu1 %v1956_v33  ;;  %v1939_v31 = vor.u32 %v1938_v36, %v1935_v39  ;;  %v1946_v30 = vrot.slane %v1944_v13, 4  ;;  %v7062_v20 = vcombine.low %v4506_v49, %v4507_v7  ;;  %v7063_v9 = vcombine.low %v4508_v23, %v4508_v23  ;;  %v9694_v37 = vpop.f32.mrb[52].mxu1  ;;  %v4511_v7 = vld [vmem:[#allocation4 + $0xc8] sm:$0xf] }
 0x2ff   : > { %v5316_v14 = vshrl.u32 %v4766_v6, 16  ;;  %v5319_v42 = vshll.u32 %v4766_v6, 16  ;;  %v1402_v19 = vrot.slane %v1400_v34, 4  ;;  %v1405_v16 = vrot.slane %v1403_v38, 5  ;;  %v9696_v5 = vpop.f32.mrb[53].mxu1 }
 0x300   : > { %v1947_v43 = vor.u32 %v1946_v30, %v1943_v57  ;;  %v5299_v52 = vshrl.u32 %v7062_v20, 16  ;;  %v5302_v27 = vshll.u32 %v7062_v20, 16  ;;  %v5307_v50 = vshrl.u32 %v7063_v9, 16  ;;  %10431 = vst [vmem:[#allocation38_spill] sm:$0xff] %v9696_v5  ;;  %v9698_v23 = vpop.f32.mrb[54].mxu1 }
 0x301   : > { %v5318_v54 = vrot.slane %v5316_v14, 3  ;;  %v5321_v45 = vrot.slane %v5319_v42, 4  ;;  %v1406_v33 = vor.u32 %v1405_v16, %v1402_v19  ;;  %v5310_v39 = vshll.u32 %v7063_v9, 16  ;;  %10432 = vst [vmem:[#allocation39_spill] sm:$0xff] %v9698_v23  ;;  %v9701_v34 = vpop.f32.mrb[55].mxu1 }
 0x302   : > { %v1948_v49 = vsel %vm1544_vm7, %v1939_v31, %v1947_v43  ;;  %v5301_v36 = vrot.slane %v5299_v52, 3  ;;  %v5304_v13 = vrot.slane %v5302_v27, 4  ;;  %v5309_v6 = vrot.slane %v5307_v50, 3  ;;  %v8471_v16 = vld [vmem:[#allocation4 + $0xa4] sm:$0xf] }
 0x303   : > { %v5322_v57 = vor.u32 %v5321_v45, %v5318_v54  ;;  %4261 = vmatmul.mubr.bf16.gmra.mrb[120].mxu1 %v1948_v49  ;;  %v1993_v20 = vshrl.u32 %v1406_v33, 16  ;;  %v1996_v30 = vshll.u32 %v1406_v33, 16  ;;  %v5312_v38 = vrot.slane %v5310_v39, 4  ;;  %v8472_v42 = vld [vmem:[#allocation4 + $0xa8] sm:$0xf] }
 0x304   : > { %v5305_v5 = vor.u32 %v5304_v13, %v5301_v36  ;;  %v9703_v14 = vcombine.low %v4510_v24, %v4511_v7  ;;  %v6888_v9 = vcombine.low %v1141_v28, %v8471_v16  ;;  %v6889_v19 = vcombine.low %v8472_v42, %v8472_v42  ;;  %v9709_v28 = vld [vmem:[#allocation4 + $0xd4] sm:$0xf]  ;;  %v1144_v13 = vld [vmem:[#allocation4 + $0xb0] sm:$0x8] }
 0x305   : > { %5943 = vmatprep.mubr.bf16.mxu0 %v5322_v57  ;;  %v1995_v23 = vrot.slane %v1993_v20, 3  ;;  %v1998_v31 = vrot.slane %v1996_v30, 4  ;;  %v5313_v43 = vor.u32 %v5312_v38, %v5309_v6  ;;  %v1408_v52 = vshrl.u32 %v9446_v22, 16  ;;  %v4509_v38 = vld [vmem:[#allocation4 + $0xc0] sm:$0x8] }
 0x306   : > { %10433 = vst [vmem:[#allocation40_spill] sm:$0xff] %v9703_v14  ;;  %v4768_v27 = vshrl.u32 %v9703_v14, 16  ;;  %v4771_v50 = vshll.u32 %v9703_v14, 16  ;;  %v1976_v54 = vshrl.u32 %v6888_v9, 16  ;;  %v1979_v45 = vshll.u32 %v6888_v9, 16 }
 0x307   : > { %v1999_v33 = vor.u32 %v1998_v31, %v1995_v23  ;;  %v5314_v39 = vsel %vm1544_vm7, %v5305_v5, %v5313_v43  ;;  %v1984_v49 = vshrl.u32 %v6889_v19, 16  ;;  %v1987_v36 = vshll.u32 %v6889_v19, 16  ;;  %v9712_v23 = vld [vmem:[#allocation4 + $0xd8] sm:$0xf] }
 0x308   : > { %5944 = vmatmul.mubr.bf16.gmra.mrb[84].mxu0 %v5314_v39  ;;  %v4770_v57 = vrot.slane %v4768_v27, 4  ;;  %v4773_v20 = vrot.slane %v4771_v50, 5  ;;  %v1978_v6 = vrot.slane %v1976_v54, 3  ;;  %v1981_v30 = vrot.slane %v1979_v45, 4  ;;  %v8473_v39 = vld [vmem:[#allocation4 + $0xb4] sm:$0xf] }
 0x309   : > { %4268 = vmatprep.mubr.bf16.mxu1 %v1999_v33  ;;  %v1986_v16 = vrot.slane %v1984_v49, 3  ;;  %v1989_v42 = vrot.slane %v1987_v36, 4  ;;  %v1410_v14 = vrot.slane %v1408_v52, 4  ;;  %v1411_v9 = vshll.u32 %v9446_v22, 16 }
 0x30a   : > { %v4774_v5 = vor.u32 %v4773_v20, %v4770_v57  ;;  %v1982_v31 = vor.u32 %v1981_v30, %v1978_v6  ;;  %v9716_v19 = vadd.f32 %v9503_v58, %v9501_v17  ;;  %v9720_v43 = vadd.f32 %v9510_v35, %v9507_v21 }
 0x30b   : > { %v1990_v27 = vor.u32 %v1989_v42, %v1986_v16  ;;  %v1413_v50 = vrot.slane %v1411_v9, 5  ;;  %v7064_v54 = vcombine.low %v4509_v38, %v4510_v24  ;;  %v7065_v45 = vcombine.low %v4511_v7, %v4511_v7 }
 0x30c   : > { %10434 = vst [vmem:[#allocation41_spill] sm:$0xff] %v9720_v43  ;;  %v5359_v33 = vshrl.u32 %v4774_v5, 16  ;;  %v5362_v52 = vshll.u32 %v4774_v5, 16  ;;  %v9724_v22 = vcombine.low %v9709_v28, %v9712_v23  ;;  %v6890_v49 = vcombine.low %v1144_v13, %v8473_v39  ;;  %v8474_v39 = vld [vmem:[#allocation4 + $0xb8] sm:$0xf] }
 0x30d   : > { %v1991_v36 = vsel %vm1544_vm7, %v1982_v31, %v1990_v27  ;;  %v1414_v17 = vor.u32 %v1413_v50, %v1410_v14  ;;  %v5342_v58 = vshrl.u32 %v7064_v54, 16  ;;  %v5345_v57 = vshll.u32 %v7064_v54, 16 }
 0x30e   : > { %v5361_v20 = vrot.slane %v5359_v33, 3  ;;  %v5364_v21 = vrot.slane %v5362_v52, 4  ;;  %4269 = vmatmul.mubr.bf16.gmra.mrb[124].mxu1 %v1991_v36  ;;  %v5350_v35 = vshrl.u32 %v7065_v45, 16  ;;  %v5353_v6 = vshll.u32 %v7065_v45, 16 }
 0x30f   : > { %v2036_v24 = vshrl.u32 %v1414_v17, 16  ;;  %v2039_v7 = vshll.u32 %v1414_v17, 16  ;;  %v5344_v30 = vrot.slane %v5342_v58, 3  ;;  %v5347_v38 = vrot.slane %v5345_v57, 4  ;;  %v9727_v16 = vpop.f32.mrb[56].mxu1 }
 0x310   : > { %v5365_v42 = vor.u32 %v5364_v21, %v5361_v20  ;;  %v5352_v9 = vrot.slane %v5350_v35, 3  ;;  %v5355_v5 = vrot.slane %v5353_v6, 4  ;;  %v4776_v13 = vshrl.u32 %v9724_v22, 16  ;;  %v9730_v31 = vpop.f32.mrb[57].mxu1  ;;  %v4512_v6 = vld [vmem:[#allocation4 + $0xd0] sm:$0x8] }
 0x311   : > { %v2038_v14 = vrot.slane %v2036_v24, 3  ;;  %v2041_v27 = vrot.slane %v2039_v7, 4  ;;  %v5348_v50 = vor.u32 %v5347_v38, %v5344_v30  ;;  %v4779_v54 = vshll.u32 %v9724_v22, 16  ;;  %v9733_v33 = vpop.f32.mrb[58].mxu1  ;;  %v8441_v24 = vld [vmem:[#allocation10] sm:$0xff]  }
 0x312   : > { %5951 = vmatprep.mubr.bf16.mxu0 %v5365_v42  ;;  %v5356_v45 = vor.u32 %v5355_v5, %v5352_v9  ;;  %v4778_v52 = vrot.slane %v4776_v13, 4  ;;  %v6891_v36 = vcombine.low %v8474_v39, %v8474_v39  ;;  %v2019_v17 = vshrl.u32 %v6890_v49, 16  ;;  %v9735_v58 = vpop.f32.mrb[59].mxu1  ;;  %7853 = vmatprep.subr.bf16.mxu1 %v8441_v24 }
 0x313   : > { %v2042_v57 = vor.u32 %v2041_v27, %v2038_v14  ;;  %v4781_v20 = vrot.slane %v4779_v54, 5  ;;  %v2022_v21 = vshll.u32 %v6890_v49, 16  ;;  %v1416_v35 = vshrl.u32 %v9448_v2, 16  ;;  %7854 = vmatpush3.bf16.msra.mxu1 %v8441_v24 }
 0x314   : > { %v5357_v7 = vsel %vm1544_vm7, %v5348_v50, %v5356_v45  ;;  %v2021_v30 = vrot.slane %v2019_v17, 3  ;;  %v2027_v38 = vshrl.u32 %v6891_v36, 16  ;;  %v2030_v43 = vshll.u32 %v6891_v36, 16 }
 0x315   : > { %4276 = vmatprep.mubr.bf16.mxu1 %v2042_v57  ;;  %5952 = vmatmul.mubr.bf16.gmra.mrb[88].mxu0 %v5357_v7  ;;  %v4782_v42 = vor.u32 %v4781_v20, %v4778_v52  ;;  %v2024_v9 = vrot.slane %v2022_v21, 4  ;;  %v1418_v5 = vrot.slane %v1416_v35, 4  ;;  %v1419_v13 = vshll.u32 %v9448_v2, 16  ;;  %v1147_v20 = vld [vmem:[#allocation4 + $0xc0] sm:$0x8] }
 0x316   : > { %v2029_v39 = vrot.slane %v2027_v38, 3  ;;  %v2032_v14 = vrot.slane %v2030_v43, 4  ;;  %v9742_v49 = vadd.f32 %v9532_v61, %v9530_v41  ;;  %v7066_v27 = vcombine.low %v4512_v6, %v9709_v28  ;;  %v4516_v61 = vld [vmem:[#allocation4 + $0xe4] sm:$0xf]  ;;  %v4517_v28 = vld [vmem:[#allocation4 + $0xe8] sm:$0xf] }
 0x317   : > { %v5402_v50 = vshrl.u32 %v4782_v42, 16  ;;  %v5405_v54 = vshll.u32 %v4782_v42, 16  ;;  %v2025_v45 = vor.u32 %v2024_v9, %v2021_v30  ;;  %v1421_v36 = vrot.slane %v1419_v13, 5 }
 0x318   : > { %v2033_v17 = vor.u32 %v2032_v14, %v2029_v39  ;;  %v7067_v52 = vcombine.low %v9712_v23, %v9712_v23  ;;  %v5385_v57 = vshrl.u32 %v7066_v27, 16  ;;  %v5388_v2 = vshll.u32 %v7066_v27, 16 }
 0x319   : > { %v5404_v43 = vrot.slane %v5402_v50, 3  ;;  %v5407_v21 = vrot.slane %v5405_v54, 4  ;;  %v1422_v35 = vor.u32 %v1421_v36, %v1418_v5  ;;  %v9749_v41 = vadd.f32 %v9536_v44, %v9534_v1  ;;  %v8475_v5 = vld [vmem:[#allocation4 + $0xc4] sm:$0xf]  ;;  %v8476_v54 = vld [vmem:[#allocation4 + $0xc8] sm:$0xf] }
 0x31a   : > { %v2034_v6 = vsel %vm1544_vm7, %v2025_v45, %v2033_v17  ;;  %v5387_v7 = vrot.slane %v5385_v57, 3  ;;  %v5390_v24 = vrot.slane %v5388_v2, 4  ;;  %v5393_v30 = vshrl.u32 %v7067_v52, 16 }
 0x31b   : > { %v5408_v38 = vor.u32 %v5407_v21, %v5404_v43  ;;  %4277 = vmatmul.mubr.bf16.gmra.mrb[128].mxu1 %v2034_v6  ;;  %v2079_v23 = vshrl.u32 %v1422_v35, 16  ;;  %v2082_v42 = vshll.u32 %v1422_v35, 16  ;;  %v5396_v9 = vshll.u32 %v7067_v52, 16 }
 0x31c   : > { %v5391_v13 = vor.u32 %v5390_v24, %v5387_v7  ;;  %v5395_v39 = vrot.slane %v5393_v30, 3  ;;  %v9752_v14 = vcombine.low %v4516_v61, %v4517_v28  ;;  %v6892_v27 = vcombine.low %v1147_v20, %v8475_v5  ;;  %v4515_v7 = vld [vmem:[#allocation4 + $0xe0] sm:$0x8] }
 0x31d   : > { %5959 = vmatprep.mubr.bf16.mxu0 %v5408_v38  ;;  %v2081_v1 = vrot.slane %v2079_v23, 3  ;;  %v2084_v44 = vrot.slane %v2082_v42, 4  ;;  %v5398_v50 = vrot.slane %v5396_v9, 4  ;;  %v6893_v45 = vcombine.low %v8476_v54, %v8476_v54  ;;  %v8442_v9 = vld [vmem:[#allocation10 + $0x8] sm:$0xff]  }
 0x31e   : > { %v4784_v36 = vshrl.u32 %v9752_v14, 16  ;;  %v4787_v17 = vshll.u32 %v9752_v14, 16  ;;  %v2062_v57 = vshrl.u32 %v6892_v27, 16  ;;  %v2065_v2 = vshll.u32 %v6892_v27, 16  ;;  %v9756_v43 = vpop.f32.mrb[60].mxu1  ;;  %7855 = vmatprep.subr.bf16.mxu1 %v8442_v9 }
 0x31f   : > { %v2085_v52 = vor.u32 %v2084_v44, %v2081_v1  ;;  %v5399_v21 = vor.u32 %v5398_v50, %v5395_v39  ;;  %v2070_v35 = vshrl.u32 %v6893_v45, 16  ;;  %v2073_v6 = vshll.u32 %v6893_v45, 16  ;;  %v9758_v20 = vpop.f32.mrb[61].mxu1  ;;  %7856 = vmatpush3.bf16.msra.mxu1 %v8442_v9 }
 0x320   : > { %v4786_v24 = vrot.slane %v4784_v36, 4  ;;  %v4789_v30 = vrot.slane %v4787_v17, 5  ;;  %v2064_v38 = vrot.slane %v2062_v57, 3  ;;  %v2067_v23 = vrot.slane %v2065_v2, 4  ;;  %v9760_v42 = vpop.f32.mrb[62].mxu1 }
 0x321   : > { %4284 = vmatprep.mubr.bf16.mxu1 %v2085_v52  ;;  %v5400_v5 = vsel %vm1544_vm7, %v5391_v13, %v5399_v21  ;;  %v2072_v27 = vrot.slane %v2070_v35, 3  ;;  %v2075_v54 = vrot.slane %v2073_v6, 4  ;;  %v1424_v1 = vshrl.u32 %v9459_v51, 16  ;;  %v9764_v39 = vpop.f32.mrb[63].mxu1  ;;  %v9771_v52 = vld [vmem:[#allocation4 + $0xf4] sm:$0xf] }
 0x322   : > { %5960 = vmatmul.mubr.bf16.gmra.mrb[92].mxu0 %v5400_v5  ;;  %v4790_v44 = vor.u32 %v4789_v30, %v4786_v24  ;;  %v2068_v50 = vor.u32 %v2067_v23, %v2064_v38  ;;  %v1427_v45 = vshll.u32 %v9459_v51, 16  ;;  %v9769_v36 = vadd.f32 %v9557_v60, %v9555_v8  ;;  %v4520_v51 = vld [vmem:[#allocation4 + $0xf8] sm:$0xf] }
 0x323   : > { %v2076_v17 = vor.u32 %v2075_v54, %v2072_v27  ;;  %v1426_v57 = vrot.slane %v1424_v1, 4  ;;  %v7068_v2 = vcombine.low %v4515_v7, %v4516_v61  ;;  %v7069_v13 = vcombine.low %v4517_v28, %v4517_v28  ;;  %v1150_v7 = vld [vmem:[#allocation4 + $0xd0] sm:$0x8] }
 0x324   : > { %10435 = vst [vmem:[#allocation42_spill] sm:$0xff] %v9769_v36  ;;  %v5445_v21 = vshrl.u32 %v4790_v44, 16  ;;  %v5448_v35 = vshll.u32 %v4790_v44, 16  ;;  %v1429_v6 = vrot.slane %v1427_v45, 5  ;;  %v9775_v24 = vadd.f32 %v9563_v4, %v9559_v47 }
 0x325   : > { %v2077_v30 = vsel %vm1544_vm7, %v2068_v50, %v2076_v17  ;;  %v5428_v8 = vshrl.u32 %v7068_v2, 16  ;;  %v5431_v60 = vshll.u32 %v7068_v2, 16  ;;  %v5436_v38 = vshrl.u32 %v7069_v13, 16 }
 0x326   : > { %10436 = vst [vmem:[#allocation43_spill] sm:$0xff] %v9775_v24  ;;  %v5447_v23 = vrot.slane %v5445_v21, 3  ;;  %v5450_v5 = vrot.slane %v5448_v35, 4  ;;  %4285 = vmatmul.mubr.bf16.gmra.mrb[132].mxu1 %v2077_v30  ;;  %v1430_v61 = vor.u32 %v1429_v6, %v1426_v57  ;;  %v5439_v28 = vshll.u32 %v7069_v13, 16  ;;  %v8477_v21 = vld [vmem:[#allocation4 + $0xd4] sm:$0xf] }
 0x327   : > { %v5430_v9 = vrot.slane %v5428_v8, 3  ;;  %v5433_v27 = vrot.slane %v5431_v60, 4  ;;  %v5438_v54 = vrot.slane %v5436_v38, 3  ;;  %v9779_v1 = vcombine.low %v9771_v52, %v4520_v51  ;;  %v8478_v30 = vld [vmem:[#allocation4 + $0xd8] sm:$0xf] }
 0x328   : > { %v5451_v47 = vor.u32 %v5450_v5, %v5447_v23  ;;  %v2122_v4 = vshrl.u32 %v1430_v61, 16  ;;  %v2125_v44 = vshll.u32 %v1430_v61, 16  ;;  %v5441_v45 = vrot.slane %v5439_v28, 4 }
 0x329   : > { %v5434_v50 = vor.u32 %v5433_v27, %v5430_v9  ;;  %v4792_v17 = vshrl.u32 %v9779_v1, 16  ;;  %v4795_v2 = vshll.u32 %v9779_v1, 16  ;;  %v6894_v35 = vcombine.low %v1150_v7, %v8477_v21  ;;  %v4518_v27 = vld [vmem:[#allocation4 + $0xf0] sm:$0x8] }
 0x32a   : > { %5967 = vmatprep.mubr.bf16.mxu0 %v5451_v47  ;;  %v2124_v57 = vrot.slane %v2122_v4, 3  ;;  %v2127_v13 = vrot.slane %v2125_v44, 4  ;;  %v5442_v6 = vor.u32 %v5441_v45, %v5438_v54  ;;  %v6895_v8 = vcombine.low %v8478_v30, %v8478_v30  ;;  %v9787_v44 = vld [vmem:[#allocation4 + $0x104] sm:$0xf] }
 0x32b   : > { %v4794_v60 = vrot.slane %v4792_v17, 4  ;;  %v4797_v38 = vrot.slane %v4795_v2, 5  ;;  %v2105_v24 = vshrl.u32 %v6894_v35, 16  ;;  %v2108_v23 = vshll.u32 %v6894_v35, 16  ;;  %v9796_v35 = vld [vmem:[#allocation4 + $0x108] sm:$0xf] }
 0x32c   : > { %v2128_v5 = vor.u32 %v2127_v13, %v2124_v57  ;;  %v5443_v61 = vsel %vm1544_vm7, %v5434_v50, %v5442_v6  ;;  %v2113_v28 = vshrl.u32 %v6895_v8, 16  ;;  %v2116_v9 = vshll.u32 %v6895_v8, 16  ;;  %v9784_v36 = vpop.f32.mrb[64].mxu1 }
 0x32d   : > { %5968 = vmatmul.mubr.bf16.gmra.mrb[96].mxu0 %v5443_v61  ;;  %v4798_v7 = vor.u32 %v4797_v38, %v4794_v60  ;;  %v2107_v47 = vrot.slane %v2105_v24, 3  ;;  %v2110_v4 = vrot.slane %v2108_v23, 4  ;;  %v1432_v54 = vshrl.u32 %v9463_v15, 16  ;;  %v9789_v45 = vpop.f32.mrb[65].mxu1 }
 0x32e   : > { %4292 = vmatprep.mubr.bf16.mxu1 %v2128_v5  ;;  %v2115_v17 = vrot.slane %v2113_v28, 3  ;;  %v2118_v2 = vrot.slane %v2116_v9, 4  ;;  %v1435_v50 = vshll.u32 %v9463_v15, 16  ;;  %v9794_v21 = vadd.f32 %v9584_v59, %v9581_v56  ;;  %v9798_v57 = vpop.f32.mrb[66].mxu1 }
 0x32f   : > { %v5488_v24 = vshrl.u32 %v4798_v7, 16  ;;  %v5491_v13 = vshll.u32 %v4798_v7, 16  ;;  %v2111_v6 = vor.u32 %v2110_v4, %v2107_v47  ;;  %v1434_v30 = vrot.slane %v1432_v54, 4  ;;  %v9800_v8 = vpop.f32.mrb[67].mxu1 }
 0x330   : > { %10437 = vst [vmem:[#allocation44_spill] sm:$0xff] %v9794_v21  ;;  %v2119_v60 = vor.u32 %v2118_v2, %v2115_v17  ;;  %v1437_v38 = vrot.slane %v1435_v50, 5  ;;  %v7070_v23 = vcombine.low %v4518_v27, %v9771_v52  ;;  %v7071_v5 = vcombine.low %v4520_v51, %v4520_v51  ;;  %v1153_v27 = vld [vmem:[#allocation4 + $0xe0] sm:$0x8] }
 0x331   : > { %v5490_v15 = vrot.slane %v5488_v24, 3  ;;  %v5493_v61 = vrot.slane %v5491_v13, 4  ;;  %v9805_v56 = vadd.f32 %v9593_v29, %v9588_v48  ;;  %v9809_v59 = vcombine.low %v9787_v44, %v9796_v35 }
 0x332   : > { %v2120_v28 = vsel %vm1544_vm7, %v2111_v6, %v2119_v60  ;;  %v1438_v9 = vor.u32 %v1437_v38, %v1434_v30  ;;  %v5471_v7 = vshrl.u32 %v7070_v23, 16  ;;  %v5474_v47 = vshll.u32 %v7070_v23, 16  ;;  %v8479_v23 = vld [vmem:[#allocation4 + $0xe4] sm:$0xf] }
 0x333   : > { %10438 = vst [vmem:[#allocation45_spill] sm:$0xff] %v9805_v56  ;;  %v5494_v4 = vor.u32 %v5493_v61, %v5490_v15  ;;  %4293 = vmatmul.mubr.bf16.gmra.mrb[136].mxu1 %v2120_v28  ;;  %v5479_v54 = vshrl.u32 %v7071_v5, 16  ;;  %v5482_v52 = vshll.u32 %v7071_v5, 16  ;;  %v4800_v51 = vshrl.u32 %v9809_v59, 16  ;;  %v8480_v28 = vld [vmem:[#allocation4 + $0xe8] sm:$0xf] }
 0x334   : > { %v2165_v17 = vshrl.u32 %v1438_v9, 16  ;;  %v2168_v2 = vshll.u32 %v1438_v9, 16  ;;  %v5473_v48 = vrot.slane %v5471_v7, 3  ;;  %v5476_v29 = vrot.slane %v5474_v47, 4  ;;  %v8443_v9 = vld [vmem:[#allocation10 + $0x10] sm:$0xff]  }
 0x335   : > { %5975 = vmatprep.mubr.bf16.mxu0 %v5494_v4  ;;  %v5481_v50 = vrot.slane %v5479_v54, 3  ;;  %v5484_v24 = vrot.slane %v5482_v52, 4  ;;  %v4802_v13 = vrot.slane %v4800_v51, 4  ;;  %v4803_v6 = vshll.u32 %v9809_v59, 16  ;;  %7857 = vmatprep.subr.bf16.mxu1 %v8443_v9 }
 0x336   : > { %v2167_v30 = vrot.slane %v2165_v17, 3  ;;  %v2170_v60 = vrot.slane %v2168_v2, 4  ;;  %v5477_v38 = vor.u32 %v5476_v29, %v5473_v48  ;;  %v6896_v15 = vcombine.low %v1153_v27, %v8479_v23  ;;  %v4521_v48 = vld [vmem:[#allocation4 + $0x100] sm:$0x8]  ;;  %7858 = vmatpush3.bf16.msra.mxu1 %v8443_v9 }
 0x337   : > { %v5485_v61 = vor.u32 %v5484_v24, %v5481_v50  ;;  %v4805_v5 = vrot.slane %v4803_v6, 5  ;;  %v6897_v56 = vcombine.low %v8480_v28, %v8480_v28  ;;  %v1440_v21 = vshrl.u32 %v9472_v26, 16 }
 0x338   : > { %v2171_v7 = vor.u32 %v2170_v60, %v2167_v30  ;;  %v2148_v47 = vshrl.u32 %v6896_v15, 16  ;;  %v2151_v4 = vshll.u32 %v6896_v15, 16  ;;  %v1443_v54 = vshll.u32 %v9472_v26, 16 }
 0x339   : > { %v5486_v52 = vsel %vm1544_vm7, %v5477_v38, %v5485_v61  ;;  %v4806_v51 = vor.u32 %v4805_v5, %v4802_v13  ;;  %v2156_v17 = vshrl.u32 %v6897_v56, 16  ;;  %v2159_v2 = vshll.u32 %v6897_v56, 16  ;;  %v9817_v29 = vpop.f32.mrb[68].mxu1 }
 0x33a   : > { %4300 = vmatprep.mubr.bf16.mxu1 %v2171_v7  ;;  %5976 = vmatmul.mubr.bf16.gmra.mrb[100].mxu0 %v5486_v52  ;;  %v2150_v27 = vrot.slane %v2148_v47, 3  ;;  %v2153_v50 = vrot.slane %v2151_v4, 4  ;;  %v1442_v24 = vrot.slane %v1440_v21, 4  ;;  %v1445_v6 = vrot.slane %v1443_v54, 5  ;;  %v9819_v30 = vpop.f32.mrb[69].mxu1 }
 0x33b   : > { %v5531_v60 = vshrl.u32 %v4806_v51, 16  ;;  %v5534_v23 = vshll.u32 %v4806_v51, 16  ;;  %v2158_v26 = vrot.slane %v2156_v17, 3  ;;  %v2161_v15 = vrot.slane %v2159_v2, 4  ;;  %v9821_v38 = vpop.f32.mrb[70].mxu1 }
 0x33c   : > { %v2154_v56 = vor.u32 %v2153_v50, %v2150_v27  ;;  %v1446_v13 = vor.u32 %v1445_v6, %v1442_v24  ;;  %v9825_v61 = vadd.f32 %v9613_v32, %v9611_v55  ;;  %v7072_v5 = vcombine.low %v4521_v48, %v9787_v44  ;;  %v9828_v28 = vpop.f32.mrb[71].mxu1  ;;  %v1156_v17 = vld [vmem:[#allocation4 + $0xf0] sm:$0x8]  ;;  %v4525_v50 = vld [vmem:[#allocation4 + $0x114] sm:$0xf] }
 0x33d   : > { %v5533_v21 = vrot.slane %v5531_v60, 3  ;;  %v5536_v7 = vrot.slane %v5534_v23, 4  ;;  %v2162_v47 = vor.u32 %v2161_v15, %v2158_v26  ;;  %v7073_v4 = vcombine.low %v9796_v35, %v9796_v35  ;;  %v4526_v60 = vld [vmem:[#allocation4 + $0x118] sm:$0xf]  ;;  %v8481_v15 = vld [vmem:[#allocation4 + $0xf4] sm:$0xf] }
 0x33e   : > { %v2208_v54 = vshrl.u32 %v1446_v13, 16  ;;  %v2211_v52 = vshll.u32 %v1446_v13, 16  ;;  %v5514_v51 = vshrl.u32 %v7072_v5, 16  ;;  %v5517_v9 = vshll.u32 %v7072_v5, 16  ;;  %v4524_v5 = vld [vmem:[#allocation4 + $0x110] sm:$0x8] }
 0x33f   : > { %v5537_v2 = vor.u32 %v5536_v7, %v5533_v21  ;;  %v2163_v27 = vsel %vm1544_vm7, %v2154_v56, %v2162_v47  ;;  %v5522_v55 = vshrl.u32 %v7073_v4, 16  ;;  %v5525_v32 = vshll.u32 %v7073_v4, 16  ;;  %v8482_v7 = vld [vmem:[#allocation4 + $0xf8] sm:$0xf] }
 0x340   : > { %4301 = vmatmul.mubr.bf16.gmra.mrb[140].mxu1 %v2163_v27  ;;  %v2210_v44 = vrot.slane %v2208_v54, 3  ;;  %v2213_v48 = vrot.slane %v2211_v52, 4  ;;  %v5516_v24 = vrot.slane %v5514_v51, 3  ;;  %v5519_v6 = vrot.slane %v5517_v9, 4 }
 0x341   : > { %5983 = vmatprep.mubr.bf16.mxu0 %v5537_v2  ;;  %v5524_v23 = vrot.slane %v5522_v55, 3  ;;  %v5527_v35 = vrot.slane %v5525_v32, 4  ;;  %v9835_v26 = vadd.f32 %v9619_v62, %v9616_v53  ;;  %v6898_v13 = vcombine.low %v1156_v17, %v8481_v15 }
 0x342   : > { %v2214_v56 = vor.u32 %v2213_v48, %v2210_v44  ;;  %v5520_v21 = vor.u32 %v5519_v6, %v5516_v24  ;;  %v6899_v47 = vcombine.low %v8482_v7, %v8482_v7  ;;  %v9839_v4 = vadd.f32 %v9640_v0, %v9636_v40  ;;  %v8425_v48 = vld [vmem:[#allocation4 + $0x2c] ss:$0 sps:$4 sm:$0x11]  }
 0x343   : > { %v5528_v54 = vor.u32 %v5527_v35, %v5524_v23  ;;  %v2191_v52 = vshrl.u32 %v6898_v13, 16  ;;  %v2194_v51 = vshll.u32 %v6898_v13, 16  ;;  %v9841_v9 = vcombine.low %v4525_v50, %v4526_v60 }
 0x344   : > { %4308 = vmatprep.mubr.bf16.mxu1 %v2214_v56  ;;  %v2199_v2 = vshrl.u32 %v6899_v47, 16  ;;  %v2202_v53 = vshll.u32 %v6899_v47, 16  ;;  %v7074_v62 = vcombine.low %v4524_v5, %v4525_v50  ;;  %v7075_v27 = vcombine.low %v4526_v60, %v4526_v60 }
 0x345   : > { %v5529_v17 = vsel %vm1544_vm7, %v5520_v21, %v5528_v54  ;;  %v2193_v55 = vrot.slane %v2191_v52, 3  ;;  %v2196_v32 = vrot.slane %v2194_v51, 4  ;;  %v4808_v44 = vshrl.u32 %v9841_v9, 16 }
 0x346   : > { %5984 = vmatmul.mubr.bf16.gmra.mrb[104].mxu0 %v5529_v17  ;;  %v2201_v40 = vrot.slane %v2199_v2, 3  ;;  %v2204_v0 = vrot.slane %v2202_v53, 4  ;;  %v4811_v24 = vshll.u32 %v9841_v9, 16  ;;  %v5557_v6 = vshrl.u32 %v7074_v62, 16 }
 0x347   : > { %v2197_v23 = vor.u32 %v2196_v32, %v2193_v55  ;;  %v4810_v35 = vrot.slane %v4808_v44, 4  ;;  %v5560_v15 = vshll.u32 %v7074_v62, 16  ;;  %v5565_v13 = vshrl.u32 %v7075_v27, 16  ;;  %v9846_v56 = vpop.f32.mrb[72].mxu1 }
 0x348   : > { %v2205_v50 = vor.u32 %v2204_v0, %v2201_v40  ;;  %v4813_v60 = vrot.slane %v4811_v24, 5  ;;  %v5559_v5 = vrot.slane %v5557_v6, 3  ;;  %v5568_v21 = vshll.u32 %v7075_v27, 16  ;;  %v9848_v7 = vpop.f32.mrb[73].mxu1 }
 0x349   : > { %v5562_v47 = vrot.slane %v5560_v15, 4  ;;  %v5567_v54 = vrot.slane %v5565_v13, 3  ;;  %v9852_v52 = vadd.f32 %v9645_v11, %v9642_v18  ;;  %v4863_v51 = vrot.slane %v9475_v46, 5  ;;  %v9855_v2 = vpop.f32.mrb[74].mxu1 }
 0x34a   : > { %v2206_v53 = vsel %vm1544_vm7, %v2197_v23, %v2205_v50  ;;  %v4814_v62 = vor.u32 %v4813_v60, %v4810_v35  ;;  %v5570_v17 = vrot.slane %v5568_v21, 4  ;;  %v4864_v55 = vrot.slane %v8425_v48, 5  ;;  %v9858_v32 = vpop.f32.mrb[75].mxu1  ;;  %v8426_v18 = vld [vmem:[#allocation4 + $0x3c] ss:$0 sps:$4 sm:$0x11]  }
 0x34b   : > { %10439 = vst [vmem:[#allocation46_spill] sm:$0xff] %v9852_v52  ;;  %4309 = vmatmul.mubr.bf16.gmra.mrb[144].mxu1 %v2206_v53  ;;  %v5563_v27 = vor.u32 %v5562_v47, %v5559_v5  ;;  %v4938_v44 = vshrl.u32 %v4863_v51, 16  ;;  %v4941_v40 = vshll.u32 %v4863_v51, 16  ;;  %v9862_v0 = vadd.f32 %v9665_v12, %v9663_v3  ;;  %v8427_v23 = vld [vmem:[#allocation4 + $0x4c] ss:$0 sps:$4 sm:$0x11]  }
 0x34c   : > { %v5574_v11 = vshrl.u32 %v4814_v62, 16  ;;  %v5577_v46 = vshll.u32 %v4814_v62, 16  ;;  %v5571_v24 = vor.u32 %v5570_v17, %v5567_v54  ;;  %v4865_v6 = vsel %vm1495_vm6, %v4863_v51, %v4864_v55  ;;  %v8444_v47 = vld [vmem:[#allocation10 + $0x18] sm:$0xff]  }
 0x34d   : > { %10440 = vst [vmem:[#allocation47_spill] sm:$0xff] %v9862_v0  ;;  %v4940_v35 = vrot.slane %v4938_v44, 3  ;;  %v4943_v15 = vrot.slane %v4941_v40, 4  ;;  %v4946_v48 = vshrl.u32 %v4865_v6, 16  ;;  %v4949_v13 = vshll.u32 %v4865_v6, 16  ;;  %v10441_v51 = vld [vmem:[#allocation33_spill] sm:$0xff]  ;;  %7859 = vmatprep.subr.bf16.mxu1 %v8444_v47 }
 0x34e   : > { %v5576_v50 = vrot.slane %v5574_v11, 3  ;;  %v5579_v60 = vrot.slane %v5577_v46, 4  ;;  %v5572_v5 = vsel %vm1544_vm7, %v5563_v27, %v5571_v24  ;;  %v4866_v21 = vrot.slane %v9499_v10, 5  ;;  %v10443_v11 = vld [vmem:[#allocation26_spill] sm:$0xff]  ;;  %7860 = vmatpush3.bf16.msra.mxu1 %v8444_v47 }
 0x34f   : > { %v4944_v3 = vor.u32 %v4943_v15, %v4940_v35  ;;  %v4948_v12 = vrot.slane %v4946_v48, 3  ;;  %v4951_v53 = vrot.slane %v4949_v13, 4  ;;  %v4867_v0 = vrot.slane %v8426_v18, 5  ;;  %v8428_v10 = vld [vmem:[#allocation4 + $0x5c] ss:$0 sps:$4 sm:$0x11]  }
 0x350   : > { %v5580_v62 = vor.u32 %v5579_v60, %v5576_v50  ;;  %v4981_v54 = vshrl.u32 %v4866_v21, 16  ;;  %v4984_v17 = vshll.u32 %v4866_v21, 16  ;;  %v9869_v55 = vadd.f32 %v10441_v51, %v9668_v25  ;;  %v8429_v50 = vld [vmem:[#allocation4 + $0x6c] ss:$0 sps:$4 sm:$0x11]  }
 0x351   : > { %v4952_v44 = vor.u32 %v4951_v53, %v4948_v12  ;;  %v4868_v40 = vsel %vm1495_vm6, %v4866_v21, %v4867_v0  ;;  %v4869_v27 = vrot.slane %v10443_v11, 5  ;;  %v4870_v46 = vrot.slane %v8427_v23, 5 }
 0x352   : > { %10442 = vst [vmem:[#allocation33_spill] sm:$0xff] %v9869_v55  ;;  %5991 = vmatprep.mubr.bf16.mxu0 %v5580_v62  ;;  %v4983_v24 = vrot.slane %v4981_v54, 3  ;;  %v4986_v6 = vrot.slane %v4984_v17, 4  ;;  %v4989_v18 = vshrl.u32 %v4868_v40, 16  ;;  %v4992_v35 = vshll.u32 %v4868_v40, 16  ;;  %v10444_v54 = vld [vmem:[#allocation35_spill] sm:$0xff] }
 0x353   : > { %5992 = vmatmul.mubr.bf16.gmra.mrb[108].mxu0 %v5572_v5  ;;  %v4953_v15 = vsel %vm1544_vm7, %v4944_v3, %v4952_v44  ;;  %v4871_v25 = vsel %vm1495_vm6, %v4869_v27, %v4870_v46  ;;  %v5024_v48 = vshrl.u32 %v4869_v27, 16  ;;  %v5027_v13 = vshll.u32 %v4869_v27, 16  ;;  %v10446_v44 = vld [vmem:[#allocation27_spill] sm:$0xff]  ;;  %v10452_v55 = vld [vmem:[#allocation29_spill] sm:$0xff] }
 0x354   : > { %7821 = vmatprep.mubr.bf16.mxu0 %v4953_v15  ;;  %v4987_v0 = vor.u32 %v4986_v6, %v4983_v24  ;;  %v4991_v60 = vrot.slane %v4989_v18, 3  ;;  %v4994_v21 = vrot.slane %v4992_v35, 4  ;;  %v5032_v23 = vshrl.u32 %v4871_v25, 16  ;;  %v9875_v12 = vpop.f32.mrb[76].mxu1  ;;  %v10447_v6 = vld [vmem:[#allocation36_spill] sm:$0xff]  ;;  %v10448_v18 = vld [vmem:[#allocation37_spill] sm:$0xff] }
 0x355   : > { %v5026_v47 = vrot.slane %v5024_v48, 3  ;;  %v5029_v53 = vrot.slane %v5027_v13, 4  ;;  %v5035_v62 = vshll.u32 %v4871_v25, 16  ;;  %v9879_v5 = vadd.f32 %v10444_v54, %v9681_v63  ;;  %v9881_v3 = vpop.f32.mrb[77].mxu1  ;;  %v10450_v15 = vld [vmem:[#allocation28_spill] sm:$0xff] }
 0x356   : > { %v4995_v17 = vor.u32 %v4994_v21, %v4991_v60  ;;  %v5034_v51 = vrot.slane %v5032_v23, 3  ;;  %v4872_v40 = vrot.slane %v10446_v44, 5  ;;  %v4873_v11 = vrot.slane %v8428_v10, 5  ;;  %v9884_v27 = vpop.f32.mrb[78].mxu1 }
 0x357   : > { %10445 = vst [vmem:[#allocation26_spill] sm:$0xff] %v9879_v5  ;;  %v5030_v46 = vor.u32 %v5029_v53, %v5026_v47  ;;  %v5037_v24 = vrot.slane %v5035_v62, 4  ;;  %v9888_v35 = vadd.f32 %v10448_v18, %v10447_v6  ;;  %v4875_v25 = vrot.slane %v10450_v15, 5  ;;  %v9891_v48 = vpop.f32.mrb[79].mxu1 }
 0x358   : > { %v4996_v63 = vsel %vm1544_vm7, %v4987_v0, %v4995_v17  ;;  %v4874_v13 = vsel %vm1495_vm6, %v4872_v40, %v4873_v11  ;;  %v5067_v60 = vshrl.u32 %v4872_v40, 16  ;;  %v5070_v21 = vshll.u32 %v4872_v40, 16  ;;  %v8430_v47 = vld [vmem:[#allocation4 + $0x7c] ss:$0 sps:$4 sm:$0x11]  }
 0x359   : > { %10449 = vst [vmem:[#allocation35_spill] sm:$0xff] %v9888_v35  ;;  %v5038_v23 = vor.u32 %v5037_v24, %v5034_v51  ;;  %v5075_v10 = vshrl.u32 %v4874_v13, 16  ;;  %v5078_v54 = vshll.u32 %v4874_v13, 16  ;;  %v4876_v44 = vrot.slane %v8429_v50, 5 }
 0x35a   : > { %v5069_v53 = vrot.slane %v5067_v60, 3  ;;  %v5072_v62 = vrot.slane %v5070_v21, 4  ;;  %v5110_v5 = vshrl.u32 %v4875_v25, 16  ;;  %v5113_v6 = vshll.u32 %v4875_v25, 16  ;;  %v10451_v60 = vld [vmem:[#allocation38_spill] sm:$0xff] }
 0x35b   : > { %7822 = vmatmul.mubr.bf16.vlgmr.msra.gmra.mrb[16].mxu0 %v4996_v63  ;;  %v5039_v18 = vsel %vm1544_vm7, %v5030_v46, %v5038_v23  ;;  %v5077_v15 = vrot.slane %v5075_v10, 3  ;;  %v5080_v35 = vrot.slane %v5078_v54, 4  ;;  %v4877_v0 = vsel %vm1495_vm6, %v4875_v25, %v4876_v44  ;;  %v8431_v24 = vld [vmem:[#allocation4 + $0x8c] ss:$0 sps:$4 sm:$0x11]  }
 0x35c   : > { %7825 = vmatprep.mubr.bf16.mxu0 %v5039_v18  ;;  %v5073_v17 = vor.u32 %v5072_v62, %v5069_v53  ;;  %v5112_v11 = vrot.slane %v5110_v5, 3  ;;  %v5115_v40 = vrot.slane %v5113_v6, 4  ;;  %v5118_v51 = vshrl.u32 %v4877_v0, 16  ;;  %v10453_v10 = vld [vmem:[#allocation39_spill] sm:$0xff]  ;;  %v10454_v62 = vld [vmem:[#allocation30_spill] sm:$0xff] }
 0x35d   : > { %v5081_v13 = vor.u32 %v5080_v35, %v5077_v15  ;;  %v5121_v50 = vshll.u32 %v4877_v0, 16  ;;  %v9899_v21 = vadd.f32 %v10451_v60, %v9694_v37  ;;  %v4878_v63 = vrot.slane %v10452_v55, 5  ;;  %v8432_v18 = vld [vmem:[#allocation4 + $0x9c] ss:$0 sps:$4 sm:$0x11]  }
 0x35e   : > { %v5116_v52 = vor.u32 %v5115_v40, %v5112_v11  ;;  %v5120_v46 = vrot.slane %v5118_v51, 3  ;;  %v4879_v23 = vrot.slane %v8430_v47, 5  ;;  %v9904_v25 = vadd.f32 %v9701_v34, %v10453_v10 }
 0x35f   : > { %v5082_v5 = vsel %vm1544_vm7, %v5073_v17, %v5081_v13  ;;  %v5123_v54 = vrot.slane %v5121_v50, 4  ;;  %v5153_v44 = vshrl.u32 %v4878_v63, 16  ;;  %v5156_v53 = vshll.u32 %v4878_v63, 16 }
 0x360   : > { %v4880_v35 = vsel %vm1495_vm6, %v4878_v63, %v4879_v23  ;;  %v4881_v6 = vrot.slane %v10454_v62, 5  ;;  %v4882_v37 = vrot.slane %v8431_v24, 5  ;;  %v9911_v55 = vadd.f32 %v9730_v31, %v9727_v16  ;;  %v8433_v63 = vld [vmem:[#allocation4 + $0xac] ss:$0 sps:$4 sm:$0x11]  }
 0x361   : > { %v5124_v47 = vor.u32 %v5123_v54, %v5120_v46  ;;  %v5155_v15 = vrot.slane %v5153_v44, 3  ;;  %v5158_v0 = vrot.slane %v5156_v53, 4  ;;  %v5161_v34 = vshrl.u32 %v4880_v35, 16  ;;  %v9913_v11 = vpop.f32.mrb[80].mxu1  ;;  %v10456_v62 = vld [vmem:[#allocation31_spill] sm:$0xff] }
 0x362   : > { %10455 = vst [vmem:[#allocation27_spill] sm:$0xff] %v9911_v55  ;;  %v5164_v17 = vshll.u32 %v4880_v35, 16  ;;  %v4883_v40 = vsel %vm1495_vm6, %v4881_v6, %v4882_v37  ;;  %v5196_v51 = vshrl.u32 %v4881_v6, 16  ;;  %v5199_v13 = vshll.u32 %v4881_v6, 16  ;;  %v9916_v50 = vpop.f32.mrb[81].mxu1 }
 0x363   : > { %7826 = vmatmul.mubr.bf16.gmra.mrb[20].mxu0 %v5082_v5  ;;  %v5125_v24 = vsel %vm1544_vm7, %v5116_v52, %v5124_v47  ;;  %v5159_v60 = vor.u32 %v5158_v0, %v5155_v15  ;;  %v5163_v16 = vrot.slane %v5161_v34, 3  ;;  %v5204_v31 = vshrl.u32 %v4883_v40, 16  ;;  %v9919_v46 = vpop.f32.mrb[82].mxu1  ;;  %v8445_v5 = vld [vmem:[#allocation10 + $0x20] sm:$0xff]   ;;  %v10458_v34 = vld [vmem:[#allocation32_spill] sm:$0xff] }
 0x364   : > { %7829 = vmatprep.mubr.bf16.mxu0 %v5125_v24  ;;  %v5166_v23 = vrot.slane %v5164_v17, 4  ;;  %v5198_v10 = vrot.slane %v5196_v51, 3  ;;  %v5201_v54 = vrot.slane %v5199_v13, 4  ;;  %v5207_v44 = vshll.u32 %v4883_v40, 16  ;;  %v9921_v53 = vpop.f32.mrb[83].mxu1  ;;  %7861 = vmatprep.subr.bf16.mxu1 %v8445_v5 }
 0x365   : > { %v5206_v35 = vrot.slane %v5204_v31, 3  ;;  %v4884_v6 = vrot.slane %v10456_v62, 5  ;;  %v4885_v37 = vrot.slane %v8432_v18, 5  ;;  %v9926_v52 = vadd.f32 %v9735_v58, %v9733_v33  ;;  %7862 = vmatpush3.bf16.msra.mxu1 %v8445_v5 }
 0x366   : > { %v5167_v47 = vor.u32 %v5166_v23, %v5163_v16  ;;  %v5202_v15 = vor.u32 %v5201_v54, %v5198_v10  ;;  %v5209_v0 = vrot.slane %v5207_v44, 4  ;;  %v4887_v24 = vrot.slane %v10458_v34, 5  ;;  %v8434_v10 = vld [vmem:[#allocation4 + $0xbc] ss:$0 sps:$4 sm:$0x11]  }
 0x367   : > { %10457 = vst [vmem:[#allocation36_spill] sm:$0xff] %v9926_v52  ;;  %v4886_v17 = vsel %vm1495_vm6, %v4884_v6, %v4885_v37  ;;  %v5239_v51 = vshrl.u32 %v4884_v6, 16  ;;  %v5242_v40 = vshll.u32 %v4884_v6, 16  ;;  %v4888_v13 = vrot.slane %v8433_v63, 5 }
 0x368   : > { %v5168_v31 = vsel %vm1544_vm7, %v5159_v60, %v5167_v47  ;;  %v5210_v62 = vor.u32 %v5209_v0, %v5206_v35  ;;  %v5247_v18 = vshrl.u32 %v4886_v17, 16  ;;  %v5250_v55 = vshll.u32 %v4886_v17, 16  ;;  %v8435_v35 = vld [vmem:[#allocation4 + $0xcc] ss:$0 sps:$4 sm:$0x11]   ;;  %v10459_v17 = vld [vmem:[#allocation34_spill] sm:$0xff] }
 0x369   : > { %v5241_v33 = vrot.slane %v5239_v51, 3  ;;  %v5244_v58 = vrot.slane %v5242_v40, 4  ;;  %v4889_v16 = vsel %vm1495_vm6, %v4887_v24, %v4888_v13  ;;  %v5282_v23 = vshrl.u32 %v4887_v24, 16 }
 0x36a   : > { %v5211_v54 = vsel %vm1544_vm7, %v5202_v15, %v5210_v62  ;;  %v5249_v44 = vrot.slane %v5247_v18, 3  ;;  %v5252_v37 = vrot.slane %v5250_v55, 4  ;;  %v5285_v34 = vshll.u32 %v4887_v24, 16 }
 0x36b   : > { %7830 = vmatmul.mubr.bf16.gmra.mrb[24].mxu0 %v5168_v31  ;;  %v5245_v63 = vor.u32 %v5244_v58, %v5241_v33  ;;  %v5284_v6 = vrot.slane %v5282_v23, 3  ;;  %v5290_v52 = vshrl.u32 %v4889_v16, 16  ;;  %v5293_v60 = vshll.u32 %v4889_v16, 16  ;;  %v10460_v16 = vld [vmem:[#allocation40_spill] sm:$0xff] }
 0x36c   : > { %7833 = vmatprep.mubr.bf16.mxu0 %v5211_v54  ;;  %v5253_v47 = vor.u32 %v5252_v37, %v5249_v44  ;;  %v5287_v5 = vrot.slane %v5285_v34, 4  ;;  %v9935_v0 = vadd.f32 %v9758_v20, %v9756_v43  ;;  %v4890_v51 = vrot.slane %v10459_v17, 5 }
 0x36d   : > { %v5292_v40 = vrot.slane %v5290_v52, 3  ;;  %v5295_v15 = vrot.slane %v5293_v60, 4  ;;  %v4891_v13 = vrot.slane %v8434_v10, 5  ;;  %v9940_v55 = vadd.f32 %v9764_v39, %v9760_v42  ;;  %v9942_v24 = vpop.f32.mrb[84].mxu1 }
 0x36e   : > { %v5254_v31 = vsel %vm1544_vm7, %v5245_v63, %v5253_v47  ;;  %v5288_v62 = vor.u32 %v5287_v5, %v5284_v6  ;;  %v5325_v18 = vshrl.u32 %v4890_v51, 16  ;;  %v5328_v33 = vshll.u32 %v4890_v51, 16  ;;  %v9945_v58 = vpop.f32.mrb[85].mxu1  ;;  %v8436_v10 = vld [vmem:[#allocation4 + $0xdc] ss:$0 sps:$4 sm:$0x11]  }
 0x36f   : > { %v5296_v43 = vor.u32 %v5295_v15, %v5292_v40  ;;  %v4892_v20 = vsel %vm1495_vm6, %v4890_v51, %v4891_v13  ;;  %v4893_v52 = vrot.slane %v10460_v16, 5  ;;  %v4894_v23 = vrot.slane %v8435_v35, 5  ;;  %v9949_v54 = vpop.f32.mrb[86].mxu1  ;;  %v8437_v5 = vld [vmem:[#allocation4 + $0xec] ss:$0 sps:$4 sm:$0x11]  }
 0x370   : > { %v5327_v42 = vrot.slane %v5325_v18, 3  ;;  %v5330_v39 = vrot.slane %v5328_v33, 4  ;;  %v5333_v44 = vshrl.u32 %v4892_v20, 16  ;;  %v5336_v37 = vshll.u32 %v4892_v20, 16  ;;  %v9951_v34 = vpop.f32.mrb[87].mxu1 }
 0x371   : > { %v5297_v63 = vsel %vm1544_vm7, %v5288_v62, %v5296_v43  ;;  %v4895_v6 = vsel %vm1495_vm6, %v4893_v52, %v4894_v23  ;;  %v5368_v60 = vshrl.u32 %v4893_v52, 16  ;;  %v5371_v47 = vshll.u32 %v4893_v52, 16 }
 0x372   : > { %v5331_v17 = vor.u32 %v5330_v39, %v5327_v42  ;;  %v5335_v51 = vrot.slane %v5333_v44, 3  ;;  %v5338_v40 = vrot.slane %v5336_v37, 4  ;;  %v5376_v35 = vshrl.u32 %v4895_v6, 16  ;;  %v9955_v15 = vpop.f32.mrb[48].mxu0 }
 0x373   : > { %7834 = vmatmul.mubr.bf16.gmra.mrb[28].mxu0 %v5254_v31  ;;  %v5370_v13 = vrot.slane %v5368_v60, 3  ;;  %v5373_v18 = vrot.slane %v5371_v47, 4  ;;  %v5379_v33 = vshll.u32 %v4895_v6, 16  ;;  %v9959_v20 = vadd.f32 %v9789_v45, %v9784_v36  ;;  %v9961_v62 = vpop.f32.mrb[49].mxu0 }
 0x374   : > { %7837 = vmatprep.mubr.bf16.mxu0 %v5297_v63  ;;  %v5339_v43 = vor.u32 %v5338_v40, %v5335_v51  ;;  %v5378_v16 = vrot.slane %v5376_v35, 3  ;;  %v4896_v52 = vrot.slane %v9724_v22, 5  ;;  %v4897_v23 = vrot.slane %v8436_v10, 5  ;;  %v9964_v42 = vpop.f32.mrb[50].mxu0 }
 0x375   : > { %v5374_v39 = vor.u32 %v5373_v18, %v5370_v13  ;;  %v5381_v44 = vrot.slane %v5379_v33, 4  ;;  %v9968_v31 = vadd.f32 %v9800_v8, %v9798_v57  ;;  %v4899_v37 = vrot.slane %v9752_v14, 5  ;;  %v9971_v36 = vpop.f32.mrb[51].mxu0  ;;  %v8438_v40 = vld [vmem:[#allocation4 + $0xfc] ss:$0 sps:$4 sm:$0x11]  }
 0x376   : > { %v5340_v45 = vsel %vm1544_vm7, %v5331_v17, %v5339_v43  ;;  %v4898_v63 = vsel %vm1495_vm6, %v4896_v52, %v4897_v23  ;;  %v5411_v6 = vshrl.u32 %v4896_v52, 16  ;;  %v5414_v60 = vshll.u32 %v4896_v52, 16  ;;  %v8439_v17 = vld [vmem:[#allocation4 + $0x10c] ss:$0 sps:$4 sm:$0x11]  }
 0x377   : > { %10461 = vst [vmem:[#allocation37_spill] sm:$0xff] %v9968_v31  ;;  %v5382_v22 = vor.u32 %v5381_v44, %v5378_v16  ;;  %v5419_v10 = vshrl.u32 %v4898_v63, 16  ;;  %v5422_v47 = vshll.u32 %v4898_v63, 16  ;;  %v4900_v51 = vrot.slane %v8437_v5, 5 }
 0x378   : > { %v5413_v35 = vrot.slane %v5411_v6, 3  ;;  %v5416_v13 = vrot.slane %v5414_v60, 4  ;;  %v5454_v18 = vshrl.u32 %v4899_v37, 16  ;;  %v5457_v57 = vshll.u32 %v4899_v37, 16 }
 0x379   : > { %v5383_v8 = vsel %vm1544_vm7, %v5374_v39, %v5382_v22  ;;  %v5421_v14 = vrot.slane %v5419_v10, 3  ;;  %v5424_v33 = vrot.slane %v5422_v47, 4  ;;  %v4901_v31 = vsel %vm1495_vm6, %v4899_v37, %v4900_v51  ;;  %v9977_v43 = vpop.f32.mrb[88].mxu1 }
 0x37a   : > { %v5417_v23 = vor.u32 %v5416_v13, %v5413_v35  ;;  %v5456_v52 = vrot.slane %v5454_v18, 3  ;;  %v5459_v16 = vrot.slane %v5457_v57, 4  ;;  %v5462_v44 = vshrl.u32 %v4901_v31, 16  ;;  %v9979_v63 = vpop.f32.mrb[89].mxu1 }
 0x37b   : > { %7838 = vmatmul.mubr.bf16.gmra.mrb[32].mxu0 %v5340_v45  ;;  %v5425_v5 = vor.u32 %v5424_v33, %v5421_v14  ;;  %v5465_v6 = vshll.u32 %v4901_v31, 16  ;;  %v9983_v60 = vadd.f32 %v9819_v30, %v9817_v29  ;;  %v4902_v39 = vrot.slane %v9779_v1, 5  ;;  %v9986_v22 = vpop.f32.mrb[90].mxu1  ;;  %v8446_v30 = vld [vmem:[#allocation10 + $0x28] sm:$0xff]  }
 0x37c   : > { %7841 = vmatprep.mubr.bf16.mxu0 %v5383_v8  ;;  %v5460_v37 = vor.u32 %v5459_v16, %v5456_v52  ;;  %v5464_v10 = vrot.slane %v5462_v44, 3  ;;  %v4903_v47 = vrot.slane %v8438_v40, 5  ;;  %v9990_v51 = vadd.f32 %v9828_v28, %v9821_v38  ;;  %v9992_v35 = vpop.f32.mrb[91].mxu1  ;;  %v8440_v8 = vld [vmem:[#allocation4 + $0x11c] ss:$0 sps:$4 sm:$0x11]   ;;  %7863 = vmatprep.subr.bf16.mxu1 %v8446_v30 }
 0x37d   : > { %v5426_v31 = vsel %vm1544_vm7, %v5417_v23, %v5425_v5  ;;  %v5467_v45 = vrot.slane %v5465_v6, 4  ;;  %v5497_v13 = vshrl.u32 %v4902_v39, 16  ;;  %v5500_v29 = vshll.u32 %v4902_v39, 16  ;;  %7864 = vmatpush3.bf16.msra.mxu1 %v8446_v30 }
 0x37e   : > { %10462 = vst [vmem:[#allocation28_spill] sm:$0xff] %v9990_v51  ;;  %v4904_v1 = vsel %vm1495_vm6, %v4902_v39, %v4903_v47  ;;  %v4905_v18 = vrot.slane %v9809_v59, 5  ;;  %v4906_v57 = vrot.slane %v8439_v17, 5  ;;  %v9999_v40 = vadd.f32 %v9848_v7, %v9846_v56  ;;  %v7519_v38 = vpop.f32.mrb[52].mxu0 }
 0x37f   : > { %v5468_v28 = vor.u32 %v5467_v45, %v5464_v10  ;;  %v5499_v14 = vrot.slane %v5497_v13, 3  ;;  %v5502_v33 = vrot.slane %v5500_v29, 4  ;;  %v5505_v52 = vshrl.u32 %v4904_v1, 16  ;;  %v7520_v23 = vpop.f32.mrb[53].mxu0 }
 0x380   : > { %10463 = vst [vmem:[#allocation38_spill] sm:$0xff] %v9999_v40  ;;  %v5508_v16 = vshll.u32 %v4904_v1, 16  ;;  %v4907_v44 = vsel %vm1495_vm6, %v4905_v18, %v4906_v57  ;;  %v5540_v5 = vshrl.u32 %v4905_v18, 16  ;;  %v5543_v6 = vshll.u32 %v4905_v18, 16  ;;  %v7522_v39 = vpop.f32.mrb[54].mxu0 }
 0x381   : > { %v5469_v59 = vsel %vm1544_vm7, %v5460_v37, %v5468_v28  ;;  %v5503_v17 = vor.u32 %v5502_v33, %v5499_v14  ;;  %v5507_v56 = vrot.slane %v5505_v52, 3  ;;  %v5548_v7 = vshrl.u32 %v4907_v44, 16  ;;  %v7523_v47 = vpop.f32.mrb[55].mxu0 }
 0x382   : > { %v5510_v40 = vrot.slane %v5508_v16, 4  ;;  %v5542_v10 = vrot.slane %v5540_v5, 3  ;;  %v5545_v45 = vrot.slane %v5543_v6, 4  ;;  %v5551_v13 = vshll.u32 %v4907_v44, 16 }
 0x383   : > { %7842 = vmatmul.mubr.bf16.gmra.mrb[36].mxu0 %v5426_v31  ;;  %v5550_v29 = vrot.slane %v5548_v7, 3  ;;  %v4908_v1 = vrot.slane %v9841_v9, 5  ;;  %v4909_v51 = vrot.slane %v8440_v8, 5  ;;  %v10006_v18 = vadd.f32 %v9858_v32, %v9855_v2  ;;  %v7389_v30 = vpop.f32.mrb[92].mxu1 }
 0x384   : > { %7845 = vmatprep.mubr.bf16.mxu0 %v5469_v59  ;;  %v5511_v37 = vor.u32 %v5510_v40, %v5507_v56  ;;  %v5546_v57 = vor.u32 %v5545_v45, %v5542_v10  ;;  %v5553_v28 = vrot.slane %v5551_v13, 4  ;;  %v10010_v14 = vadd.f32 %v9881_v3, %v9875_v12  ;;  %v7390_v33 = vpop.f32.mrb[93].mxu1 }
 0x385   : > { %v4910_v31 = vsel %vm1495_vm6, %v4908_v1, %v4909_v51  ;;  %v5583_v52 = vshrl.u32 %v4908_v1, 16  ;;  %v5586_v16 = vshll.u32 %v4908_v1, 16  ;;  %v10015_v9 = vadd.f32 %v9891_v48, %v9884_v27  ;;  %v7392_v2 = vpop.f32.mrb[94].mxu1 }
 0x386   : > { %v5554_v32 = vor.u32 %v5553_v28, %v5550_v29  ;;  %v5591_v8 = vshrl.u32 %v4910_v31, 16  ;;  %v5594_v44 = vshll.u32 %v4910_v31, 16  ;;  %v7393_v40 = vpop.f32.mrb[95].mxu1  ;;  %v10019_v12 = vadd.f32 %v9916_v50, %v9913_v11  ;;  %v10468_v31 = vld [vmem:[#allocation45_spill] sm:$0xff] }
 0x387   : > { %v5585_v5 = vrot.slane %v5583_v52, 3  ;;  %v5588_v6 = vrot.slane %v5586_v16, 4  ;;  %v10023_v3 = vadd.f32 %v9921_v53, %v9919_v46  ;;  %v5512_v51 = vsel %vm1544_vm7, %v5503_v17, %v5511_v37 }
 0x388   : > { %v5593_v59 = vrot.slane %v5591_v8, 3  ;;  %v5596_v27 = vrot.slane %v5594_v44, 4  ;;  %v7379_v48 = vadd.f32 %v9945_v58, %v9942_v24  ;;  %v5555_v56 = vsel %vm1544_vm7, %v5546_v57, %v5554_v32  ;;  %v10467_v57 = vld [vmem:[#allocation44_spill] sm:$0xff] }
 0x389   : > { %v7382_v7 = vadd.f32 %v9951_v34, %v9949_v54  ;;  %v10033_v11 = vadd.f32 %v9961_v62, %v9955_v15  ;;  %v10037_v50 = vadd.f32 %v9971_v36, %v9964_v42  ;;  %v5589_v46 = vor.u32 %v5588_v6, %v5585_v5  ;;  %v10464_v54 = vld [vmem:[#allocation41_spill] sm:$0xff]  ;;  %v8447_v44 = vld [vmem:[#allocation10 + $0x30] sm:$0xff]  }
 0x38a   : > { %v10040_v53 = vadd.f32 %v7379_v48, %v9716_v19  ;;  %v7385_v24 = vadd.f32 %v9979_v63, %v9977_v43  ;;  %v7388_v58 = vadd.f32 %v9992_v35, %v9986_v22  ;;  %v7525_v17 = vpop.f32.mrb[56].mxu0  ;;  %v10049_v15 = vadd.f32 %v7520_v23, %v7519_v38  ;;  %v10465_v22 = vld [vmem:[#allocation42_spill] sm:$0xff]  ;;  %v10466_v38 = vld [vmem:[#allocation43_spill] sm:$0xff]  ;;  %7865 = vmatprep.subr.bf16.mxu1 %v8447_v44 }
 0x38b   : > { %7846 = vmatmul.mubr.bf16.gmra.mrb[40].mxu0 %v5512_v51  ;;  %v10047_v34 = vadd.f32 %v7382_v7, %v10464_v54  ;;  %v10051_v62 = vadd.f32 %v7523_v47, %v7522_v39  ;;  %v7391_v42 = vadd.f32 %v7390_v33, %v7389_v30  ;;  %v7526_v36 = vpop.f32.mrb[57].mxu0  ;;  %v5597_v19 = vor.u32 %v5596_v27, %v5593_v59 }
 0x38c   : > { %7849 = vmatprep.mubr.bf16.mxu0 %v5555_v56  ;;  %v7917_v10 = vadd.f32 %v7385_v24, %v9742_v49  ;;  %v7923_v43 = vadd.f32 %v7388_v58, %v9749_v41  ;;  %v7394_v63 = vadd.f32 %v7393_v40, %v7392_v2  ;;  %v7528_v45 = vpop.f32.mrb[58].mxu0  ;;  %v10058_v13 = vadd.f32 %v7526_v36, %v7525_v17 }
 0x38d   : > { %v10056_v35 = vadd.f32 %v7391_v42, %v10465_v22  ;;  %v7529_v29 = vpop.f32.mrb[59].mxu0  ;;  %v5598_v1 = vsel %vm1544_vm7, %v5589_v46, %v5597_v19  ;;  %7866 = vmatpush3.bf16.msra.mxu1 %v8447_v44 }
 0x38e   : > { %v10061_v23 = vadd.f32 %v7394_v63, %v10466_v38  ;;  %v10063_v39 = vadd.f32 %v7529_v29, %v7528_v45  ;;  %v8448_v38 = vld [vmem:[#allocation10 + $0x38] sm:$0xff]  }
 0x38f   : > { %v7395_v47 = vpop.f32.mrb[96].mxu1  ;;  %7867 = vmatprep.subr.bf16.mxu1 %v8448_v38 }
 0x390   : > { %v7396_v30 = vpop.f32.mrb[97].mxu1 }
 0x391   : > { %v7397_v49 = vadd.f32 %v7396_v30, %v7395_v47  ;;  %v7398_v37 = vpop.f32.mrb[98].mxu1  ;;  %7868 = vmatpush3.bf16.msra.mxu1 %v8448_v38 }
 0x392   : > { %v7399_v41 = vpop.f32.mrb[99].mxu1 }
 0x393   : > { %7850 = vmatmul.mubr.bf16.gmra.mrb[44].mxu0 %v5598_v1  ;;  %v7929_v28 = vadd.f32 %v7397_v49, %v10467_v57  ;;  %v7400_v33 = vadd.f32 %v7399_v41, %v7398_v37  ;;  %v10073_v57 = vadd.f32 %v7917_v10, %v10049_v15  ;;  %v10085_v15 = vadd.f32 %v10047_v34, %v10037_v50 }
 0x394   : > { %v10098_v50 = vadd.f32 %v10061_v23, %v10063_v39 }
 0x395   : > { %v7935_v52 = vadd.f32 %v7400_v33, %v10468_v31  ;;  %v7531_v16 = vpop.f32.mrb[60].mxu0 }
 0x396   : > { %v7532_v2 = vpop.f32.mrb[61].mxu0 }
 0x397   : > { %v7533_v32 = vadd.f32 %v7532_v2, %v7531_v16  ;;  %v7534_v8 = vpop.f32.mrb[62].mxu0  ;;  %v10077_v2 = vadd.f32 %v10040_v53, %v10033_v11 }
 0x398   : > { %v7535_v40 = vpop.f32.mrb[63].mxu0 }
 0x399   : > { %v7536_v5 = vadd.f32 %v7535_v40, %v7534_v8  ;;  %v10080_v8 = vadd.f32 %v7923_v43, %v10051_v62  ;;  %v10087_v10 = vadd.f32 %v7929_v28, %v7533_v32  ;;  %v10092_v62 = vadd.f32 %v10056_v35, %v10058_v13  ;;  %v10473_v13 = vld [vmem:[#allocation35_spill] sm:$0xff] }
 0x39c   : > { %v7401_v6 = vpop.f32.mrb[100].mxu1 }
 0x39d   : > { %v7402_v51 = vpop.f32.mrb[101].mxu1 }
 0x39e   : > { %v7403_v59 = vadd.f32 %v7402_v51, %v7401_v6  ;;  %v7404_v27 = vpop.f32.mrb[102].mxu1  ;;  %v10470_v51 = vld [vmem:[#allocation47_spill] sm:$0xff] }
 0x39f   : > { %v7405_v48 = vpop.f32.mrb[103].mxu1 }
 0x3a0   : > { %v7944_v56 = vadd.f32 %v7403_v59, %v9825_v61  ;;  %v7406_v7 = vadd.f32 %v7405_v48, %v7404_v27  ;;  %v10469_v61 = vld [vmem:[#allocation46_spill] sm:$0xff]  ;;  %v10471_v48 = vld [vmem:[#allocation33_spill] sm:$0xff] }
 0x3a1   : > { %v7537_v46 = vpop.f32.mrb[64].mxu0 }
 0x3a2   : > { %v7950_v24 = vadd.f32 %v7406_v7, %v9835_v26  ;;  %v7538_v58 = vpop.f32.mrb[65].mxu0 }
 0x3a3   : > { %v7539_v17 = vadd.f32 %v7538_v58, %v7537_v46  ;;  %v7540_v54 = vpop.f32.mrb[66].mxu0 }
 0x3a4   : > { %v7541_v42 = vpop.f32.mrb[67].mxu0 }
 0x3a5   : > { %v7542_v36 = vadd.f32 %v7541_v42, %v7540_v54  ;;  %v10094_v54 = vadd.f32 %v7935_v52, %v7536_v5  ;;  %v10103_v35 = vadd.f32 %v7944_v56, %v7539_v17 }
 0x3a7   : > { %v7407_v19 = vpop.f32.mrb[104].mxu1  ;;  %v10108_v23 = vadd.f32 %v7950_v24, %v7542_v36 }
 0x3a8   : > { %v7408_v63 = vpop.f32.mrb[105].mxu1 }
 0x3a9   : > { %v7409_v45 = vadd.f32 %v7408_v63, %v7407_v19  ;;  %v7410_v22 = vpop.f32.mrb[106].mxu1 }
 0x3aa   : > { %v7411_v29 = vpop.f32.mrb[107].mxu1 }
 0x3ab   : > { %v7941_v47 = vadd.f32 %v7409_v45, %v9839_v4  ;;  %v7412_v1 = vadd.f32 %v7411_v29, %v7410_v22  ;;  %v10472_v22 = vld [vmem:[#allocation26_spill] sm:$0xff] }
 0x3ac   : > { %v7543_v30 = vpop.f32.mrb[68].mxu0 }
 0x3ad   : > { %v7947_v49 = vadd.f32 %v7412_v1, %v10469_v61  ;;  %v7544_v37 = vpop.f32.mrb[69].mxu0 }
 0x3ae   : > { %v7545_v26 = vadd.f32 %v7544_v37, %v7543_v30  ;;  %v7546_v41 = vpop.f32.mrb[70].mxu0 }
 0x3af   : > { %v7547_v33 = vpop.f32.mrb[71].mxu0 }
 0x3b0   : > { %v7548_v31 = vadd.f32 %v7547_v33, %v7546_v41  ;;  %v10100_v28 = vadd.f32 %v7941_v47, %v7545_v26 }
 0x3b2   : > { %v10106_v1 = vadd.f32 %v7947_v49, %v7548_v31 }
 0x3b3   : > { %v7413_v16 = vpop.f32.mrb[108].mxu1 }
 0x3b4   : > { %v7414_v4 = vpop.f32.mrb[109].mxu1 }
 0x3b5   : > { %v7415_v44 = vadd.f32 %v7414_v4, %v7413_v16  ;;  %v7416_v40 = vpop.f32.mrb[110].mxu1 }
 0x3b6   : > { %v7417_v6 = vpop.f32.mrb[111].mxu1 }
 0x3b7   : > { %v7956_v59 = vadd.f32 %v7415_v44, %v10470_v51  ;;  %v7418_v27 = vadd.f32 %v7417_v6, %v7416_v40 }
 0x3b9   : > { %v7962_v7 = vadd.f32 %v7418_v27, %v10471_v48  ;;  %v7549_v11 = vpop.f32.mrb[72].mxu0 }
 0x3ba   : > { %v7550_v53 = vpop.f32.mrb[73].mxu0 }
 0x3bb   : > { %v7551_v46 = vadd.f32 %v7550_v53, %v7549_v11  ;;  %v7552_v58 = vpop.f32.mrb[74].mxu0 }
 0x3bc   : > { %v7553_v43 = vpop.f32.mrb[75].mxu0 }
 0x3bd   : > { %v7554_v42 = vadd.f32 %v7553_v43, %v7552_v58  ;;  %v10112_v16 = vadd.f32 %v7956_v59, %v7551_v46 }
 0x3be   : > { %v7419_v34 = vpop.f32.mrb[112].mxu1 }
 0x3bf   : > { %v7420_v32 = vpop.f32.mrb[113].mxu1  ;;  %v10116_v49 = vadd.f32 %v7962_v7, %v7554_v42 }
 0x3c0   : > { %v7421_v19 = vadd.f32 %v7420_v32, %v7419_v34  ;;  %v7422_v63 = vpop.f32.mrb[114].mxu1  ;;  %v10474_v34 = vld [vmem:[#allocation27_spill] sm:$0xff] }
 0x3c1   : > { %v7423_v45 = vpop.f32.mrb[115].mxu1 }
 0x3c2   : > { %v7953_v29 = vadd.f32 %v7421_v19, %v10472_v22  ;;  %v7424_v38 = vadd.f32 %v7423_v45, %v7422_v63  ;;  %v10475_v63 = vld [vmem:[#allocation36_spill] sm:$0xff] }
 0x3c4   : > { %v7959_v52 = vadd.f32 %v7424_v38, %v10473_v13  ;;  %v7555_v5 = vpop.f32.mrb[76].mxu0 }
 0x3c5   : > { %v7556_v30 = vpop.f32.mrb[77].mxu0 }
 0x3c6   : > { %v7557_v39 = vadd.f32 %v7556_v30, %v7555_v5  ;;  %v7558_v47 = vpop.f32.mrb[78].mxu0 }
 0x3c7   : > { %v7559_v61 = vpop.f32.mrb[79].mxu0 }
 0x3c8   : > { %v7560_v37 = vadd.f32 %v7559_v61, %v7558_v47  ;;  %v10110_v26 = vadd.f32 %v7953_v29, %v7557_v39 }
 0x3ca   : > { %v7425_v41 = vpop.f32.mrb[116].mxu1  ;;  %v10114_v4 = vadd.f32 %v7959_v52, %v7560_v37 }
 0x3cb   : > { %v7426_v33 = vpop.f32.mrb[117].mxu1 }
 0x3cc   : > { %v7427_v56 = vadd.f32 %v7426_v33, %v7425_v41  ;;  %v7428_v17 = vpop.f32.mrb[118].mxu1 }
 0x3cd   : > { %v7429_v44 = vpop.f32.mrb[119].mxu1 }
 0x3ce   : > { %v7968_v24 = vadd.f32 %v7427_v56, %v9899_v21  ;;  %v7430_v36 = vadd.f32 %v7429_v44, %v7428_v17 }
 0x3cf   : > { %v7561_v31 = vpop.f32.mrb[80].mxu0 }
 0x3d0   : > { %v7974_v40 = vadd.f32 %v7430_v36, %v9904_v25  ;;  %v7562_v6 = vpop.f32.mrb[81].mxu0 }
 0x3d1   : > { %v7563_v51 = vadd.f32 %v7562_v6, %v7561_v31  ;;  %v7564_v27 = vpop.f32.mrb[82].mxu0 }
 0x3d2   : > { %v7565_v48 = vpop.f32.mrb[83].mxu0 }
 0x3d3   : > { %v7566_v11 = vadd.f32 %v7565_v48, %v7564_v27  ;;  %v10120_v59 = vadd.f32 %v7968_v24, %v7563_v51 }
 0x3d5   : > { %v10122_v53 = vadd.f32 %v7974_v40, %v7566_v11 }
 0x3d6   : > { %v7431_v46 = vpop.f32.mrb[120].mxu1 }
 0x3d7   : > { %v7432_v58 = vpop.f32.mrb[121].mxu1 }
 0x3d8   : > { %v7433_v43 = vadd.f32 %v7432_v58, %v7431_v46  ;;  %v7434_v7 = vpop.f32.mrb[122].mxu1 }
 0x3d9   : > { %v7435_v42 = vpop.f32.mrb[123].mxu1 }
 0x3da   : > { %v7965_v21 = vadd.f32 %v7433_v43, %v10474_v34  ;;  %v7436_v32 = vadd.f32 %v7435_v42, %v7434_v7  ;;  %v10476_v7 = vld [vmem:[#allocation37_spill] sm:$0xff] }
 0x3db   : > { %v7567_v19 = vpop.f32.mrb[84].mxu0 }
 0x3dc   : > { %v7971_v25 = vadd.f32 %v7436_v32, %v10475_v63  ;;  %v7568_v45 = vpop.f32.mrb[85].mxu0 }
 0x3dd   : > { %v7569_v22 = vadd.f32 %v7568_v45, %v7567_v19  ;;  %v7570_v29 = vpop.f32.mrb[86].mxu0 }
 0x3de   : > { %v7571_v38 = vpop.f32.mrb[87].mxu0 }
 0x3df   : > { %v7572_v13 = vadd.f32 %v7571_v38, %v7570_v29  ;;  %v10126_v52 = vadd.f32 %v7965_v21, %v7569_v22 }
 0x3e1   : > { %v7437_v5 = vpop.f32.mrb[124].mxu1  ;;  %v10128_v30 = vadd.f32 %v7971_v25, %v7572_v13 }
 0x3e2   : > { %v7438_v39 = vpop.f32.mrb[125].mxu1 }
 0x3e3   : > { %v7439_v47 = vadd.f32 %v7438_v39, %v7437_v5  ;;  %v7440_v61 = vpop.f32.mrb[126].mxu1 }
 0x3e4   : > { %v7441_v37 = vpop.f32.mrb[127].mxu1 }
 0x3e5   : > { %v7980_v41 = vadd.f32 %v7439_v47, %v9935_v0  ;;  %v7442_v33 = vadd.f32 %v7441_v37, %v7440_v61  ;;  %v10477_v47 = vld [vmem:[#allocation28_spill] sm:$0xff] }
 0x3e7   : > { %v7986_v56 = vadd.f32 %v7442_v33, %v9940_v55 }
 0x3e8   : > { %v7573_v17 = vpop.f32.mrb[88].mxu0 }
 0x3e9   : > { %v7574_v44 = vpop.f32.mrb[89].mxu0 }
 0x3ea   : > { %v7575_v24 = vadd.f32 %v7574_v44, %v7573_v17  ;;  %v7576_v36 = vpop.f32.mrb[90].mxu0 }
 0x3eb   : > { %v7577_v31 = vpop.f32.mrb[91].mxu0 }
 0x3ec   : > { %v7578_v40 = vadd.f32 %v7577_v31, %v7576_v36  ;;  %v10132_v6 = vadd.f32 %v7980_v41, %v7575_v24 }
 0x3ee   : > { %v7443_v51 = vpop.f32.mrb[128].mxu1  ;;  %v10134_v27 = vadd.f32 %v7986_v56, %v7578_v40 }
 0x3ef   : > { %v7444_v48 = vpop.f32.mrb[129].mxu1 }
 0x3f0   : > { %v7445_v11 = vadd.f32 %v7444_v48, %v7443_v51  ;;  %v7446_v46 = vpop.f32.mrb[130].mxu1 }
 0x3f1   : > { %v7447_v58 = vpop.f32.mrb[131].mxu1 }
 0x3f2   : > { %v7977_v0 = vadd.f32 %v7445_v11, %v9959_v20  ;;  %v7448_v43 = vadd.f32 %v7447_v58, %v7446_v46  ;;  %v10478_v46 = vld [vmem:[#allocation38_spill] sm:$0xff] }
 0x3f4   : > { %v7983_v55 = vadd.f32 %v7448_v43, %v10476_v7 }
 0x3f5   : > { %v7579_v42 = vpop.f32.mrb[92].mxu0 }
 0x3f6   : > { %v7580_v34 = vpop.f32.mrb[93].mxu0 }
 0x3f7   : > { %v7581_v21 = vadd.f32 %v7580_v34, %v7579_v42  ;;  %v7582_v32 = vpop.f32.mrb[94].mxu0 }
 0x3f8   : > { %v7583_v19 = vpop.f32.mrb[95].mxu0 }
 0x3f9   : > { %v7449_v63 = vpop.f32.mrb[132].mxu1  ;;  %v7584_v25 = vadd.f32 %v7583_v19, %v7582_v32  ;;  %v10138_v45 = vadd.f32 %v7977_v0, %v7581_v21 }
 0x3fa   : > { %v7450_v22 = vpop.f32.mrb[133].mxu1 }
 0x3fb   : > { %v7451_v29 = vadd.f32 %v7450_v22, %v7449_v63  ;;  %v7452_v38 = vpop.f32.mrb[134].mxu1  ;;  %v10140_v13 = vadd.f32 %v7983_v55, %v7584_v25 }
 0x3fc   : > { %v7453_v5 = vpop.f32.mrb[135].mxu1 }
 0x3fd   : > { %v7992_v20 = vadd.f32 %v7451_v29, %v9983_v60  ;;  %v7454_v39 = vadd.f32 %v7453_v5, %v7452_v38 }
 0x3ff   : > { %v7998_v61 = vadd.f32 %v7454_v39, %v10477_v47 }
 0x400   : > { %v7585_v37 = vpop.f32.mrb[96].mxu0 }
 0x401   : > { %v7586_v41 = vpop.f32.mrb[97].mxu0 }
 0x402   : > { %v7587_v33 = vadd.f32 %v7586_v41, %v7585_v37  ;;  %v7588_v56 = vpop.f32.mrb[98].mxu0 }
 0x403   : > { %v7589_v17 = vpop.f32.mrb[99].mxu0 }
 0x404   : > { %v7590_v44 = vadd.f32 %v7589_v17, %v7588_v56  ;;  %v10144_v24 = vadd.f32 %v7992_v20, %v7587_v33 }
 0x406   : > { %v7455_v36 = vpop.f32.mrb[136].mxu1  ;;  %v10146_v31 = vadd.f32 %v7998_v61, %v7590_v44 }
 0x407   : > { %v7456_v40 = vpop.f32.mrb[137].mxu1 }
 0x408   : > { %v7457_v51 = vadd.f32 %v7456_v40, %v7455_v36  ;;  %v7458_v48 = vpop.f32.mrb[138].mxu1 }
 0x409   : > { %v7459_v11 = vpop.f32.mrb[139].mxu1 }
 0x40a   : > { %v7989_v60 = vadd.f32 %v7457_v51, %v10478_v46  ;;  %v7460_v58 = vadd.f32 %v7459_v11, %v7458_v48 }
 0x40c   : > { %v7995_v0 = vadd.f32 %v7460_v58, %v10006_v18 }
 0x40d   : > { %v7591_v43 = vpop.f32.mrb[100].mxu0 }
 0x40e   : > { %v7592_v7 = vpop.f32.mrb[101].mxu0 }
 0x40f   : > { %v7593_v55 = vadd.f32 %v7592_v7, %v7591_v43  ;;  %v7594_v42 = vpop.f32.mrb[102].mxu0 }
 0x410   : > { %v7595_v34 = vpop.f32.mrb[103].mxu0 }
 0x411   : > { %v7596_v21 = vadd.f32 %v7595_v34, %v7594_v42  ;;  %v10150_v32 = vadd.f32 %v7989_v60, %v7593_v55 }
 0x413   : > { %v7461_v19 = vpop.f32.mrb[140].mxu1  ;;  %v10152_v63 = vadd.f32 %v7995_v0, %v7596_v21  ;;  %v10169_v21 = vld [vmem:[%s10365_s4] ss:$0 sm:$0xff] }
 0x414   : > { %v7462_v25 = vpop.f32.mrb[141].mxu1 }
 0x415   : > { %v7463_v22 = vadd.f32 %v7462_v25, %v7461_v19  ;;  %v7464_v29 = vpop.f32.mrb[142].mxu1 }
 0x416   : > { %v7465_v38 = vpop.f32.mrb[143].mxu1 }
 0x417   : > { %v8004_v5 = vadd.f32 %v7463_v22, %v10010_v14  ;;  %v7466_v20 = vadd.f32 %v7465_v38, %v7464_v29 }
 0x419   : > { %v8010_v18 = vadd.f32 %v7466_v20, %v10015_v9  ;;  %v7597_v39 = vpop.f32.mrb[104].mxu0 }
 0x41a   : > { %v7598_v47 = vpop.f32.mrb[105].mxu0 }
 0x41b   : > { %v7599_v61 = vadd.f32 %v7598_v47, %v7597_v39  ;;  %v7600_v37 = vpop.f32.mrb[106].mxu0 }
 0x41c   : > { %v7601_v41 = vpop.f32.mrb[107].mxu0 }
 0x41d   : > { %v7602_v33 = vadd.f32 %v7601_v41, %v7600_v37  ;;  %v10156_v56 = vadd.f32 %v8004_v5, %v7599_v61 }
 0x41e   : > { %v7467_v17 = vpop.f32.mrb[144].mxu1 }
 0x41f   : > { %v7468_v44 = vpop.f32.mrb[145].mxu1  ;;  %v10158_v36 = vadd.f32 %v8010_v18, %v7602_v33 }
 0x420   : > { %v7469_v40 = vadd.f32 %v7468_v44, %v7467_v17  ;;  %v7470_v51 = vpop.f32.mrb[146].mxu1 }
 0x421   : > { %v7471_v48 = vpop.f32.mrb[147].mxu1 }
 0x422   : > { %v8001_v14 = vadd.f32 %v7469_v40, %v10019_v12  ;;  %v7472_v11 = vadd.f32 %v7471_v48, %v7470_v51 }
 0x424   : > { %v8007_v9 = vadd.f32 %v7472_v11, %v10023_v3 }
 0x426   : > { %v7603_v46 = vpop.f32.mrb[108].mxu0 }
 0x427   : > { %v7604_v60 = vpop.f32.mrb[109].mxu0 }
 0x428   : > { %v7605_v58 = vadd.f32 %v7604_v60, %v7603_v46  ;;  %v7606_v0 = vpop.f32.mrb[110].mxu0 }
 0x429   : > { %v7607_v43 = vpop.f32.mrb[111].mxu0 }
 0x42a   : > { %v7608_v7 = vadd.f32 %v7607_v43, %v7606_v0  ;;  %v10162_v55 = vadd.f32 %v8001_v14, %v7605_v58 }
 0x42c   : > { %v10164_v42 = vadd.f32 %v8007_v9, %v7608_v7 }
 0x42e   : > { %v7823_v34 = vpop.f32.mrb[16].mxu0 }
 0x42f   : > { %v7919_v12 = vadd.f32 %v10073_v57, %v7823_v34  ;;  %v6034_v19 = vpop.f32.mrb[17].mxu0 }
 0x430   : > { %v7922_v3 = vadd.f32 %v10077_v2, %v6034_v19  ;;  %v7824_v25 = vpop.f32.mrb[18].mxu0 }
 0x431   : > { %v6202_v22 = vadd.f32 %v7919_v12, %v10169_v21  ;;  %v7925_v29 = vadd.f32 %v10080_v8, %v7824_v25  ;;  %v6037_v38 = vpop.f32.mrb[19].mxu0 }
 0x432   : > { %v6200_v5 = vadd.f32 %v7922_v3, %v10169_v21  ;;  %v7928_v20 = vadd.f32 %v10085_v15, %v6037_v38 }
 0x433   : > { %v6203_v18 = vadd.f32 %v7925_v29, %v10169_v21  ;;  %v6234_v47 = vmax.f32 %v6202_v22, 0.0 }
 0x434   : > { %v6201_v39 = vadd.f32 %v7928_v20, %v10169_v21  ;;  %v6232_v57 = vmax.f32 %v6200_v5, 0.0 }
 0x435   : > { %v6235_v61 = vmax.f32 %v6203_v18, 0.0 }
 0x436   : > { %v6233_v37 = vmax.f32 %v6201_v39, 0.0  ;;  %v7827_v41 = vpop.f32.mrb[20].mxu0 }
 0x437   : > { %v6265_v2 = vpack.c.bf16 %v6235_v61, %v6234_v47  ;;  %v7931_v33 = vadd.f32 %v10087_v10, %v7827_v41  ;;  %v6050_v17 = vpop.f32.mrb[21].mxu0 }
 0x438   : > { %v7934_v8 = vadd.f32 %v10092_v62, %v6050_v17  ;;  %v7828_v44 = vpop.f32.mrb[22].mxu0  ;;  %v6264_v40 = vpack.c.bf16 %v6233_v37, %v6232_v57 }
 0x439   : > { %v6206_v51 = vadd.f32 %v7931_v33, %v10169_v21  ;;  %v7937_v15 = vadd.f32 %v10094_v54, %v7828_v44  ;;  %v6053_v48 = vpop.f32.mrb[23].mxu0 }
 0x43a   : > { %v6204_v14 = vadd.f32 %v7934_v8, %v10169_v21  ;;  %v7940_v11 = vadd.f32 %v10098_v50, %v6053_v48  ;;  %7869 = vmatprep.mubr.bf16.mxu1 %v6264_v40 }
 0x43b   : > { %v6207_v9 = vadd.f32 %v7937_v15, %v10169_v21  ;;  %7870 = vmatmul.mubr.bf16.vlgmr.msra.gmra.mrb[148].mxu1 %v6265_v2  ;;  %v6238_v46 = vmax.f32 %v6206_v51, 0.0 }
 0x43c   : > { %v6205_v10 = vadd.f32 %v7940_v11, %v10169_v21  ;;  %v6236_v62 = vmax.f32 %v6204_v14, 0.0 }
 0x43d   : > { %v6239_v60 = vmax.f32 %v6207_v9, 0.0 }
 0x43e   : > { %v6237_v58 = vmax.f32 %v6205_v10, 0.0  ;;  %v7831_v0 = vpop.f32.mrb[24].mxu0 }
 0x43f   : > { %v7943_v43 = vadd.f32 %v10100_v28, %v7831_v0  ;;  %v6066_v7 = vpop.f32.mrb[25].mxu0  ;;  %v6267_v54 = vpack.c.bf16 %v6239_v60, %v6238_v46 }
 0x440   : > { %v7946_v34 = vadd.f32 %v10103_v35, %v6066_v7  ;;  %v7832_v12 = vpop.f32.mrb[26].mxu0  ;;  %v6266_v19 = vpack.c.bf16 %v6237_v58, %v6236_v62 }
 0x441   : > { %v6210_v50 = vadd.f32 %v7943_v43, %v10169_v21  ;;  %v7949_v3 = vadd.f32 %v10106_v1, %v7832_v12  ;;  %v6069_v25 = vpop.f32.mrb[27].mxu0 }
 0x442   : > { %v6208_v22 = vadd.f32 %v7946_v34, %v10169_v21  ;;  %v7952_v29 = vadd.f32 %v10108_v23, %v6069_v25  ;;  %7873 = vmatprep.mubr.bf16.mxu1 %v6266_v19 }
 0x443   : > { %v6211_v38 = vadd.f32 %v7949_v3, %v10169_v21  ;;  %7874 = vmatmul.mubr.bf16.gmra.mrb[152].mxu1 %v6267_v54  ;;  %v6242_v5 = vmax.f32 %v6210_v50, 0.0 }
 0x444   : > { %v6209_v28 = vadd.f32 %v7952_v29, %v10169_v21  ;;  %v6240_v35 = vmax.f32 %v6208_v22, 0.0 }
 0x445   : > { %v6243_v20 = vmax.f32 %v6211_v38, 0.0 }
 0x446   : > { %v6241_v18 = vmax.f32 %v6209_v28, 0.0  ;;  %v7835_v39 = vpop.f32.mrb[28].mxu0 }
 0x447   : > { %v7955_v47 = vadd.f32 %v10110_v26, %v7835_v39  ;;  %v6082_v61 = vpop.f32.mrb[29].mxu0  ;;  %v6269_v1 = vpack.c.bf16 %v6243_v20, %v6242_v5 }
 0x448   : > { %v7958_v57 = vadd.f32 %v10112_v16, %v6082_v61  ;;  %v7836_v37 = vpop.f32.mrb[30].mxu0  ;;  %v6268_v41 = vpack.c.bf16 %v6241_v18, %v6240_v35 }
 0x449   : > { %v6214_v23 = vadd.f32 %v7955_v47, %v10169_v21  ;;  %v7961_v2 = vadd.f32 %v10114_v4, %v7836_v37  ;;  %v6085_v33 = vpop.f32.mrb[31].mxu0 }
 0x44a   : > { %v6212_v17 = vadd.f32 %v7958_v57, %v10169_v21  ;;  %v7964_v8 = vadd.f32 %v10116_v49, %v6085_v33  ;;  %7877 = vmatprep.mubr.bf16.mxu1 %v6268_v41 }
 0x44b   : > { %v6215_v44 = vadd.f32 %v7961_v2, %v10169_v21  ;;  %7878 = vmatmul.mubr.bf16.gmra.mrb[156].mxu1 %v6269_v1  ;;  %v6246_v40 = vmax.f32 %v6214_v23, 0.0 }
 0x44c   : > { %v6213_v26 = vadd.f32 %v7964_v8, %v10169_v21  ;;  %v6244_v16 = vmax.f32 %v6212_v17, 0.0 }
 0x44d   : > { %v6247_v51 = vmax.f32 %v6215_v44, 0.0 }
 0x44e   : > { %v6245_v15 = vmax.f32 %v6213_v26, 0.0  ;;  %v7839_v48 = vpop.f32.mrb[32].mxu0 }
 0x44f   : > { %v7967_v14 = vadd.f32 %v10126_v52, %v7839_v48  ;;  %v6098_v11 = vpop.f32.mrb[33].mxu0  ;;  %v6271_v4 = vpack.c.bf16 %v6247_v51, %v6246_v40 }
 0x450   : > { %v7970_v9 = vadd.f32 %v10120_v59, %v6098_v11  ;;  %v7840_v10 = vpop.f32.mrb[34].mxu0  ;;  %v6270_v46 = vpack.c.bf16 %v6245_v15, %v6244_v16 }
 0x451   : > { %v6218_v49 = vadd.f32 %v7967_v14, %v10169_v21  ;;  %v7973_v60 = vadd.f32 %v10128_v30, %v7840_v10  ;;  %v6101_v62 = vpop.f32.mrb[35].mxu0 }
 0x452   : > { %v6216_v58 = vadd.f32 %v7970_v9, %v10169_v21  ;;  %v7976_v0 = vadd.f32 %v10122_v53, %v6101_v62  ;;  %7881 = vmatprep.mubr.bf16.mxu1 %v6270_v46 }
 0x453   : > { %v6219_v43 = vadd.f32 %v7973_v60, %v10169_v21  ;;  %7882 = vmatmul.mubr.bf16.gmra.mrb[160].mxu1 %v6271_v4  ;;  %v6250_v7 = vmax.f32 %v6218_v49, 0.0 }
 0x454   : > { %v6217_v52 = vadd.f32 %v7976_v0, %v10169_v21  ;;  %v6248_v59 = vmax.f32 %v6216_v58, 0.0 }
 0x455   : > { %v6251_v54 = vmax.f32 %v6219_v43, 0.0 }
 0x456   : > { %v6249_v34 = vmax.f32 %v6217_v52, 0.0  ;;  %v7843_v12 = vpop.f32.mrb[36].mxu0  ;;  %v7142_v52 = vld [vmem:[#allocation2 + $0x8] sm:$0xff] }
 0x457   : > { %v7979_v19 = vadd.f32 %v10138_v45, %v7843_v12  ;;  %v6114_v50 = vpop.f32.mrb[37].mxu0  ;;  %v6273_v30 = vpack.c.bf16 %v6251_v54, %v6250_v7 }
 0x458   : > { %v7982_v3 = vadd.f32 %v10132_v6, %v6114_v50  ;;  %v7844_v25 = vpop.f32.mrb[38].mxu0  ;;  %v6272_v22 = vpack.c.bf16 %v6249_v34, %v6248_v59  ;;  %v6531_v59 = vunpack.c.l.bf16 %v7142_v52 }
 0x459   : > { %v6222_v53 = vadd.f32 %v7979_v19, %v10169_v21  ;;  %v7985_v29 = vadd.f32 %v10140_v13, %v7844_v25  ;;  %v6117_v38 = vpop.f32.mrb[39].mxu0 }
 0x45a   : > { %v6220_v28 = vadd.f32 %v7982_v3, %v10169_v21  ;;  %v7988_v5 = vadd.f32 %v10134_v27, %v6117_v38  ;;  %7885 = vmatprep.mubr.bf16.mxu1 %v6272_v22  ;;  %v7145_v38 = vld [vmem:[#allocation2 + $0x20] sm:$0xff] }
 0x45b   : > { %v6223_v20 = vadd.f32 %v7985_v29, %v10169_v21  ;;  %7886 = vmatmul.mubr.bf16.gmra.mrb[164].mxu1 %v6273_v30  ;;  %v6254_v35 = vmax.f32 %v6222_v53, 0.0  ;;  %v6532_v30 = vunpack.c.h.bf16 %v7142_v52 }
 0x45c   : > { %v6221_v45 = vadd.f32 %v7988_v5, %v10169_v21  ;;  %v6252_v6 = vmax.f32 %v6220_v28, 0.0 }
 0x45d   : > { %v6255_v18 = vmax.f32 %v6223_v20, 0.0  ;;  %v7144_v20 = vld [vmem:[#allocation2 + $0x18] sm:$0xff] }
 0x45e   : > { %v6253_v39 = vmax.f32 %v6221_v45, 0.0  ;;  %v7847_v47 = vpop.f32.mrb[40].mxu0 }
 0x45f   : > { %v7991_v61 = vadd.f32 %v10150_v32, %v7847_v47  ;;  %v6130_v1 = vpop.f32.mrb[41].mxu0  ;;  %v6275_v13 = vpack.c.bf16 %v6255_v18, %v6254_v35 }
 0x460   : > { %v7994_v57 = vadd.f32 %v10144_v24, %v6130_v1  ;;  %v7848_v37 = vpop.f32.mrb[42].mxu0  ;;  %v6274_v41 = vpack.c.bf16 %v6253_v39, %v6252_v6  ;;  %v6537_v6 = vunpack.c.l.bf16 %v7145_v38 }
 0x461   : > { %v6226_v27 = vadd.f32 %v7991_v61, %v10169_v21  ;;  %v7997_v23 = vadd.f32 %v10152_v63, %v7848_v37  ;;  %v6133_v2 = vpop.f32.mrb[43].mxu0  ;;  %v6535_v61 = vunpack.c.l.bf16 %v7144_v20 }
 0x462   : > { %v6224_v33 = vadd.f32 %v7994_v57, %v10169_v21  ;;  %v8000_v17 = vadd.f32 %v10146_v31, %v6133_v2  ;;  %7889 = vmatprep.mubr.bf16.mxu1 %v6274_v41  ;;  %v6538_v57 = vunpack.c.h.bf16 %v7145_v38 }
 0x463   : > { %v6227_v8 = vadd.f32 %v7997_v23, %v10169_v21  ;;  %7890 = vmatmul.mubr.bf16.gmra.mrb[168].mxu1 %v6275_v13  ;;  %v6258_v44 = vmax.f32 %v6226_v27, 0.0  ;;  %v6536_v27 = vunpack.c.h.bf16 %v7144_v20  ;;  %v7151_v20 = vld [vmem:[#allocation2 + $0x50] sm:$0xff] }
 0x464   : > { %v6225_v32 = vadd.f32 %v8000_v17, %v10169_v21  ;;  %v6256_v24 = vmax.f32 %v6224_v33, 0.0 }
 0x465   : > { %v6259_v26 = vmax.f32 %v6227_v8, 0.0 }
 0x466   : > { %v6257_v40 = vmax.f32 %v6225_v32, 0.0  ;;  %v7851_v51 = vpop.f32.mrb[44].mxu0  ;;  %v7147_v32 = vld [vmem:[#allocation2 + $0x30] sm:$0xff] }
 0x467   : > { %v8003_v16 = vadd.f32 %v10162_v55, %v7851_v51  ;;  %v6146_v15 = vpop.f32.mrb[45].mxu0  ;;  %v6277_v63 = vpack.c.bf16 %v6259_v26, %v6258_v44 }
 0x468   : > { %v8006_v48 = vadd.f32 %v10156_v56, %v6146_v15  ;;  %v7852_v14 = vpop.f32.mrb[46].mxu0  ;;  %v6276_v11 = vpack.c.bf16 %v6257_v40, %v6256_v24  ;;  %v7146_v24 = vld [vmem:[#allocation2 + $0x28] sm:$0xff]  ;;  %v6541_v15 = vunpack.c.l.bf16 %v7147_v32 }
 0x469   : > { %v6230_v31 = vadd.f32 %v8003_v16, %v10169_v21  ;;  %v8009_v4 = vadd.f32 %v10164_v42, %v7852_v14  ;;  %v6149_v9 = vpop.f32.mrb[47].mxu0  ;;  %v7143_v42 = vld [vmem:[#allocation2 + $0x10] sm:$0xff]  ;;  %v6539_v14 = vunpack.c.l.bf16 %v7146_v24 }
 0x46a   : > { %v6228_v10 = vadd.f32 %v8006_v48, %v10169_v21  ;;  %v8012_v46 = vadd.f32 %v10158_v36, %v6149_v9  ;;  %7893 = vmatprep.mubr.bf16.mxu1 %v6276_v11  ;;  %v10238_v36 = vld [vmem:[%s10367_s6] ss:$0 sm:$0xff]  ;;  %v6533_v7 = vunpack.c.l.bf16 %v7143_v42  ;;  %v6534_v12 = vunpack.c.h.bf16 %v7143_v42  ;;  %v7148_v42 = vld [vmem:[#allocation2 + $0x38] sm:$0xff] }
 0x46b   : > { %v6231_v49 = vadd.f32 %v8009_v4, %v10169_v21  ;;  %7894 = vmatmul.mubr.bf16.gmra.mrb[172].mxu1 %v6277_v63  ;;  %v6262_v60 = vmax.f32 %v6230_v31, 0.0  ;;  %v6542_v4 = vunpack.c.h.bf16 %v7147_v32 }
 0x46c   : > { %v6229_v55 = vadd.f32 %v8012_v46, %v10169_v21  ;;  %v6260_v56 = vmax.f32 %v6228_v10, 0.0  ;;  %v6540_v46 = vunpack.c.h.bf16 %v7146_v24  ;;  %v7153_v24 = vld [vmem:[#allocation2 + $0x60] sm:$0xff] }
 0x46d   : > { %v6263_v62 = vmax.f32 %v6231_v49, 0.0 }
 0x46e   : > { %v6261_v58 = vmax.f32 %v6229_v55, 0.0 }
 0x46f   : > { %v6279_v0 = vpack.c.bf16 %v6263_v62, %v6262_v60 }
 0x470   : > { %v6278_v43 = vpack.c.bf16 %v6261_v58, %v6260_v56  ;;  %v7149_v58 = vld [vmem:[#allocation2 + $0x40] sm:$0xff] }
 0x472   : > { %7897 = vmatprep.mubr.bf16.mxu1 %v6278_v43 }
 0x473   : > { %7898 = vmatmul.mubr.bf16.gmra.mrb[176].mxu1 %v6279_v0 }
 0x50e   : > { %v7871_v54 = vpop.f32.mrb[148].mxu1 }
 0x50f   : > { %v6394_v21 = vadd.f32 %v7871_v54, %v10238_v36  ;;  %v6385_v34 = vpop.f32.mrb[149].mxu1 }
 0x510   : > { %v6386_v19 = vadd.f32 %v10238_v36, %v6385_v34  ;;  %v7872_v50 = vpop.f32.mrb[150].mxu1 }
 0x511   : > { %v6565_v3 = vadd.f32 %v6533_v7, %v6394_v21  ;;  %v6397_v25 = vadd.f32 %v7872_v50, %v10238_v36  ;;  %v6388_v22 = vpop.f32.mrb[151].mxu1 }
 0x512   : > { %v6563_v53 = vadd.f32 %v6531_v59, %v6386_v19  ;;  %v6389_v29 = vadd.f32 %v10238_v36, %v6388_v22  ;;  %v6545_v59 = vunpack.c.l.bf16 %v7149_v58  ;;  %v6544_v22 = vunpack.c.h.bf16 %v7148_v42 }
 0x513   : > { %v6597_v28 = vmax.f32 %v6565_v3, 0.0  ;;  %v6566_v5 = vadd.f32 %v6534_v12, %v6397_v25  ;;  %v6543_v12 = vunpack.c.l.bf16 %v7148_v42  ;;  %v7155_v42 = vld [vmem:[#allocation2 + $0x70] sm:$0xff] }
 0x514   : > { %v6595_v45 = vmax.f32 %v6563_v53, 0.0  ;;  %v6564_v35 = vadd.f32 %v6532_v30, %v6389_v29  ;;  %v6546_v30 = vunpack.c.h.bf16 %v7149_v58 }
 0x515   : > { %6629 = vst [vmem:[%s8981_s3 + $0x10] sm:$0xff] %v6597_v28  ;;  %v6598_v18 = vmax.f32 %v6566_v5, 0.0 }
 0x516   : > { %6627 = vst [vmem:[%s8981_s3] sm:$0xff] %v6595_v45  ;;  %v6596_v39 = vmax.f32 %v6564_v35, 0.0  ;;  %v7875_v47 = vpop.f32.mrb[152].mxu1 }
 0x517   : > { %6630 = vst [vmem:[%s8981_s3 + $0x18] sm:$0xff] %v6598_v18  ;;  %v6410_v1 = vadd.f32 %v7875_v47, %v10238_v36  ;;  %v6401_v13 = vpop.f32.mrb[153].mxu1  ;;  %v7150_v18 = vld [vmem:[#allocation2 + $0x48] sm:$0xff] }
 0x518   : > { %6628 = vst [vmem:[%s8981_s3 + $0x8] sm:$0xff] %v6596_v39  ;;  %v6402_v37 = vadd.f32 %v10238_v36, %v6401_v13  ;;  %v7876_v41 = vpop.f32.mrb[154].mxu1 }
 0x519   : > { %v6569_v23 = vadd.f32 %v6537_v6, %v6410_v1  ;;  %v6413_v2 = vadd.f32 %v7876_v41, %v10238_v36  ;;  %v6404_v33 = vpop.f32.mrb[155].mxu1 }
 0x51a   : > { %v6567_v17 = vadd.f32 %v6535_v61, %v6402_v37  ;;  %v6405_v8 = vadd.f32 %v10238_v36, %v6404_v33  ;;  %v6549_v61 = vunpack.c.l.bf16 %v7151_v20  ;;  %v6548_v33 = vunpack.c.h.bf16 %v7150_v18 }
 0x51b   : > { %v6601_v44 = vmax.f32 %v6569_v23, 0.0  ;;  %v6570_v26 = vadd.f32 %v6538_v57, %v6413_v2  ;;  %v6547_v57 = vunpack.c.l.bf16 %v7150_v18  ;;  %v7157_v18 = vld [vmem:[#allocation2 + $0x80] sm:$0xff] }
 0x51c   : > { %v6599_v40 = vmax.f32 %v6567_v17, 0.0  ;;  %v6568_v51 = vadd.f32 %v6536_v27, %v6405_v8  ;;  %v6550_v27 = vunpack.c.h.bf16 %v7151_v20 }
 0x51d   : > { %6633 = vst [vmem:[%s8981_s3 + $0x30] sm:$0xff] %v6601_v44  ;;  %v6602_v16 = vmax.f32 %v6570_v26, 0.0 }
 0x51e   : > { %6631 = vst [vmem:[%s8981_s3 + $0x20] sm:$0xff] %v6599_v40  ;;  %v6600_v63 = vmax.f32 %v6568_v51, 0.0  ;;  %v7879_v48 = vpop.f32.mrb[156].mxu1 }
 0x51f   : > { %6634 = vst [vmem:[%s8981_s3 + $0x38] sm:$0xff] %v6602_v16  ;;  %v6426_v11 = vadd.f32 %v7879_v48, %v10238_v36  ;;  %v6417_v31 = vpop.f32.mrb[157].mxu1  ;;  %v7152_v16 = vld [vmem:[#allocation2 + $0x58] sm:$0xff] }
 0x520   : > { %6632 = vst [vmem:[%s8981_s3 + $0x28] sm:$0xff] %v6600_v63  ;;  %v6418_v9 = vadd.f32 %v10238_v36, %v6417_v31  ;;  %v7880_v10 = vpop.f32.mrb[158].mxu1 }
 0x521   : > { %v6573_v49 = vadd.f32 %v6541_v15, %v6426_v11  ;;  %v6429_v55 = vadd.f32 %v7880_v10, %v10238_v36  ;;  %v6420_v60 = vpop.f32.mrb[159].mxu1 }
 0x522   : > { %v6571_v62 = vadd.f32 %v6539_v14, %v6418_v9  ;;  %v6421_v56 = vadd.f32 %v10238_v36, %v6420_v60  ;;  %v6553_v14 = vunpack.c.l.bf16 %v7153_v24  ;;  %v6552_v60 = vunpack.c.h.bf16 %v7152_v16 }
 0x523   : > { %v6605_v0 = vmax.f32 %v6573_v49, 0.0  ;;  %v6574_v43 = vadd.f32 %v6542_v4, %v6429_v55  ;;  %v6551_v4 = vunpack.c.l.bf16 %v7152_v16 }
 0x524   : > { %v6603_v52 = vmax.f32 %v6571_v62, 0.0  ;;  %v6572_v7 = vadd.f32 %v6540_v46, %v6421_v56  ;;  %v6554_v46 = vunpack.c.h.bf16 %v7153_v24 }
 0x525   : > { %6637 = vst [vmem:[%s8981_s3 + $0x50] sm:$0xff] %v6605_v0  ;;  %v6606_v54 = vmax.f32 %v6574_v43, 0.0 }
 0x526   : > { %6635 = vst [vmem:[%s8981_s3 + $0x40] sm:$0xff] %v6603_v52  ;;  %v6604_v21 = vmax.f32 %v6572_v7, 0.0  ;;  %v7883_v34 = vpop.f32.mrb[160].mxu1 }
 0x527   : > { %6638 = vst [vmem:[%s8981_s3 + $0x58] sm:$0xff] %v6606_v54  ;;  %v6442_v19 = vadd.f32 %v7883_v34, %v10238_v36  ;;  %v6433_v50 = vpop.f32.mrb[161].mxu1  ;;  %v7154_v54 = vld [vmem:[#allocation2 + $0x68] sm:$0xff] }
 0x528   : > { %6636 = vst [vmem:[%s8981_s3 + $0x48] sm:$0xff] %v6604_v21  ;;  %v6434_v3 = vadd.f32 %v10238_v36, %v6433_v50  ;;  %v7884_v25 = vpop.f32.mrb[162].mxu1 }
 0x529   : > { %v6577_v53 = vadd.f32 %v6545_v59, %v6442_v19  ;;  %v6445_v29 = vadd.f32 %v7884_v25, %v10238_v36  ;;  %v6436_v38 = vpop.f32.mrb[163].mxu1 }
 0x52a   : > { %v6575_v28 = vadd.f32 %v6543_v12, %v6434_v3  ;;  %v6437_v5 = vadd.f32 %v10238_v36, %v6436_v38  ;;  %v6557_v12 = vunpack.c.l.bf16 %v7155_v42  ;;  %v6556_v38 = vunpack.c.h.bf16 %v7154_v54 }
 0x52b   : > { %v6609_v45 = vmax.f32 %v6577_v53, 0.0  ;;  %v6578_v35 = vadd.f32 %v6546_v30, %v6445_v29  ;;  %v6555_v30 = vunpack.c.l.bf16 %v7154_v54 }
 0x52c   : > { %v6607_v6 = vmax.f32 %v6575_v28, 0.0  ;;  %v6576_v39 = vadd.f32 %v6544_v22, %v6437_v5  ;;  %v6558_v22 = vunpack.c.h.bf16 %v7155_v42 }
 0x52d   : > { %6641 = vst [vmem:[%s8981_s3 + $0x70] sm:$0xff] %v6609_v45  ;;  %v6610_v47 = vmax.f32 %v6578_v35, 0.0 }
 0x52e   : > { %6639 = vst [vmem:[%s8981_s3 + $0x60] sm:$0xff] %v6607_v6  ;;  %v6608_v1 = vmax.f32 %v6576_v39, 0.0  ;;  %v7887_v13 = vpop.f32.mrb[164].mxu1 }
 0x52f   : > { %6642 = vst [vmem:[%s8981_s3 + $0x78] sm:$0xff] %v6610_v47  ;;  %v6458_v37 = vadd.f32 %v7887_v13, %v10238_v36  ;;  %v6449_v41 = vpop.f32.mrb[165].mxu1  ;;  %v7156_v47 = vld [vmem:[#allocation2 + $0x78] sm:$0xff] }
 0x530   : > { %6640 = vst [vmem:[%s8981_s3 + $0x68] sm:$0xff] %v6608_v1  ;;  %v6450_v23 = vadd.f32 %v10238_v36, %v6449_v41  ;;  %v7888_v2 = vpop.f32.mrb[166].mxu1 }
 0x531   : > { %v6581_v17 = vadd.f32 %v6549_v61, %v6458_v37  ;;  %v6461_v8 = vadd.f32 %v7888_v2, %v10238_v36  ;;  %v6452_v32 = vpop.f32.mrb[167].mxu1 }
 0x532   : > { %v6579_v44 = vadd.f32 %v6547_v57, %v6450_v23  ;;  %v6453_v26 = vadd.f32 %v10238_v36, %v6452_v32  ;;  %v6561_v57 = vunpack.c.l.bf16 %v7157_v18  ;;  %v6560_v32 = vunpack.c.h.bf16 %v7156_v47 }
 0x533   : > { %v6613_v40 = vmax.f32 %v6581_v17, 0.0  ;;  %v6582_v51 = vadd.f32 %v6550_v27, %v6461_v8  ;;  %v6559_v27 = vunpack.c.l.bf16 %v7156_v47 }
 0x534   : > { %v6611_v15 = vmax.f32 %v6579_v44, 0.0  ;;  %v6580_v63 = vadd.f32 %v6548_v33, %v6453_v26  ;;  %v6562_v33 = vunpack.c.h.bf16 %v7157_v18 }
 0x535   : > { %6645 = vst [vmem:[%s8981_s3 + $0x90] sm:$0xff] %v6613_v40  ;;  %v6614_v48 = vmax.f32 %v6582_v51, 0.0 }
 0x536   : > { %6643 = vst [vmem:[%s8981_s3 + $0x80] sm:$0xff] %v6611_v15  ;;  %v6612_v11 = vmax.f32 %v6580_v63, 0.0  ;;  %v7891_v31 = vpop.f32.mrb[168].mxu1 }
 0x537   : > { %6646 = vst [vmem:[%s8981_s3 + $0x98] sm:$0xff] %v6614_v48  ;;  %v6474_v9 = vadd.f32 %v7891_v31, %v10238_v36  ;;  %v6465_v10 = vpop.f32.mrb[169].mxu1 }
 0x538   : > { %6644 = vst [vmem:[%s8981_s3 + $0x88] sm:$0xff] %v6612_v11  ;;  %v6466_v49 = vadd.f32 %v10238_v36, %v6465_v10  ;;  %v7892_v55 = vpop.f32.mrb[170].mxu1 }
 0x539   : > { %v6585_v62 = vadd.f32 %v6553_v14, %v6474_v9  ;;  %v6477_v56 = vadd.f32 %v7892_v55, %v10238_v36  ;;  %v6468_v58 = vpop.f32.mrb[171].mxu1 }
 0x53a   : > { %v6583_v0 = vadd.f32 %v6551_v4, %v6466_v49  ;;  %v6469_v43 = vadd.f32 %v10238_v36, %v6468_v58 }
 0x53b   : > { %v6617_v52 = vmax.f32 %v6585_v62, 0.0  ;;  %v6586_v7 = vadd.f32 %v6554_v46, %v6477_v56 }
 0x53c   : > { %v6615_v59 = vmax.f32 %v6583_v0, 0.0  ;;  %v6584_v21 = vadd.f32 %v6552_v60, %v6469_v43 }
 0x53d   : > { %6649 = vst [vmem:[%s8981_s3 + $0xb0] sm:$0xff] %v6617_v52  ;;  %v6618_v34 = vmax.f32 %v6586_v7, 0.0 }
 0x53e   : > { %6647 = vst [vmem:[%s8981_s3 + $0xa0] sm:$0xff] %v6615_v59  ;;  %v6616_v19 = vmax.f32 %v6584_v21, 0.0  ;;  %v7895_v50 = vpop.f32.mrb[172].mxu1 }
 0x53f   : > { %6650 = vst [vmem:[%s8981_s3 + $0xb8] sm:$0xff] %v6618_v34  ;;  %v6490_v3 = vadd.f32 %v7895_v50, %v10238_v36  ;;  %v6481_v25 = vpop.f32.mrb[173].mxu1 }
 0x540   : > { %6648 = vst [vmem:[%s8981_s3 + $0xa8] sm:$0xff] %v6616_v19  ;;  %v6482_v53 = vadd.f32 %v10238_v36, %v6481_v25  ;;  %v7896_v29 = vpop.f32.mrb[174].mxu1 }
 0x541   : > { %v6589_v28 = vadd.f32 %v6557_v12, %v6490_v3  ;;  %v6493_v5 = vadd.f32 %v7896_v29, %v10238_v36  ;;  %v6484_v20 = vpop.f32.mrb[175].mxu1 }
 0x542   : > { %v6587_v45 = vadd.f32 %v6555_v30, %v6482_v53  ;;  %v6485_v35 = vadd.f32 %v10238_v36, %v6484_v20 }
 0x543   : > { %v6621_v6 = vmax.f32 %v6589_v28, 0.0  ;;  %v6590_v39 = vadd.f32 %v6558_v22, %v6493_v5 }
 0x544   : > { %v6619_v61 = vmax.f32 %v6587_v45, 0.0  ;;  %v6588_v1 = vadd.f32 %v6556_v38, %v6485_v35 }
 0x545   : > { %6653 = vst [vmem:[%s8981_s3 + $0xd0] sm:$0xff] %v6621_v6  ;;  %v6622_v13 = vmax.f32 %v6590_v39, 0.0 }
 0x546   : > { %6651 = vst [vmem:[%s8981_s3 + $0xc0] sm:$0xff] %v6619_v61  ;;  %v6620_v37 = vmax.f32 %v6588_v1, 0.0  ;;  %v7899_v41 = vpop.f32.mrb[176].mxu1 }
 0x547   : > { %6654 = vst [vmem:[%s8981_s3 + $0xd8] sm:$0xff] %v6622_v13  ;;  %v6506_v23 = vadd.f32 %v7899_v41, %v10238_v36  ;;  %v6497_v2 = vpop.f32.mrb[177].mxu1 }
 0x548   : > { %6652 = vst [vmem:[%s8981_s3 + $0xc8] sm:$0xff] %v6620_v37  ;;  %v6498_v17 = vadd.f32 %v10238_v36, %v6497_v2  ;;  %v7900_v8 = vpop.f32.mrb[178].mxu1 }
 0x549   : > { %v6593_v44 = vadd.f32 %v6561_v57, %v6506_v23  ;;  %v6509_v26 = vadd.f32 %v7900_v8, %v10238_v36  ;;  %v6500_v24 = vpop.f32.mrb[179].mxu1 }
 0x54a   : > { %v6591_v40 = vadd.f32 %v6559_v27, %v6498_v17  ;;  %v6501_v51 = vadd.f32 %v10238_v36, %v6500_v24 }
 0x54b   : > { %v6625_v16 = vmax.f32 %v6593_v44, 0.0  ;;  %v6594_v15 = vadd.f32 %v6562_v33, %v6509_v26 }
 0x54c   : > { %v6623_v63 = vmax.f32 %v6591_v40, 0.0  ;;  %v6592_v48 = vadd.f32 %v6560_v32, %v6501_v51 }
 0x54d   : > { %6657 = vst [vmem:[%s8981_s3 + $0xf0] sm:$0xff] %v6625_v16  ;;  %v6626_v14 = vmax.f32 %v6594_v15, 0.0 }
 0x54e   : > { %6655 = vst [vmem:[%s8981_s3 + $0xe0] sm:$0xff] %v6623_v63  ;;  %v6624_v36 = vmax.f32 %v6592_v48, 0.0 }
 0x54f   : > { %6658 = vst [vmem:[%s8981_s3 + $0xf8] sm:$0xff] %v6626_v14 }
 0x550   : > { %6656 = vst [vmem:[%s8981_s3 + $0xe8] sm:$0xff] %v6624_v36 }
 0x551   : > { %8604 = shalt.err (!%p8601_p2)
}
 0x552   : > { %s8605_s19 = scalar_lea.hbm %s10306_s8, 4096  ;;  %s8609_s26 = scalar_lea.hbm %s10368_s7, 8192 }
 0x553   : > { %p8606_p3 = scmp.ne.s32.totalorder %s10306_s8, %s8605_s19  ;;  %p8610_p7 = scmp.lt.u32.totalorder %s10306_s8, %s10368_s7 }
 0x554   : > { %p8611_p9 = scmp.lt.u32.totalorder %s8609_s26, %s8605_s19  ;;  %p8613_p4 = scmp.lt.u32.totalorder %s8605_s19, %s10306_s8 }
 0x555   : > { %p8607_p5 = pnand %p8606_p3, %p10479_p1 }
 0x556   : > { %p8612_p12 = por %p8611_p9, %p8610_p7 }
 0x557   : > { %p8608_p6 = pneg %p8607_p5 }
 0x558   : > { %p8614_p13 = por %p8613_p4, %p8612_p12 }
 0x55a   : > { %p8615_p8 = pnand %p8614_p13, %p8608_p6 }
 0x55c   : > { %8618 = shalt.err (!%p8615_p8)
}
 0x55d   : > { %s8689_s22 = smov 128   ;;  %s8690_s23 = smov 8  }
 0x55e   : > { %8089 = dma.vmem_to_hbm [thread:$0]  (%p10479_p1), %s10308_s18, 4096, %s10306_s8, %s10315_s27, %s8689_s22, %s8689_s22, %s8690_s23  }
 0x55f PF: > { %p8111_p10 = scmp.ge.s32.totalorder %s8679_s29, 2  ;;  %s6692_s28 = sand.u32 1, %s8659_s24  }
 0x560   : > { %p10480_p11 = scmp.ne.s32.totalorder %s10391_s13, 0  ;;  %s6693_s14 = scalar_lea.sflag [#allocation7], %s6692_s28 }
 0x562   : > { %p8102_p0 = pnand %p8111_p10, %p10480_p11 }
 0x564   : > { %8654 = dma.done.wait (!%p8102_p0), %s6693_s14, 4096  }
 0x565   : > { %8656 = vsyncadd (!%p8102_p0), %s6693_s14, 4294963200  ;;  %s22_s29 = sadd.s32 1, %s8679_s29   ;;  %s10481_s30 = sld [smem:[#allocation22_spill]] }
 0x566   : > { %p19_p2 = scmp.ge.s32.totalorder %s22_s29, 4   ;;  %s10482_s26 = sld [smem:[#allocation25_spill]] }
 0x567   : > { %s10483_s27 = sld [smem:[#allocation23_spill]]  ;;  %s10484_s28 = sld [smem:[#allocation24_spill]] }
 0x568   : > { %s10485_s24 = smov %s8663_s25  ;;  %21 = sbr.rel (!%p19_p2) target bundleno = 8 (0x8), region = 115 }
 0x56b   : > { %s10486_s25 = smov %s10481_s30 }
 0x56f   :  { %6698 = vsyncpa [#allocation6], 1 }
 0x570   :  { %6700 = vsyncpa [#allocation6 + $0x1], 1 }
 0x571   :  { %6701 = vsyncpa [#allocation9], 1 }
 0x572   :  { %6702 = vsyncpa [#allocation7], 1 }
 0x573   :  { %6704 = vsyncpa [#allocation7 + $0x1], 1 }
 0x574   :  { %6705 = vsyncmov [#allocation3] }
 0x577   :  { %s6706_s11 = vpop.sfrf %6705 }
 0x578   :  { %p7163_p1 = scmp.ne.s32.totalorder %s6706_s11, 0 }
 0x57a   :  { %6710 = shalt.err (%p7163_p1)  }
 0x57b   :  { %6712 = vsyncmov [#allocation3 + $0x1] }
 0x57e   :  { %s6713_s13 = vpop.sfrf %6712 }
 0x57f   :  { %p7164_p3 = scmp.ne.s32.totalorder %s6713_s13, 0 }
 0x581   :  { %6717 = shalt.err (%p7164_p3)  }

</bundles_post_ra>
